<compile_context>
chip_gen: v6e
topology: v6e:2x2x1
jax: 0.10.0
libtpu: 0.0.40
codegen_flags: <defaults>
</compile_context>

<pallas_src>
import functools

import jax
import jax.numpy as jnp
from jax.experimental import pallas as pl
from jax.experimental.pallas import tpu as pltpu


# M-tile for the matmul grid. bf16 rows * largest K here (3136) ~ 3.2 MiB per
# buffer; double-buffered it is far inside v7x's 64 MiB VMEM and tiny on
# v5e/v6e (128 MiB), while still >=512 rows to amortize per-step overhead.
TILE_M = 512


def _round_up(x, m):
    return ((x + m - 1) // m) * m


# ---------------------------------------------------------------------------
# Pallas kernel: fused matmul (bf16 operands, fp32 accum) + bias + activation
# ---------------------------------------------------------------------------
def _matmul_bias_act_kernel(x_ref, w_ref, b_ref, o_ref, *, act):
    y = jnp.dot(x_ref[...], w_ref[...], preferred_element_type=jnp.float32)
    y = y + b_ref[...]
    if act == "relu":
        y = jnp.maximum(y, 0.0)
    elif act == "tanh":
        y = jnp.tanh(y)
    o_ref[...] = y.astype(o_ref.dtype)


def pallas_matmul_bias_act(x, w, b, act="none", out_dtype=jnp.bfloat16):
    """x: [M, K] float, w: [K, N] bf16 (pre-packed), b: [1, N] fp32 -> [M, N]."""
    M, K = x.shape
    K2, N = w.shape
    assert K == K2 and b.shape == (1, N)

    x = x.astype(jnp.bfloat16)

    # Tile only M. K and N blocks are full-extent (legal regardless of the
    # (8,128) rule, and avoids any HBM-side zero padding of K/N).
    tm = min(TILE_M, _round_up(M, 8))
    Mp = _round_up(M, tm)
    if Mp != M:
        x = jnp.pad(x, ((0, Mp - M), (0, 0)))  # zero rows, sliced off below

    out = pl.pallas_call(
        functools.partial(_matmul_bias_act_kernel, act=act),
        out_shape=jax.ShapeDtypeStruct((Mp, N), out_dtype),
        grid=(Mp // tm,),
        in_specs=[
            pl.BlockSpec((tm, K), lambda i: (i, 0)),
            pl.BlockSpec((K, N), lambda i: (0, 0)),
            pl.BlockSpec((1, N), lambda i: (0, 0)),
        ],
        out_specs=pl.BlockSpec((tm, N), lambda i: (i, 0)),
        compiler_params=pltpu.CompilerParams(
            dimension_semantics=("parallel",),
        ),
    )(x, w, b)
    return out[:M] if Mp != M else out


# ---------------------------------------------------------------------------
# Plain-JAX glue (data rearrangement only), NHWC / channels-last throughout
# ---------------------------------------------------------------------------
def _im2col_nhwc(x, kh, kw, stride, pad_t, pad_b, pad_l, pad_r):
    """NHWC -> ([B*Ho*Wo, kh*kw*C], Ho, Wo). K ordering = i*(kw*C) + j*C + c."""
    B, H, W, C = x.shape
    if pad_t or pad_b or pad_l or pad_r:
        x = jnp.pad(x, ((0, 0), (pad_t, pad_b), (pad_l, pad_r), (0, 0)))
    Hp, Wp = H + pad_t + pad_b, W + pad_l + pad_r
    Ho = (Hp - kh) // stride + 1
    Wo = (Wp - kw) // stride + 1
    patches = [
        x[:, i:i + stride * Ho:stride, j:j + stride * Wo:stride, :]
        for i in range(kh) for j in range(kw)
    ]
    col = jnp.concatenate(patches, axis=-1)            # [B, Ho, Wo, kh*kw*C]
    return col.reshape(B * Ho * Wo, kh * kw * C), Ho, Wo


def _dilate_pad_nhwc(x, s, pt, pb, p_l, p_r):
    """Zero-dilate spatially by s and edge-pad in a single scatter."""
    B, H, W, C = x.shape
    Hd, Wd = (H - 1) * s + 1, (W - 1) * s + 1
    out = jnp.zeros((B, Hd + pt + pb, Wd + p_l + p_r, C), x.dtype)
    return out.at[:, pt:pt + Hd:s, p_l:p_l + Wd:s, :].set(x)


# ---------------------------------------------------------------------------
# Conv / ConvTranspose layers driven by the Pallas matmul kernel
# ---------------------------------------------------------------------------
def conv2d_nhwc(x, w2d, b, kh, kw, stride, padding, act, out_dtype=jnp.bfloat16):
    B = x.shape[0]
    col, Ho, Wo = _im2col_nhwc(x, kh, kw, stride, padding, padding, padding, padding)
    y = pallas_matmul_bias_act(col, w2d, b, act, out_dtype)
    return y.reshape(B, Ho, Wo, w2d.shape[1])


def conv_transpose2d_nhwc(x, w2d, b, kh, kw, stride, padding, output_padding, act,
                          out_dtype=jnp.bfloat16):
    """Exact PyTorch ConvTranspose2d: stride-1 conv on the zero-dilated,
    asymmetrically padded input with the pre-flipped weight matrix."""
    B = x.shape[0]
    pt = kh - 1 - padding
    pb = kh - 1 - padding + output_padding
    p_l = kw - 1 - padding
    p_r = kw - 1 - padding + output_padding
    xd = _dilate_pad_nhwc(x, stride, pt, pb, p_l, p_r)
    col, Ho, Wo = _im2col_nhwc(xd, kh, kw, 1, 0, 0, 0, 0)
    y = pallas_matmul_bias_act(col, w2d, b, act, out_dtype)
    return y.reshape(B, Ho, Wo, w2d.shape[1])


# ---------------------------------------------------------------------------
# Parameters: PyTorch-layout init, one-time repack into matmul-ready matrices
# ---------------------------------------------------------------------------
def init_params(key):
    def conv_w(key, shape):
        fan_in = shape[1] * shape[2] * shape[3]
        return (jax.random.normal(key, shape, jnp.float32) / jnp.sqrt(fan_in))

    keys = jax.random.split(key, 12)
    return {
        # encoder (Conv2d layout: [Cout, Cin, kh, kw])
        "e1_w": conv_w(keys[0], (16, 1, 3, 3)),
        "e1_b": 0.01 * jax.random.normal(keys[1], (16,), jnp.float32),
        "e2_w": conv_w(keys[2], (32, 16, 3, 3)),
        "e2_b": 0.01 * jax.random.normal(keys[3], (32,), jnp.float32),
        "e3_w": conv_w(keys[4], (64, 32, 7, 7)),
        "e3_b": 0.01 * jax.random.normal(keys[5], (64,), jnp.float32),
        # decoder (ConvTranspose2d layout: [Cin, Cout, kh, kw])
        "d1_w": conv_w(keys[6], (64, 32, 7, 7)),
        "d1_b": 0.01 * jax.random.normal(keys[7], (32,), jnp.float32),
        "d2_w": conv_w(keys[8], (32, 16, 3, 3)),
        "d2_b": 0.01 * jax.random.normal(keys[9], (16,), jnp.float32),
        "d3_w": conv_w(keys[10], (16, 1, 3, 3)),
        "d3_b": 0.01 * jax.random.normal(keys[11], (1,), jnp.float32),
    }


def prepare_params(p):
    """One-time repack: DMA-ready bf16 weight matrices, row order i*(kw*C)+j*C+c."""
    def conv_wmat(w):        # [Cout, Cin, kh, kw] -> [kh*kw*Cin, Cout]
        return jnp.transpose(w, (2, 3, 1, 0)).reshape(-1, w.shape[0]).astype(jnp.bfloat16)

    def convT_wmat(w):       # [Cin, Cout, kh, kw] -> spatial flip -> [kh*kw*Cin, Cout]
        wf = jnp.flip(w, axis=(2, 3))
        return jnp.transpose(wf, (2, 3, 0, 1)).reshape(-1, w.shape[1]).astype(jnp.bfloat16)

    def bias(b):
        return b.astype(jnp.float32).reshape(1, -1)

    return {
        "e1_w": conv_wmat(p["e1_w"]), "e1_b": bias(p["e1_b"]),
        "e2_w": conv_wmat(p["e2_w"]), "e2_b": bias(p["e2_b"]),
        "e3_w": conv_wmat(p["e3_w"]), "e3_b": bias(p["e3_b"]),
        "d1_w": convT_wmat(p["d1_w"]), "d1_b": bias(p["d1_b"]),
        "d2_w": convT_wmat(p["d2_w"]), "d2_b": bias(p["d2_b"]),
        "d3_w": convT_wmat(p["d3_w"]), "d3_b": bias(p["d3_b"]),
    }


# ---------------------------------------------------------------------------
# Forward pass (NCHW in/out, NHWC + bf16 internally)
# ---------------------------------------------------------------------------
def autoencoder_forward(wp, x_nchw):
    x = jnp.transpose(x_nchw, (0, 2, 3, 1)).astype(jnp.bfloat16)   # -> NHWC
    # encoder
    h = conv2d_nhwc(x, wp["e1_w"], wp["e1_b"], 3, 3, 2, 1, "relu")
    h = conv2d_nhwc(h, wp["e2_w"], wp["e2_b"], 3, 3, 2, 1, "relu")
    h = conv2d_nhwc(h, wp["e3_w"], wp["e3_b"], 7, 7, 1, 0, "none")
    # decoder
    h = conv_transpose2d_nhwc(h, wp["d1_w"], wp["d1_b"], 7, 7, 1, 0, 0, "relu")
    h = conv_transpose2d_nhwc(h, wp["d2_w"], wp["d2_b"], 3, 3, 2, 1, 1, "relu")
    h = conv_transpose2d_nhwc(h, wp["d3_w"], wp["d3_b"], 3, 3, 2, 1, 1, "tanh",
                              out_dtype=jnp.float32)
    return jnp.transpose(h, (0, 3, 1, 2))                          # -> NCHW, fp32


if __name__ == "__main__":
    key = jax.random.PRNGKey(0)
    pkey, xkey = jax.random.split(key)
    params = init_params(pkey)
    weight_pack = prepare_params(params)   # one-time weight repack (not per-forward)

    # MNIST-style input the architecture implies: [B, 1, 28, 28]
    x = jax.random.normal(xkey, (2, 1, 28, 28), jnp.float32)

    fwd = jax.jit(autoencoder_forward)
    out = jax.block_until_ready(fwd(weight_pack, x))

    assert out.shape == (2, 1, 28, 28), out.shape
    assert out.dtype == jnp.float32
    assert bool(jnp.all(jnp.isfinite(out)))
    assert bool(jnp.all(jnp.abs(out) <= 1.0))  # tanh output range
    print("KERNEL_OK")
</pallas_src>

<mosaic_0001>
module attributes {stable_mosaic.version = 11 : i64} {
  func.func @_matmul_bias_act_kernel(%arg0: i32, %arg1: memref<392x9xbf16, #tpu.memory_space<vmem>>, %arg2: memref<9x16xbf16, #tpu.memory_space<vmem>>, %arg3: memref<1x16xf32, #tpu.memory_space<vmem>>, %arg4: memref<392x16xbf16, #tpu.memory_space<vmem>>) attributes {dimension_semantics = [#tpu.dimension_semantics<parallel>], iteration_bounds = array<i64: 1>, scalar_prefetch = 0 : i64, scratch_operands = 0 : i64, tpu.core_type = #tpu.core_type<tc>, window_params = [{transform_indices = @transform_0, window_bounds = array<i64: 392, 9>}, {pipeline_mode = #tpu.pipeline_mode<synchronous>, transform_indices = @transform_1, window_bounds = array<i64: 9, 16>}, {pipeline_mode = #tpu.pipeline_mode<synchronous>, transform_indices = @transform_2, window_bounds = array<i64: 1, 16>}, {transform_indices = @transform_3, window_bounds = array<i64: 392, 16>}]} {
    %c0 = arith.constant 0 : index
    %c0_0 = arith.constant 0 : index
    %0 = vector.load %arg1[%c0, %c0_0] : memref<392x9xbf16, #tpu.memory_space<vmem>>, vector<392x9xbf16>
    %c0_1 = arith.constant 0 : index
    %c0_2 = arith.constant 0 : index
    %1 = vector.load %arg2[%c0_1, %c0_2] : memref<9x16xbf16, #tpu.memory_space<vmem>>, vector<9x16xbf16>
    %cst = arith.constant dense<0.000000e+00> : vector<392x16xf32>
    %2 = tpu.matmul %0, %1, %cst {dimension_numbers = #tpu.dot_dimension_numbers<[1], [0], [0], [1], [0, 0, 1, 1], [], []>} : vector<392x9xbf16>, vector<9x16xbf16>, vector<392x16xf32> -> vector<392x16xf32>
    %c0_3 = arith.constant 0 : index
    %c0_4 = arith.constant 0 : index
    %3 = vector.load %arg3[%c0_3, %c0_4] : memref<1x16xf32, #tpu.memory_space<vmem>>, vector<1x16xf32>
    %4 = vector.broadcast %3 : vector<1x16xf32> to vector<392x16xf32>
    %5 = arith.addf %2, %4 : vector<392x16xf32>
    %cst_5 = arith.constant 0.000000e+00 : f32
    %6 = vector.broadcast %cst_5 : f32 to vector<392x16xf32>
    %7 = arith.maximumf %5, %6 : vector<392x16xf32>
    %8 = arith.truncf %7 : vector<392x16xf32> to vector<392x16xbf16>
    %c0_6 = arith.constant 0 : index
    %c0_7 = arith.constant 0 : index
    %9 = vector.load %arg4[%c0_6, %c0_7] : memref<392x16xbf16, #tpu.memory_space<vmem>>, vector<392x16xbf16>
    tpu.vector_store %arg4[%c0_6, %c0_7], %8 {strides = array<i32>} : memref<392x16xbf16, #tpu.memory_space<vmem>>, vector<392x16xbf16>,
    return
  }
  func.func @transform_0(%arg0: i32) -> (i32, i32) {
    %c0_i32 = arith.constant 0 : i32
    %c0_i32_0 = arith.constant 0 : i32
    return %arg0, %c0_i32 : i32, i32
  }
  func.func @transform_1(%arg0: i32) -> (i32, i32) {
    %c0_i32 = arith.constant 0 : i32
    %c0_i32_0 = arith.constant 0 : i32
    %c0_i32_1 = arith.constant 0 : i32
    return %c0_i32, %c0_i32_0 : i32, i32
  }
  func.func @transform_2(%arg0: i32) -> (i32, i32) {
    %c0_i32 = arith.constant 0 : i32
    %c0_i32_0 = arith.constant 0 : i32
    %c0_i32_1 = arith.constant 0 : i32
    return %c0_i32, %c0_i32_0 : i32, i32
  }
  func.func @transform_3(%arg0: i32) -> (i32, i32) {
    %c0_i32 = arith.constant 0 : i32
    %c0_i32_0 = arith.constant 0 : i32
    return %arg0, %c0_i32 : i32, i32
  }
}

module attributes {stable_mosaic.version = 11 : i64} {
  func.func @_matmul_bias_act_kernel(%arg0: i32, %arg1: memref<104x144xbf16, #tpu.memory_space<vmem>>, %arg2: memref<144x32xbf16, #tpu.memory_space<vmem>>, %arg3: memref<1x32xf32, #tpu.memory_space<vmem>>, %arg4: memref<104x32xbf16, #tpu.memory_space<vmem>>) attributes {dimension_semantics = [#tpu.dimension_semantics<parallel>], iteration_bounds = array<i64: 1>, scalar_prefetch = 0 : i64, scratch_operands = 0 : i64, tpu.core_type = #tpu.core_type<tc>, window_params = [{transform_indices = @transform_0, window_bounds = array<i64: 104, 144>}, {pipeline_mode = #tpu.pipeline_mode<synchronous>, transform_indices = @transform_1, window_bounds = array<i64: 144, 32>}, {pipeline_mode = #tpu.pipeline_mode<synchronous>, transform_indices = @transform_2, window_bounds = array<i64: 1, 32>}, {transform_indices = @transform_3, window_bounds = array<i64: 104, 32>}]} {
    %c0 = arith.constant 0 : index
    %c0_0 = arith.constant 0 : index
    %0 = vector.load %arg1[%c0, %c0_0] : memref<104x144xbf16, #tpu.memory_space<vmem>>, vector<104x144xbf16>
    %c0_1 = arith.constant 0 : index
    %c0_2 = arith.constant 0 : index
    %1 = vector.load %arg2[%c0_1, %c0_2] : memref<144x32xbf16, #tpu.memory_space<vmem>>, vector<144x32xbf16>
    %cst = arith.constant dense<0.000000e+00> : vector<104x32xf32>
    %2 = tpu.matmul %0, %1, %cst {dimension_numbers = #tpu.dot_dimension_numbers<[1], [0], [0], [1], [0, 0, 1, 1], [], []>} : vector<104x144xbf16>, vector<144x32xbf16>, vector<104x32xf32> -> vector<104x32xf32>
    %c0_3 = arith.constant 0 : index
    %c0_4 = arith.constant 0 : index
    %3 = vector.load %arg3[%c0_3, %c0_4] : memref<1x32xf32, #tpu.memory_space<vmem>>, vector<1x32xf32>
    %4 = vector.broadcast %3 : vector<1x32xf32> to vector<104x32xf32>
    %5 = arith.addf %2, %4 : vector<104x32xf32>
    %cst_5 = arith.constant 0.000000e+00 : f32
    %6 = vector.broadcast %cst_5 : f32 to vector<104x32xf32>
    %7 = arith.maximumf %5, %6 : vector<104x32xf32>
    %8 = arith.truncf %7 : vector<104x32xf32> to vector<104x32xbf16>
    %c0_6 = arith.constant 0 : index
    %c0_7 = arith.constant 0 : index
    %9 = vector.load %arg4[%c0_6, %c0_7] : memref<104x32xbf16, #tpu.memory_space<vmem>>, vector<104x32xbf16>
    tpu.vector_store %arg4[%c0_6, %c0_7], %8 {strides = array<i32>} : memref<104x32xbf16, #tpu.memory_space<vmem>>, vector<104x32xbf16>,
    return
  }
  func.func @transform_0(%arg0: i32) -> (i32, i32) {
    %c0_i32 = arith.constant 0 : i32
    %c0_i32_0 = arith.constant 0 : i32
    return %arg0, %c0_i32 : i32, i32
  }
  func.func @transform_1(%arg0: i32) -> (i32, i32) {
    %c0_i32 = arith.constant 0 : i32
    %c0_i32_0 = arith.constant 0 : i32
    %c0_i32_1 = arith.constant 0 : i32
    return %c0_i32, %c0_i32_0 : i32, i32
  }
  func.func @transform_2(%arg0: i32) -> (i32, i32) {
    %c0_i32 = arith.constant 0 : i32
    %c0_i32_0 = arith.constant 0 : i32
    %c0_i32_1 = arith.constant 0 : i32
    return %c0_i32, %c0_i32_0 : i32, i32
  }
  func.func @transform_3(%arg0: i32) -> (i32, i32) {
    %c0_i32 = arith.constant 0 : i32
    %c0_i32_0 = arith.constant 0 : i32
    return %arg0, %c0_i32 : i32, i32
  }
}

module attributes {stable_mosaic.version = 11 : i64} {
  func.func @_matmul_bias_act_kernel(%arg0: i32, %arg1: memref<8x1568xbf16, #tpu.memory_space<vmem>>, %arg2: memref<1568x64xbf16, #tpu.memory_space<vmem>>, %arg3: memref<1x64xf32, #tpu.memory_space<vmem>>, %arg4: memref<8x64xbf16, #tpu.memory_space<vmem>>) attributes {dimension_semantics = [#tpu.dimension_semantics<parallel>], iteration_bounds = array<i64: 1>, scalar_prefetch = 0 : i64, scratch_operands = 0 : i64, tpu.core_type = #tpu.core_type<tc>, window_params = [{transform_indices = @transform_0, window_bounds = array<i64: 8, 1568>}, {pipeline_mode = #tpu.pipeline_mode<synchronous>, transform_indices = @transform_1, window_bounds = array<i64: 1568, 64>}, {pipeline_mode = #tpu.pipeline_mode<synchronous>, transform_indices = @transform_2, window_bounds = array<i64: 1, 64>}, {transform_indices = @transform_3, window_bounds = array<i64: 8, 64>}]} {
    %c0 = arith.constant 0 : index
    %c0_0 = arith.constant 0 : index
    %0 = vector.load %arg1[%c0, %c0_0] : memref<8x1568xbf16, #tpu.memory_space<vmem>>, vector<8x1568xbf16>
    %c0_1 = arith.constant 0 : index
    %c0_2 = arith.constant 0 : index
    %1 = vector.load %arg2[%c0_1, %c0_2] : memref<1568x64xbf16, #tpu.memory_space<vmem>>, vector<1568x64xbf16>
    %cst = arith.constant dense<0.000000e+00> : vector<8x64xf32>
    %2 = tpu.matmul %0, %1, %cst {dimension_numbers = #tpu.dot_dimension_numbers<[1], [0], [0], [1], [0, 0, 1, 1], [], []>} : vector<8x1568xbf16>, vector<1568x64xbf16>, vector<8x64xf32> -> vector<8x64xf32>
    %c0_3 = arith.constant 0 : index
    %c0_4 = arith.constant 0 : index
    %3 = vector.load %arg3[%c0_3, %c0_4] : memref<1x64xf32, #tpu.memory_space<vmem>>, vector<1x64xf32>
    %4 = vector.broadcast %3 : vector<1x64xf32> to vector<8x64xf32>
    %5 = arith.addf %2, %4 : vector<8x64xf32>
    %6 = arith.truncf %5 : vector<8x64xf32> to vector<8x64xbf16>
    %c0_5 = arith.constant 0 : index
    %c0_6 = arith.constant 0 : index
    %7 = vector.load %arg4[%c0_5, %c0_6] : memref<8x64xbf16, #tpu.memory_space<vmem>>, vector<8x64xbf16>
    tpu.vector_store %arg4[%c0_5, %c0_6], %6 {strides = array<i32>} : memref<8x64xbf16, #tpu.memory_space<vmem>>, vector<8x64xbf16>,
    return
  }
  func.func @transform_0(%arg0: i32) -> (i32, i32) {
    %c0_i32 = arith.constant 0 : i32
    %c0_i32_0 = arith.constant 0 : i32
    return %arg0, %c0_i32 : i32, i32
  }
  func.func @transform_1(%arg0: i32) -> (i32, i32) {
    %c0_i32 = arith.constant 0 : i32
    %c0_i32_0 = arith.constant 0 : i32
    %c0_i32_1 = arith.constant 0 : i32
    return %c0_i32, %c0_i32_0 : i32, i32
  }
  func.func @transform_2(%arg0: i32) -> (i32, i32) {
    %c0_i32 = arith.constant 0 : i32
    %c0_i32_0 = arith.constant 0 : i32
    %c0_i32_1 = arith.constant 0 : i32
    return %c0_i32, %c0_i32_0 : i32, i32
  }
  func.func @transform_3(%arg0: i32) -> (i32, i32) {
    %c0_i32 = arith.constant 0 : i32
    %c0_i32_0 = arith.constant 0 : i32
    return %arg0, %c0_i32 : i32, i32
  }
}

module attributes {stable_mosaic.version = 11 : i64} {
  func.func @_matmul_bias_act_kernel(%arg0: i32, %arg1: memref<104x3136xbf16, #tpu.memory_space<vmem>>, %arg2: memref<3136x32xbf16, #tpu.memory_space<vmem>>, %arg3: memref<1x32xf32, #tpu.memory_space<vmem>>, %arg4: memref<104x32xbf16, #tpu.memory_space<vmem>>) attributes {dimension_semantics = [#tpu.dimension_semantics<parallel>], iteration_bounds = array<i64: 1>, scalar_prefetch = 0 : i64, scratch_operands = 0 : i64, tpu.core_type = #tpu.core_type<tc>, window_params = [{transform_indices = @transform_0, window_bounds = array<i64: 104, 3136>}, {pipeline_mode = #tpu.pipeline_mode<synchronous>, transform_indices = @transform_1, window_bounds = array<i64: 3136, 32>}, {pipeline_mode = #tpu.pipeline_mode<synchronous>, transform_indices = @transform_2, window_bounds = array<i64: 1, 32>}, {transform_indices = @transform_3, window_bounds = array<i64: 104, 32>}]} {
    %c0 = arith.constant 0 : index
    %c0_0 = arith.constant 0 : index
    %0 = vector.load %arg1[%c0, %c0_0] : memref<104x3136xbf16, #tpu.memory_space<vmem>>, vector<104x3136xbf16>
    %c0_1 = arith.constant 0 : index
    %c0_2 = arith.constant 0 : index
    %1 = vector.load %arg2[%c0_1, %c0_2] : memref<3136x32xbf16, #tpu.memory_space<vmem>>, vector<3136x32xbf16>
    %cst = arith.constant dense<0.000000e+00> : vector<104x32xf32>
    %2 = tpu.matmul %0, %1, %cst {dimension_numbers = #tpu.dot_dimension_numbers<[1], [0], [0], [1], [0, 0, 1, 1], [], []>} : vector<104x3136xbf16>, vector<3136x32xbf16>, vector<104x32xf32> -> vector<104x32xf32>
    %c0_3 = arith.constant 0 : index
    %c0_4 = arith.constant 0 : index
    %3 = vector.load %arg3[%c0_3, %c0_4] : memref<1x32xf32, #tpu.memory_space<vmem>>, vector<1x32xf32>
    %4 = vector.broadcast %3 : vector<1x32xf32> to vector<104x32xf32>
    %5 = arith.addf %2, %4 : vector<104x32xf32>
    %cst_5 = arith.constant 0.000000e+00 : f32
    %6 = vector.broadcast %cst_5 : f32 to vector<104x32xf32>
    %7 = arith.maximumf %5, %6 : vector<104x32xf32>
    %8 = arith.truncf %7 : vector<104x32xf32> to vector<104x32xbf16>
    %c0_6 = arith.constant 0 : index
    %c0_7 = arith.constant 0 : index
    %9 = vector.load %arg4[%c0_6, %c0_7] : memref<104x32xbf16, #tpu.memory_space<vmem>>, vector<104x32xbf16>
    tpu.vector_store %arg4[%c0_6, %c0_7], %8 {strides = array<i32>} : memref<104x32xbf16, #tpu.memory_space<vmem>>, vector<104x32xbf16>,
    return
  }
  func.func @transform_0(%arg0: i32) -> (i32, i32) {
    %c0_i32 = arith.constant 0 : i32
    %c0_i32_0 = arith.constant 0 : i32
    return %arg0, %c0_i32 : i32, i32
  }
  func.func @transform_1(%arg0: i32) -> (i32, i32) {
    %c0_i32 = arith.constant 0 : i32
    %c0_i32_0 = arith.constant 0 : i32
    %c0_i32_1 = arith.constant 0 : i32
    return %c0_i32, %c0_i32_0 : i32, i32
  }
  func.func @transform_2(%arg0: i32) -> (i32, i32) {
    %c0_i32 = arith.constant 0 : i32
    %c0_i32_0 = arith.constant 0 : i32
    %c0_i32_1 = arith.constant 0 : i32
    return %c0_i32, %c0_i32_0 : i32, i32
  }
  func.func @transform_3(%arg0: i32) -> (i32, i32) {
    %c0_i32 = arith.constant 0 : i32
    %c0_i32_0 = arith.constant 0 : i32
    return %arg0, %c0_i32 : i32, i32
  }
}

module attributes {stable_mosaic.version = 11 : i64} {
  func.func @_matmul_bias_act_kernel(%arg0: i32, %arg1: memref<392x288xbf16, #tpu.memory_space<vmem>>, %arg2: memref<288x16xbf16, #tpu.memory_space<vmem>>, %arg3: memref<1x16xf32, #tpu.memory_space<vmem>>, %arg4: memref<392x16xbf16, #tpu.memory_space<vmem>>) attributes {dimension_semantics = [#tpu.dimension_semantics<parallel>], iteration_bounds = array<i64: 1>, scalar_prefetch = 0 : i64, scratch_operands = 0 : i64, tpu.core_type = #tpu.core_type<tc>, window_params = [{transform_indices = @transform_0, window_bounds = array<i64: 392, 288>}, {pipeline_mode = #tpu.pipeline_mode<synchronous>, transform_indices = @transform_1, window_bounds = array<i64: 288, 16>}, {pipeline_mode = #tpu.pipeline_mode<synchronous>, transform_indices = @transform_2, window_bounds = array<i64: 1, 16>}, {transform_indices = @transform_3, window_bounds = array<i64: 392, 16>}]} {
    %c0 = arith.constant 0 : index
    %c0_0 = arith.constant 0 : index
    %0 = vector.load %arg1[%c0, %c0_0] : memref<392x288xbf16, #tpu.memory_space<vmem>>, vector<392x288xbf16>
    %c0_1 = arith.constant 0 : index
    %c0_2 = arith.constant 0 : index
    %1 = vector.load %arg2[%c0_1, %c0_2] : memref<288x16xbf16, #tpu.memory_space<vmem>>, vector<288x16xbf16>
    %cst = arith.constant dense<0.000000e+00> : vector<392x16xf32>
    %2 = tpu.matmul %0, %1, %cst {dimension_numbers = #tpu.dot_dimension_numbers<[1], [0], [0], [1], [0, 0, 1, 1], [], []>} : vector<392x288xbf16>, vector<288x16xbf16>, vector<392x16xf32> -> vector<392x16xf32>
    %c0_3 = arith.constant 0 : index
    %c0_4 = arith.constant 0 : index
    %3 = vector.load %arg3[%c0_3, %c0_4] : memref<1x16xf32, #tpu.memory_space<vmem>>, vector<1x16xf32>
    %4 = vector.broadcast %3 : vector<1x16xf32> to vector<392x16xf32>
    %5 = arith.addf %2, %4 : vector<392x16xf32>
    %cst_5 = arith.constant 0.000000e+00 : f32
    %6 = vector.broadcast %cst_5 : f32 to vector<392x16xf32>
    %7 = arith.maximumf %5, %6 : vector<392x16xf32>
    %8 = arith.truncf %7 : vector<392x16xf32> to vector<392x16xbf16>
    %c0_6 = arith.constant 0 : index
    %c0_7 = arith.constant 0 : index
    %9 = vector.load %arg4[%c0_6, %c0_7] : memref<392x16xbf16, #tpu.memory_space<vmem>>, vector<392x16xbf16>
    tpu.vector_store %arg4[%c0_6, %c0_7], %8 {strides = array<i32>} : memref<392x16xbf16, #tpu.memory_space<vmem>>, vector<392x16xbf16>,
    return
  }
  func.func @transform_0(%arg0: i32) -> (i32, i32) {
    %c0_i32 = arith.constant 0 : i32
    %c0_i32_0 = arith.constant 0 : i32
    return %arg0, %c0_i32 : i32, i32
  }
  func.func @transform_1(%arg0: i32) -> (i32, i32) {
    %c0_i32 = arith.constant 0 : i32
    %c0_i32_0 = arith.constant 0 : i32
    %c0_i32_1 = arith.constant 0 : i32
    return %c0_i32, %c0_i32_0 : i32, i32
  }
  func.func @transform_2(%arg0: i32) -> (i32, i32) {
    %c0_i32 = arith.constant 0 : i32
    %c0_i32_0 = arith.constant 0 : i32
    %c0_i32_1 = arith.constant 0 : i32
    return %c0_i32, %c0_i32_0 : i32, i32
  }
  func.func @transform_3(%arg0: i32) -> (i32, i32) {
    %c0_i32 = arith.constant 0 : i32
    %c0_i32_0 = arith.constant 0 : i32
    return %arg0, %c0_i32 : i32, i32
  }
}

module attributes {stable_mosaic.version = 11 : i64} {
  func.func @_matmul_bias_act_kernel(%arg0: i32, %arg1: memref<512x144xbf16, #tpu.memory_space<vmem>>, %arg2: memref<144x1xbf16, #tpu.memory_space<vmem>>, %arg3: memref<1x1xf32, #tpu.memory_space<vmem>>, %arg4: memref<512x1xf32, #tpu.memory_space<vmem>>) attributes {dimension_semantics = [#tpu.dimension_semantics<parallel>], iteration_bounds = array<i64: 4>, scalar_prefetch = 0 : i64, scratch_operands = 0 : i64, tpu.core_type = #tpu.core_type<tc>, window_params = [{transform_indices = @transform_0, window_bounds = array<i64: 512, 144>}, {pipeline_mode = #tpu.pipeline_mode<synchronous>, transform_indices = @transform_1, window_bounds = array<i64: 144, 1>}, {pipeline_mode = #tpu.pipeline_mode<synchronous>, transform_indices = @transform_2, window_bounds = array<i64: 1, 1>}, {transform_indices = @transform_3, window_bounds = array<i64: 512, 1>}]} {
    %c0 = arith.constant 0 : index
    %c0_0 = arith.constant 0 : index
    %0 = vector.load %arg1[%c0, %c0_0] : memref<512x144xbf16, #tpu.memory_space<vmem>>, vector<512x144xbf16>
    %c0_1 = arith.constant 0 : index
    %c0_2 = arith.constant 0 : index
    %1 = vector.load %arg2[%c0_1, %c0_2] : memref<144x1xbf16, #tpu.memory_space<vmem>>, vector<144x1xbf16>
    %cst = arith.constant dense<0.000000e+00> : vector<512x1xf32>
    %2 = tpu.matmul %0, %1, %cst {dimension_numbers = #tpu.dot_dimension_numbers<[1], [0], [0], [1], [0, 0, 1, 1], [], []>} : vector<512x144xbf16>, vector<144x1xbf16>, vector<512x1xf32> -> vector<512x1xf32>
    %c0_3 = arith.constant 0 : index
    %c0_4 = arith.constant 0 : index
    %3 = vector.load %arg3[%c0_3, %c0_4] : memref<1x1xf32, #tpu.memory_space<vmem>>, vector<1x1xf32>
    %4 = vector.broadcast %3 : vector<1x1xf32> to vector<512x1xf32>
    %5 = arith.addf %2, %4 : vector<512x1xf32>
    %6 = math.tanh %5 : vector<512x1xf32>
    %c0_5 = arith.constant 0 : index
    %c0_6 = arith.constant 0 : index
    %7 = vector.load %arg4[%c0_5, %c0_6] : memref<512x1xf32, #tpu.memory_space<vmem>>, vector<512x1xf32>
    tpu.vector_store %arg4[%c0_5, %c0_6], %6 {strides = array<i32>} : memref<512x1xf32, #tpu.memory_space<vmem>>, vector<512x1xf32>,
    return
  }
  func.func @transform_0(%arg0: i32) -> (i32, i32) {
    %c0_i32 = arith.constant 0 : i32
    %c0_i32_0 = arith.constant 0 : i32
    return %arg0, %c0_i32 : i32, i32
  }
  func.func @transform_1(%arg0: i32) -> (i32, i32) {
    %c0_i32 = arith.constant 0 : i32
    %c0_i32_0 = arith.constant 0 : i32
    %c0_i32_1 = arith.constant 0 : i32
    return %c0_i32, %c0_i32_0 : i32, i32
  }
  func.func @transform_2(%arg0: i32) -> (i32, i32) {
    %c0_i32 = arith.constant 0 : i32
    %c0_i32_0 = arith.constant 0 : i32
    %c0_i32_1 = arith.constant 0 : i32
    return %c0_i32, %c0_i32_0 : i32, i32
  }
  func.func @transform_3(%arg0: i32) -> (i32, i32) {
    %c0_i32 = arith.constant 0 : i32
    %c0_i32_0 = arith.constant 0 : i32
    return %arg0, %c0_i32 : i32, i32
  }
}

</mosaic_0001>

<bundles_post_ra>
// kernel: autoencoder_forward.6
= control target key start
LH: loop header
LB: loop body
LE: loop exit
PB: predicated region body
PF: predicated region fallthrough
CT: control target
= control target key end

     0   :  { %vm277_vm0 = vcmask 1043456   ;;  %vm278_vm1 = vcmask 1044480   ;;  %v1125_v0 = vmov 0.0   ;;  %v1126_v2 = vmov 65535   ;;  %s1553_s1 = inlined_call_operand.vmem [shape: bf16[9,16], index: 1, kind: input, shape index: {}]   ;;  %s1554_s0 = inlined_call_operand.vmem [shape: bf16[392,9], index: 0, kind: input, shape index: {}]   ;;  %s1555_s2 = inlined_call_operand.vmem [shape: f32[1,16], index: 2, kind: input, shape index: {}]   ;;  %s1556_s3 = inlined_call_operand.vmem [shape: bf16[392,16], index: 3, kind: output, shape index: {}]  }
   0x1   :  { %992 = vmatprep.subr.bf16.mxu0 %v1125_v0  ;;  %v1099_v1 = vld [vmem:[%s1553_s1] sm:$0x1f]   ;;  %1094 = vmatprep.subr.bf16.mxu1 %v1125_v0  ;;  %v279_v3 = vsel %vm277_vm0, 4294967295, %v1126_v2  ;;  %vm1127_vm2 = vmmov 0   ;;  %v1101_v7 = vld [vmem:[%s1554_s0 + $0x68] sm:$0xff]   ;;  %vm201_vm3 = vcmask 72704  }
   0x2   :  { %v280_v4 = vsel %vm278_vm1, %v279_v3, 0  ;;  %994 = vmatprep.mubr.msk.bf16.mxu0 %vm1127_vm2, %v1125_v0  ;;  %v1100_v5 = vld [vmem:[%s1554_s0] sm:$0xff]   ;;  %1046 = vmatprep.mubr.msk.bf16.mxu1 %vm1127_vm2, %v1125_v0  ;;  %v1102_v8 = vld [vmem:[%s1554_s0 + $0x8] sm:$0xff]   ;;  %v1103_v9 = vld [vmem:[%s1554_s0 + $0x70] sm:$0xff]   ;;  %vm762_vm4 = vcmask 125952  }
   0x3   :  { %v282_v6 = vand.u32 %v1099_v1, %v280_v4  ;;  %v1104_v10 = vld [vmem:[%s1554_s0 + $0x10] sm:$0xff]   ;;  %v1105_v11 = vld [vmem:[%s1554_s0 + $0x78] sm:$0xff]   ;;  %v1107_v13 = vld [vmem:[%s1554_s0 + $0x80] sm:$0xff]  }
   0x4   :  { %v1106_v12 = vld [vmem:[%s1554_s0 + $0x18] sm:$0xff]   ;;  %v1108_v14 = vld [vmem:[%s1554_s0 + $0x20] sm:$0xff]   ;;  %v1109_v15 = vld [vmem:[%s1554_s0 + $0x88] sm:$0xff]  }
   0x5   :  { %993 = vmatpush3.bf16.msra.mxu0 %v282_v6  ;;  %1095 = vmatpush3.bf16.msra.mxu1 %v282_v6  ;;  %v1110_v16 = vld [vmem:[%s1554_s0 + $0x28] sm:$0xff]   ;;  %v1111_v17 = vld [vmem:[%s1554_s0 + $0x90] sm:$0xff]   ;;  %v1113_v19 = vld [vmem:[%s1554_s0 + $0x98] sm:$0xff]  }
   0x6   :  { %v1112_v18 = vld [vmem:[%s1554_s0 + $0x30] sm:$0xff]   ;;  %v1114_v20 = vld [vmem:[%s1554_s0 + $0x38] sm:$0xff]   ;;  %v1115_v21 = vld [vmem:[%s1554_s0 + $0xa0] sm:$0xff]  }
   0x7   :  { %v1116_v22 = vld [vmem:[%s1554_s0 + $0x40] sm:$0xff]   ;;  %v1117_v23 = vld [vmem:[%s1554_s0 + $0xa8] sm:$0xff]   ;;  %v1119_v25 = vld [vmem:[%s1554_s0 + $0xb0] sm:$0xff]  }
   0x8   :  { %995 = vmatmul.mubr.msk.bf16.vlgmr.msra.gmra.mxu0 %vm201_vm3, %v1100_v5  ;;  %1047 = vmatmul.mubr.msk.bf16.vlgmr.msra.gmra.mxu1 %vm201_vm3, %v1101_v7  ;;  %v1118_v24 = vld [vmem:[%s1554_s0 + $0x48] sm:$0xff]   ;;  %v1120_v26 = vld [vmem:[%s1554_s0 + $0x50] sm:$0xff]   ;;  %v1121_v27 = vld [vmem:[%s1554_s0 + $0xb8] sm:$0xff]  }
   0x9   :  { %998 = vmatprep.mubr.msk.bf16.mxu0 %vm1127_vm2, %v1125_v0  ;;  %1050 = vmatprep.mubr.msk.bf16.mxu1 %vm1127_vm2, %v1125_v0  ;;  %v1122_v28 = vld [vmem:[%s1554_s0 + $0x58] sm:$0xff]   ;;  %v1123_v29 = vld [vmem:[%s1554_s0 + $0xc0] ss:$0 sps:$4 sm:$0xff]  }
   0xa   :  { %v1124_v30 = vld [vmem:[%s1554_s0 + $0x60] sm:$0xff]  }
   0xb   :  { %v1306_v31 = vld [vmem:[%s1555_s2] ss:$0 sm:$0xff] }
  0x10   :  { %999 = vmatmul.mubr.msk.bf16.gmra.mxu0 %vm201_vm3, %v1102_v8  ;;  %1051 = vmatmul.mubr.msk.bf16.gmra.mxu1 %vm201_vm3, %v1103_v9 }
  0x11   :  { %1002 = vmatprep.mubr.msk.bf16.mxu0 %vm1127_vm2, %v1125_v0  ;;  %1054 = vmatprep.mubr.msk.bf16.mxu1 %vm1127_vm2, %v1125_v0 }
  0x18   :  { %1003 = vmatmul.mubr.msk.bf16.gmra.mxu0 %vm201_vm3, %v1104_v10  ;;  %1055 = vmatmul.mubr.msk.bf16.gmra.mxu1 %vm201_vm3, %v1105_v11 }
  0x19   :  { %1006 = vmatprep.mubr.msk.bf16.mxu0 %vm1127_vm2, %v1125_v0  ;;  %1058 = vmatprep.mubr.msk.bf16.mxu1 %vm1127_vm2, %v1125_v0 }
  0x20   :  { %1007 = vmatmul.mubr.msk.bf16.gmra.mxu0 %vm201_vm3, %v1106_v12  ;;  %1059 = vmatmul.mubr.msk.bf16.gmra.mxu1 %vm201_vm3, %v1107_v13 }
  0x21   :  { %1010 = vmatprep.mubr.msk.bf16.mxu0 %vm1127_vm2, %v1125_v0  ;;  %1062 = vmatprep.mubr.msk.bf16.mxu1 %vm1127_vm2, %v1125_v0 }
  0x28   :  { %1011 = vmatmul.mubr.msk.bf16.gmra.mxu0 %vm201_vm3, %v1108_v14  ;;  %1063 = vmatmul.mubr.msk.bf16.gmra.mxu1 %vm201_vm3, %v1109_v15 }
  0x29   :  { %1014 = vmatprep.mubr.msk.bf16.mxu0 %vm1127_vm2, %v1125_v0  ;;  %1066 = vmatprep.mubr.msk.bf16.mxu1 %vm1127_vm2, %v1125_v0 }
  0x30   :  { %1015 = vmatmul.mubr.msk.bf16.gmra.mxu0 %vm201_vm3, %v1110_v16  ;;  %1067 = vmatmul.mubr.msk.bf16.gmra.mxu1 %vm201_vm3, %v1111_v17 }
  0x31   :  { %1018 = vmatprep.mubr.msk.bf16.mxu0 %vm1127_vm2, %v1125_v0  ;;  %1070 = vmatprep.mubr.msk.bf16.mxu1 %vm1127_vm2, %v1125_v0 }
  0x38   :  { %1019 = vmatmul.mubr.msk.bf16.gmra.mxu0 %vm201_vm3, %v1112_v18  ;;  %1071 = vmatmul.mubr.msk.bf16.gmra.mxu1 %vm201_vm3, %v1113_v19 }
  0x39   :  { %1022 = vmatprep.mubr.msk.bf16.mxu0 %vm1127_vm2, %v1125_v0  ;;  %1074 = vmatprep.mubr.msk.bf16.mxu1 %vm1127_vm2, %v1125_v0 }
  0x40   :  { %1023 = vmatmul.mubr.msk.bf16.gmra.mxu0 %vm201_vm3, %v1114_v20  ;;  %1075 = vmatmul.mubr.msk.bf16.gmra.mxu1 %vm201_vm3, %v1115_v21 }
  0x41   :  { %1026 = vmatprep.mubr.msk.bf16.mxu0 %vm1127_vm2, %v1125_v0  ;;  %1078 = vmatprep.mubr.msk.bf16.mxu1 %vm1127_vm2, %v1125_v0 }
  0x48   :  { %1027 = vmatmul.mubr.msk.bf16.gmra.mxu0 %vm201_vm3, %v1116_v22  ;;  %1079 = vmatmul.mubr.msk.bf16.gmra.mxu1 %vm201_vm3, %v1117_v23 }
  0x49   :  { %1030 = vmatprep.mubr.msk.bf16.mxu0 %vm1127_vm2, %v1125_v0  ;;  %1082 = vmatprep.mubr.msk.bf16.mxu1 %vm1127_vm2, %v1125_v0 }
  0x50   :  { %1031 = vmatmul.mubr.msk.bf16.gmra.mxu0 %vm201_vm3, %v1118_v24  ;;  %1083 = vmatmul.mubr.msk.bf16.gmra.mxu1 %vm201_vm3, %v1119_v25 }
  0x51   :  { %1034 = vmatprep.mubr.msk.bf16.mxu0 %vm1127_vm2, %v1125_v0  ;;  %1086 = vmatprep.mubr.msk.bf16.mxu1 %vm1127_vm2, %v1125_v0 }
  0x58   :  { %1035 = vmatmul.mubr.msk.bf16.gmra.mxu0 %vm201_vm3, %v1120_v26  ;;  %1087 = vmatmul.mubr.msk.bf16.gmra.mxu1 %vm201_vm3, %v1121_v27 }
  0x59   :  { %1038 = vmatprep.mubr.msk.bf16.mxu0 %vm1127_vm2, %v1125_v0  ;;  %1090 = vmatprep.mubr.msk.bf16.mxu1 %vm1127_vm2, %v1125_v0 }
  0x60   :  { %1039 = vmatmul.mubr.msk.bf16.gmra.mxu0 %vm201_vm3, %v1122_v28  ;;  %1091 = vmatmul.mubr.msk.bf16.gmra.mxu1 %vm201_vm3, %v1123_v29 }
  0x61   :  { %1042 = vmatprep.mubr.msk.bf16.mxu0 %vm1127_vm2, %v1125_v0 }
  0x68   :  { %1043 = vmatmul.mubr.msk.bf16.gmra.mxu0 %vm201_vm3, %v1124_v30 }
  0xc8   :  { %v318_v32 = vpop.f32.mrf.mxu0  ;;  %v422_v33 = vpop.f32.mrf.mxu1 }
  0xc9   :  { %v319_v34 = vadd.f32 %v1306_v31, %v318_v32  ;;  %v423_v35 = vadd.f32 %v1306_v31, %v422_v33 }
  0xca   :  { %v996_v36 = vpop.f32.mrf.mxu0  ;;  %v1048_v37 = vpop.f32.mrf.mxu1 }
  0xcb   :  { %v516_v38 = vmax.f32 %v319_v34, 0.0  ;;  %v542_v39 = vmax.f32 %v423_v35, 0.0 }
  0xcc   :  { %v321_v40 = vpop.f32.mrf.mxu0  ;;  %v425_v41 = vpop.f32.mrf.mxu1 }
  0xcd   :  { %v917_v42 = vpack.c.bf16 %v516_v38, %v516_v38  ;;  %v322_v43 = vadd.f32 %v1306_v31, %v321_v40  ;;  %v943_v44 = vpack.c.bf16 %v542_v39, %v542_v39  ;;  %v426_v45 = vadd.f32 %v1306_v31, %v425_v41 }
  0xce   :  { %v997_v46 = vpop.f32.mrf.mxu0  ;;  %v1049_v47 = vpop.f32.mrf.mxu1 }
  0xcf   :  { %763 = vst.msk [vmem:[%s1556_s3] sm:$0xf] %vm762_vm4, %v917_v42  ;;  %v517_v48 = vmax.f32 %v322_v43, 0.0  ;;  %789 = vst.msk [vmem:[%s1556_s3 + $0x68] sm:$0xf] %vm762_vm4, %v943_v44  ;;  %v543_v49 = vmax.f32 %v426_v45, 0.0 }
  0xd0   :  { %v326_v50 = vpop.f32.mrf.mxu0  ;;  %v430_v51 = vpop.f32.mrf.mxu1 }
  0xd1   :  { %v918_v52 = vpack.c.bf16 %v517_v48, %v517_v48  ;;  %v327_v53 = vadd.f32 %v1306_v31, %v326_v50  ;;  %v944_v54 = vpack.c.bf16 %v543_v49, %v543_v49  ;;  %v431_v55 = vadd.f32 %v1306_v31, %v430_v51 }
  0xd2   :  { %v1000_v56 = vpop.f32.mrf.mxu0  ;;  %v1052_v57 = vpop.f32.mrf.mxu1 }
  0xd3   :  { %764 = vst.msk [vmem:[%s1556_s3 + $0x4] sm:$0xf] %vm762_vm4, %v918_v52  ;;  %v518_v58 = vmax.f32 %v327_v53, 0.0  ;;  %790 = vst.msk [vmem:[%s1556_s3 + $0x6c] sm:$0xf] %vm762_vm4, %v944_v54  ;;  %v544_v59 = vmax.f32 %v431_v55, 0.0 }
  0xd4   :  { %v329_v60 = vpop.f32.mrf.mxu0  ;;  %v433_v61 = vpop.f32.mrf.mxu1 }
  0xd5   :  { %v919_v62 = vpack.c.bf16 %v518_v58, %v518_v58  ;;  %v330_v63 = vadd.f32 %v1306_v31, %v329_v60  ;;  %v945_v0 = vpack.c.bf16 %v544_v59, %v544_v59  ;;  %v434_v1 = vadd.f32 %v1306_v31, %v433_v61 }
  0xd6   :  { %v1001_v2 = vpop.f32.mrf.mxu0  ;;  %v1053_v3 = vpop.f32.mrf.mxu1 }
  0xd7   :  { %765 = vst.msk [vmem:[%s1556_s3 + $0x8] sm:$0xf] %vm762_vm4, %v919_v62  ;;  %v519_v4 = vmax.f32 %v330_v63, 0.0  ;;  %791 = vst.msk [vmem:[%s1556_s3 + $0x70] sm:$0xf] %vm762_vm4, %v945_v0  ;;  %v545_v5 = vmax.f32 %v434_v1, 0.0 }
  0xd8   :  { %v334_v6 = vpop.f32.mrf.mxu0  ;;  %v438_v7 = vpop.f32.mrf.mxu1 }
  0xd9   :  { %v920_v8 = vpack.c.bf16 %v519_v4, %v519_v4  ;;  %v335_v9 = vadd.f32 %v1306_v31, %v334_v6  ;;  %v946_v10 = vpack.c.bf16 %v545_v5, %v545_v5  ;;  %v439_v11 = vadd.f32 %v1306_v31, %v438_v7 }
  0xda   :  { %v1004_v12 = vpop.f32.mrf.mxu0  ;;  %v1056_v13 = vpop.f32.mrf.mxu1 }
  0xdb   :  { %766 = vst.msk [vmem:[%s1556_s3 + $0xc] sm:$0xf] %vm762_vm4, %v920_v8  ;;  %v520_v14 = vmax.f32 %v335_v9, 0.0  ;;  %792 = vst.msk [vmem:[%s1556_s3 + $0x74] sm:$0xf] %vm762_vm4, %v946_v10  ;;  %v546_v15 = vmax.f32 %v439_v11, 0.0 }
  0xdc   :  { %v337_v16 = vpop.f32.mrf.mxu0  ;;  %v441_v17 = vpop.f32.mrf.mxu1 }
  0xdd   :  { %v921_v18 = vpack.c.bf16 %v520_v14, %v520_v14  ;;  %v338_v19 = vadd.f32 %v1306_v31, %v337_v16  ;;  %v947_v20 = vpack.c.bf16 %v546_v15, %v546_v15  ;;  %v442_v21 = vadd.f32 %v1306_v31, %v441_v17 }
  0xde   :  { %v1005_v22 = vpop.f32.mrf.mxu0  ;;  %v1057_v23 = vpop.f32.mrf.mxu1 }
  0xdf   :  { %767 = vst.msk [vmem:[%s1556_s3 + $0x10] sm:$0xf] %vm762_vm4, %v921_v18  ;;  %v521_v24 = vmax.f32 %v338_v19, 0.0  ;;  %793 = vst.msk [vmem:[%s1556_s3 + $0x78] sm:$0xf] %vm762_vm4, %v947_v20  ;;  %v547_v25 = vmax.f32 %v442_v21, 0.0 }
  0xe0   :  { %v342_v26 = vpop.f32.mrf.mxu0  ;;  %v446_v27 = vpop.f32.mrf.mxu1 }
  0xe1   :  { %v922_v28 = vpack.c.bf16 %v521_v24, %v521_v24  ;;  %v343_v29 = vadd.f32 %v1306_v31, %v342_v26  ;;  %v948_v30 = vpack.c.bf16 %v547_v25, %v547_v25  ;;  %v447_v32 = vadd.f32 %v1306_v31, %v446_v27 }
  0xe2   :  { %v1008_v33 = vpop.f32.mrf.mxu0  ;;  %v1060_v34 = vpop.f32.mrf.mxu1 }
  0xe3   :  { %768 = vst.msk [vmem:[%s1556_s3 + $0x14] sm:$0xf] %vm762_vm4, %v922_v28  ;;  %v522_v35 = vmax.f32 %v343_v29, 0.0  ;;  %794 = vst.msk [vmem:[%s1556_s3 + $0x7c] sm:$0xf] %vm762_vm4, %v948_v30  ;;  %v548_v36 = vmax.f32 %v447_v32, 0.0 }
  0xe4   :  { %v345_v37 = vpop.f32.mrf.mxu0  ;;  %v449_v38 = vpop.f32.mrf.mxu1 }
  0xe5   :  { %v923_v39 = vpack.c.bf16 %v522_v35, %v522_v35  ;;  %v346_v40 = vadd.f32 %v1306_v31, %v345_v37  ;;  %v949_v41 = vpack.c.bf16 %v548_v36, %v548_v36  ;;  %v450_v42 = vadd.f32 %v1306_v31, %v449_v38 }
  0xe6   :  { %v1009_v43 = vpop.f32.mrf.mxu0  ;;  %v1061_v44 = vpop.f32.mrf.mxu1 }
  0xe7   :  { %769 = vst.msk [vmem:[%s1556_s3 + $0x18] sm:$0xf] %vm762_vm4, %v923_v39  ;;  %v523_v45 = vmax.f32 %v346_v40, 0.0  ;;  %795 = vst.msk [vmem:[%s1556_s3 + $0x80] sm:$0xf] %vm762_vm4, %v949_v41  ;;  %v549_v46 = vmax.f32 %v450_v42, 0.0 }
  0xe8   :  { %v350_v47 = vpop.f32.mrf.mxu0  ;;  %v454_v48 = vpop.f32.mrf.mxu1 }
  0xe9   :  { %v924_v49 = vpack.c.bf16 %v523_v45, %v523_v45  ;;  %v351_v50 = vadd.f32 %v1306_v31, %v350_v47  ;;  %v950_v51 = vpack.c.bf16 %v549_v46, %v549_v46  ;;  %v455_v52 = vadd.f32 %v1306_v31, %v454_v48 }
  0xea   :  { %v1012_v53 = vpop.f32.mrf.mxu0  ;;  %v1064_v54 = vpop.f32.mrf.mxu1 }
  0xeb   :  { %770 = vst.msk [vmem:[%s1556_s3 + $0x1c] sm:$0xf] %vm762_vm4, %v924_v49  ;;  %v524_v55 = vmax.f32 %v351_v50, 0.0  ;;  %796 = vst.msk [vmem:[%s1556_s3 + $0x84] sm:$0xf] %vm762_vm4, %v950_v51  ;;  %v550_v56 = vmax.f32 %v455_v52, 0.0 }
  0xec   :  { %v353_v57 = vpop.f32.mrf.mxu0  ;;  %v457_v58 = vpop.f32.mrf.mxu1 }
  0xed   :  { %v925_v59 = vpack.c.bf16 %v524_v55, %v524_v55  ;;  %v354_v60 = vadd.f32 %v1306_v31, %v353_v57  ;;  %v951_v61 = vpack.c.bf16 %v550_v56, %v550_v56  ;;  %v458_v62 = vadd.f32 %v1306_v31, %v457_v58 }
  0xee   :  { %v1013_v63 = vpop.f32.mrf.mxu0  ;;  %v1065_v0 = vpop.f32.mrf.mxu1 }
  0xef   :  { %771 = vst.msk [vmem:[%s1556_s3 + $0x20] sm:$0xf] %vm762_vm4, %v925_v59  ;;  %v525_v1 = vmax.f32 %v354_v60, 0.0  ;;  %797 = vst.msk [vmem:[%s1556_s3 + $0x88] sm:$0xf] %vm762_vm4, %v951_v61  ;;  %v551_v2 = vmax.f32 %v458_v62, 0.0 }
  0xf0   :  { %v358_v3 = vpop.f32.mrf.mxu0  ;;  %v462_v4 = vpop.f32.mrf.mxu1 }
  0xf1   :  { %v926_v5 = vpack.c.bf16 %v525_v1, %v525_v1  ;;  %v359_v6 = vadd.f32 %v1306_v31, %v358_v3  ;;  %v952_v7 = vpack.c.bf16 %v551_v2, %v551_v2  ;;  %v463_v8 = vadd.f32 %v1306_v31, %v462_v4 }
  0xf2   :  { %v1016_v9 = vpop.f32.mrf.mxu0  ;;  %v1068_v10 = vpop.f32.mrf.mxu1 }
  0xf3   :  { %772 = vst.msk [vmem:[%s1556_s3 + $0x24] sm:$0xf] %vm762_vm4, %v926_v5  ;;  %v526_v11 = vmax.f32 %v359_v6, 0.0  ;;  %798 = vst.msk [vmem:[%s1556_s3 + $0x8c] sm:$0xf] %vm762_vm4, %v952_v7  ;;  %v552_v12 = vmax.f32 %v463_v8, 0.0 }
  0xf4   :  { %v361_v13 = vpop.f32.mrf.mxu0  ;;  %v465_v14 = vpop.f32.mrf.mxu1 }
  0xf5   :  { %v927_v15 = vpack.c.bf16 %v526_v11, %v526_v11  ;;  %v362_v16 = vadd.f32 %v1306_v31, %v361_v13  ;;  %v953_v17 = vpack.c.bf16 %v552_v12, %v552_v12  ;;  %v466_v18 = vadd.f32 %v1306_v31, %v465_v14 }
  0xf6   :  { %v1017_v19 = vpop.f32.mrf.mxu0  ;;  %v1069_v20 = vpop.f32.mrf.mxu1 }
  0xf7   :  { %773 = vst.msk [vmem:[%s1556_s3 + $0x28] sm:$0xf] %vm762_vm4, %v927_v15  ;;  %v527_v21 = vmax.f32 %v362_v16, 0.0  ;;  %799 = vst.msk [vmem:[%s1556_s3 + $0x90] sm:$0xf] %vm762_vm4, %v953_v17  ;;  %v553_v22 = vmax.f32 %v466_v18, 0.0 }
  0xf8   :  { %v366_v23 = vpop.f32.mrf.mxu0  ;;  %v470_v24 = vpop.f32.mrf.mxu1 }
  0xf9   :  { %v928_v25 = vpack.c.bf16 %v527_v21, %v527_v21  ;;  %v367_v26 = vadd.f32 %v1306_v31, %v366_v23  ;;  %v954_v27 = vpack.c.bf16 %v553_v22, %v553_v22  ;;  %v471_v28 = vadd.f32 %v1306_v31, %v470_v24 }
  0xfa   :  { %v1020_v29 = vpop.f32.mrf.mxu0  ;;  %v1072_v30 = vpop.f32.mrf.mxu1 }
  0xfb   :  { %774 = vst.msk [vmem:[%s1556_s3 + $0x2c] sm:$0xf] %vm762_vm4, %v928_v25  ;;  %v528_v32 = vmax.f32 %v367_v26, 0.0  ;;  %800 = vst.msk [vmem:[%s1556_s3 + $0x94] sm:$0xf] %vm762_vm4, %v954_v27  ;;  %v554_v33 = vmax.f32 %v471_v28, 0.0 }
  0xfc   :  { %v369_v34 = vpop.f32.mrf.mxu0  ;;  %v473_v35 = vpop.f32.mrf.mxu1 }
  0xfd   :  { %v929_v36 = vpack.c.bf16 %v528_v32, %v528_v32  ;;  %v370_v37 = vadd.f32 %v1306_v31, %v369_v34  ;;  %v955_v38 = vpack.c.bf16 %v554_v33, %v554_v33  ;;  %v474_v39 = vadd.f32 %v1306_v31, %v473_v35 }
  0xfe   :  { %v1021_v40 = vpop.f32.mrf.mxu0  ;;  %v1073_v41 = vpop.f32.mrf.mxu1 }
  0xff   :  { %775 = vst.msk [vmem:[%s1556_s3 + $0x30] sm:$0xf] %vm762_vm4, %v929_v36  ;;  %v529_v42 = vmax.f32 %v370_v37, 0.0  ;;  %801 = vst.msk [vmem:[%s1556_s3 + $0x98] sm:$0xf] %vm762_vm4, %v955_v38  ;;  %v555_v43 = vmax.f32 %v474_v39, 0.0 }
 0x100   :  { %v374_v44 = vpop.f32.mrf.mxu0  ;;  %v478_v45 = vpop.f32.mrf.mxu1 }
 0x101   :  { %v930_v46 = vpack.c.bf16 %v529_v42, %v529_v42  ;;  %v375_v47 = vadd.f32 %v1306_v31, %v374_v44  ;;  %v956_v48 = vpack.c.bf16 %v555_v43, %v555_v43  ;;  %v479_v49 = vadd.f32 %v1306_v31, %v478_v45 }
 0x102   :  { %v1024_v50 = vpop.f32.mrf.mxu0  ;;  %v1076_v51 = vpop.f32.mrf.mxu1 }
 0x103   :  { %776 = vst.msk [vmem:[%s1556_s3 + $0x34] sm:$0xf] %vm762_vm4, %v930_v46  ;;  %v530_v52 = vmax.f32 %v375_v47, 0.0  ;;  %802 = vst.msk [vmem:[%s1556_s3 + $0x9c] sm:$0xf] %vm762_vm4, %v956_v48  ;;  %v556_v53 = vmax.f32 %v479_v49, 0.0 }
 0x104   :  { %v377_v54 = vpop.f32.mrf.mxu0  ;;  %v481_v55 = vpop.f32.mrf.mxu1 }
 0x105   :  { %v931_v56 = vpack.c.bf16 %v530_v52, %v530_v52  ;;  %v378_v57 = vadd.f32 %v1306_v31, %v377_v54  ;;  %v957_v58 = vpack.c.bf16 %v556_v53, %v556_v53  ;;  %v482_v59 = vadd.f32 %v1306_v31, %v481_v55 }
 0x106   :  { %v1025_v60 = vpop.f32.mrf.mxu0  ;;  %v1077_v61 = vpop.f32.mrf.mxu1 }
 0x107   :  { %777 = vst.msk [vmem:[%s1556_s3 + $0x38] sm:$0xf] %vm762_vm4, %v931_v56  ;;  %v531_v62 = vmax.f32 %v378_v57, 0.0  ;;  %803 = vst.msk [vmem:[%s1556_s3 + $0xa0] sm:$0xf] %vm762_vm4, %v957_v58  ;;  %v557_v63 = vmax.f32 %v482_v59, 0.0 }
 0x108   :  { %v382_v0 = vpop.f32.mrf.mxu0  ;;  %v486_v1 = vpop.f32.mrf.mxu1 }
 0x109   :  { %v932_v2 = vpack.c.bf16 %v531_v62, %v531_v62  ;;  %v383_v3 = vadd.f32 %v1306_v31, %v382_v0  ;;  %v958_v4 = vpack.c.bf16 %v557_v63, %v557_v63  ;;  %v487_v5 = vadd.f32 %v1306_v31, %v486_v1 }
 0x10a   :  { %v1028_v6 = vpop.f32.mrf.mxu0  ;;  %v1080_v7 = vpop.f32.mrf.mxu1 }
 0x10b   :  { %778 = vst.msk [vmem:[%s1556_s3 + $0x3c] sm:$0xf] %vm762_vm4, %v932_v2  ;;  %v532_v8 = vmax.f32 %v383_v3, 0.0  ;;  %804 = vst.msk [vmem:[%s1556_s3 + $0xa4] sm:$0xf] %vm762_vm4, %v958_v4  ;;  %v558_v9 = vmax.f32 %v487_v5, 0.0 }
 0x10c   :  { %v385_v10 = vpop.f32.mrf.mxu0  ;;  %v489_v11 = vpop.f32.mrf.mxu1 }
 0x10d   :  { %v933_v12 = vpack.c.bf16 %v532_v8, %v532_v8  ;;  %v386_v13 = vadd.f32 %v1306_v31, %v385_v10  ;;  %v959_v14 = vpack.c.bf16 %v558_v9, %v558_v9  ;;  %v490_v15 = vadd.f32 %v1306_v31, %v489_v11 }
 0x10e   :  { %v1029_v16 = vpop.f32.mrf.mxu0  ;;  %v1081_v17 = vpop.f32.mrf.mxu1 }
 0x10f   :  { %779 = vst.msk [vmem:[%s1556_s3 + $0x40] sm:$0xf] %vm762_vm4, %v933_v12  ;;  %v533_v18 = vmax.f32 %v386_v13, 0.0  ;;  %805 = vst.msk [vmem:[%s1556_s3 + $0xa8] sm:$0xf] %vm762_vm4, %v959_v14  ;;  %v559_v19 = vmax.f32 %v490_v15, 0.0 }
 0x110   :  { %v390_v20 = vpop.f32.mrf.mxu0  ;;  %v494_v21 = vpop.f32.mrf.mxu1 }
 0x111   :  { %v934_v22 = vpack.c.bf16 %v533_v18, %v533_v18  ;;  %v391_v23 = vadd.f32 %v1306_v31, %v390_v20  ;;  %v960_v24 = vpack.c.bf16 %v559_v19, %v559_v19  ;;  %v495_v25 = vadd.f32 %v1306_v31, %v494_v21 }
 0x112   :  { %v1032_v26 = vpop.f32.mrf.mxu0  ;;  %v1084_v27 = vpop.f32.mrf.mxu1 }
 0x113   :  { %780 = vst.msk [vmem:[%s1556_s3 + $0x44] sm:$0xf] %vm762_vm4, %v934_v22  ;;  %v534_v28 = vmax.f32 %v391_v23, 0.0  ;;  %806 = vst.msk [vmem:[%s1556_s3 + $0xac] sm:$0xf] %vm762_vm4, %v960_v24  ;;  %v560_v29 = vmax.f32 %v495_v25, 0.0 }
 0x114   :  { %v393_v30 = vpop.f32.mrf.mxu0  ;;  %v497_v32 = vpop.f32.mrf.mxu1 }
 0x115   :  { %v935_v33 = vpack.c.bf16 %v534_v28, %v534_v28  ;;  %v394_v34 = vadd.f32 %v1306_v31, %v393_v30  ;;  %v961_v35 = vpack.c.bf16 %v560_v29, %v560_v29  ;;  %v498_v36 = vadd.f32 %v1306_v31, %v497_v32 }
 0x116   :  { %v1033_v37 = vpop.f32.mrf.mxu0  ;;  %v1085_v38 = vpop.f32.mrf.mxu1 }
 0x117   :  { %781 = vst.msk [vmem:[%s1556_s3 + $0x48] sm:$0xf] %vm762_vm4, %v935_v33  ;;  %v535_v39 = vmax.f32 %v394_v34, 0.0  ;;  %807 = vst.msk [vmem:[%s1556_s3 + $0xb0] sm:$0xf] %vm762_vm4, %v961_v35  ;;  %v561_v40 = vmax.f32 %v498_v36, 0.0 }
 0x118   :  { %v398_v41 = vpop.f32.mrf.mxu0  ;;  %v502_v42 = vpop.f32.mrf.mxu1 }
 0x119   :  { %v936_v43 = vpack.c.bf16 %v535_v39, %v535_v39  ;;  %v399_v44 = vadd.f32 %v1306_v31, %v398_v41  ;;  %v962_v45 = vpack.c.bf16 %v561_v40, %v561_v40  ;;  %v503_v46 = vadd.f32 %v1306_v31, %v502_v42 }
 0x11a   :  { %v1036_v47 = vpop.f32.mrf.mxu0  ;;  %v1088_v48 = vpop.f32.mrf.mxu1 }
 0x11b   :  { %782 = vst.msk [vmem:[%s1556_s3 + $0x4c] sm:$0xf] %vm762_vm4, %v936_v43  ;;  %v536_v49 = vmax.f32 %v399_v44, 0.0  ;;  %808 = vst.msk [vmem:[%s1556_s3 + $0xb4] sm:$0xf] %vm762_vm4, %v962_v45  ;;  %v562_v50 = vmax.f32 %v503_v46, 0.0 }
 0x11c   :  { %v401_v51 = vpop.f32.mrf.mxu0  ;;  %v505_v52 = vpop.f32.mrf.mxu1 }
 0x11d   :  { %v937_v53 = vpack.c.bf16 %v536_v49, %v536_v49  ;;  %v402_v54 = vadd.f32 %v1306_v31, %v401_v51  ;;  %v963_v55 = vpack.c.bf16 %v562_v50, %v562_v50  ;;  %v506_v56 = vadd.f32 %v1306_v31, %v505_v52 }
 0x11e   :  { %v1037_v57 = vpop.f32.mrf.mxu0  ;;  %v1089_v58 = vpop.f32.mrf.mxu1 }
 0x11f   :  { %783 = vst.msk [vmem:[%s1556_s3 + $0x50] sm:$0xf] %vm762_vm4, %v937_v53  ;;  %v537_v59 = vmax.f32 %v402_v54, 0.0  ;;  %809 = vst.msk [vmem:[%s1556_s3 + $0xb8] sm:$0xf] %vm762_vm4, %v963_v55  ;;  %v563_v60 = vmax.f32 %v506_v56, 0.0 }
 0x120   :  { %v406_v61 = vpop.f32.mrf.mxu0  ;;  %v510_v62 = vpop.f32.mrf.mxu1 }
 0x121   :  { %v938_v63 = vpack.c.bf16 %v537_v59, %v537_v59  ;;  %v407_v0 = vadd.f32 %v1306_v31, %v406_v61  ;;  %v964_v1 = vpack.c.bf16 %v563_v60, %v563_v60  ;;  %v511_v2 = vadd.f32 %v1306_v31, %v510_v62 }
 0x122   :  { %v1040_v3 = vpop.f32.mrf.mxu0  ;;  %v1092_v4 = vpop.f32.mrf.mxu1 }
 0x123   :  { %784 = vst.msk [vmem:[%s1556_s3 + $0x54] sm:$0xf] %vm762_vm4, %v938_v63  ;;  %v538_v5 = vmax.f32 %v407_v0, 0.0  ;;  %810 = vst.msk [vmem:[%s1556_s3 + $0xbc] sm:$0xf] %vm762_vm4, %v964_v1  ;;  %v564_v6 = vmax.f32 %v511_v2, 0.0 }
 0x124   :  { %v409_v7 = vpop.f32.mrf.mxu0  ;;  %v513_v8 = vpop.f32.mrf.mxu1 }
 0x125   :  { %v939_v9 = vpack.c.bf16 %v538_v5, %v538_v5  ;;  %v410_v10 = vadd.f32 %v1306_v31, %v409_v7  ;;  %v965_v11 = vpack.c.bf16 %v564_v6, %v564_v6 }
 0x126   :  { %v1041_v12 = vpop.f32.mrf.mxu0  ;;  %v1093_v13 = vpop.f32.mrf.mxu1 }
 0x127   :  { %785 = vst.msk [vmem:[%s1556_s3 + $0x58] sm:$0xf] %vm762_vm4, %v939_v9  ;;  %v539_v14 = vmax.f32 %v410_v10, 0.0  ;;  %811 = vst.msk [vmem:[%s1556_s3 + $0xc0] sm:$0xf] %vm762_vm4, %v965_v11 }
 0x128   :  { %v414_v15 = vpop.f32.mrf.mxu0 }
 0x129   :  { %v940_v16 = vpack.c.bf16 %v539_v14, %v539_v14  ;;  %v415_v17 = vadd.f32 %v1306_v31, %v414_v15 }
 0x12a   :  { %v1044_v18 = vpop.f32.mrf.mxu0 }
 0x12b   :  { %786 = vst.msk [vmem:[%s1556_s3 + $0x5c] sm:$0xf] %vm762_vm4, %v940_v16  ;;  %v540_v19 = vmax.f32 %v415_v17, 0.0 }
 0x12c   :  { %v417_v20 = vpop.f32.mrf.mxu0 }
 0x12d   :  { %v941_v21 = vpack.c.bf16 %v540_v19, %v540_v19  ;;  %v418_v22 = vadd.f32 %v1306_v31, %v417_v20 }
 0x12e   :  { %v1045_v23 = vpop.f32.mrf.mxu0 }
 0x12f   :  { %787 = vst.msk [vmem:[%s1556_s3 + $0x60] sm:$0xf] %vm762_vm4, %v941_v21  ;;  %v541_v24 = vmax.f32 %v418_v22, 0.0 }
 0x131   :  { %v942_v25 = vpack.c.bf16 %v541_v24, %v541_v24 }
 0x133   :  { %788 = vst.msk [vmem:[%s1556_s3 + $0x64] sm:$0xf] %vm762_vm4, %v942_v25 }

// kernel: autoencoder_forward.7
= control target key start
LH: loop header
LB: loop body
LE: loop exit
PB: predicated region body
PF: predicated region fallthrough
CT: control target
= control target key end

     0   :  { %v466_v0 = vmov 0   ;;  %vm167_vm0 = vcmask 130048   ;;  %vm343_vm1 = vcmask 257024   ;;  %s630_s1 = inlined_call_operand.vmem [shape: bf16[144,32], index: 1, kind: input, shape index: {}]   ;;  %s631_s0 = inlined_call_operand.vmem [shape: bf16[104,144], index: 0, kind: input, shape index: {}]   ;;  %s632_s2 = inlined_call_operand.vmem [shape: f32[1,32], index: 2, kind: input, shape index: {}]   ;;  %s633_s3 = inlined_call_operand.vmem [shape: bf16[104,32], index: 3, kind: output, shape index: {}]  }
   0x1   :  { %189 = vmatprep.subr.bf16.mxu0 %v466_v0  ;;  %v437_v1 = vld [vmem:[%s630_s1 + $0x38] sm:$0xff]   ;;  %418 = vmatprep.subr.bf16.mxu1 %v466_v0  ;;  %v438_v2 = vld [vmem:[%s630_s1 + $0x30] sm:$0xff]   ;;  %v439_v3 = vld [vmem:[%s630_s1 + $0x28] sm:$0xff]  }
   0x2   :  { %190 = vmatpush1.bf16.msra.mxu0 %v437_v1  ;;  %427 = vmatpush1.bf16.msra.mxu1 %v437_v1  ;;  %v440_v4 = vld [vmem:[%s630_s1 + $0x20] sm:$0xff]   ;;  %v441_v7 = vld [vmem:[%s630_s1 + $0x18] sm:$0xff]   ;;  %v442_v8 = vld [vmem:[%s630_s1 + $0x10] sm:$0xff]  }
   0x3   :  { %191 = vmatprep.subr.bf16.mxu0 %v466_v0  ;;  %419 = vmatprep.subr.bf16.mxu1 %v466_v0  ;;  %v448_v5 = vld [vmem:[%s631_s0 + $0x4] ss:$8 sps:$4 sm:$0xff]   ;;  %v446_v12 = vld [vmem:[%s631_s0] ss:$8 sps:$4 sm:$0xff]   ;;  %v452_v14 = vld [vmem:[%s631_s0 + $0x14] ss:$8 sps:$4 sm:$0xff]  }
   0x4   :  { %v451_v6 = vld [vmem:[%s631_s0 + $0x44] ss:$8 sps:$4 sm:$0xff]   ;;  %385 = vmatprep.mubr.msk.bf16.mxu0 %vm167_vm0, %v448_v5  ;;  %v449_v13 = vld [vmem:[%s631_s0 + $0x40] ss:$8 sps:$4 sm:$0xff]   ;;  %v455_v15 = vld [vmem:[%s631_s0 + $0x54] ss:$8 sps:$4 sm:$0xff]  }
   0x5   :  { %389 = vmatprep.mubr.msk.bf16.mxu1 %vm167_vm0, %v451_v6  ;;  %v443_v9 = vld [vmem:[%s630_s1 + $0x8] sm:$0xff]   ;;  %v444_v10 = vld [vmem:[%s630_s1] sm:$0xff]   ;;  %v454_v17 = vld [vmem:[%s631_s0 + $0x10] ss:$8 sps:$4 sm:$0xff]  }
   0x6   :  { %192 = vmatpush1.bf16.msra.mxu0 %v438_v2  ;;  %428 = vmatpush1.bf16.msra.mxu1 %v438_v2  ;;  %v445_v11 = vld [vmem:[%s630_s1 + $0x40] sm:$0xff]   ;;  %v457_v18 = vld [vmem:[%s631_s0 + $0x50] ss:$8 sps:$4 sm:$0xff]   ;;  %v463_v23 = vld [vmem:[%s631_s0 + $0x34] ss:$8 sps:$4 sm:$0xff]  }
   0x7   :  { %193 = vmatprep.subr.bf16.mxu0 %v466_v0  ;;  %420 = vmatprep.subr.bf16.mxu1 %v466_v0  ;;  %v27_v16 = vld [vmem:[%s631_s0 + $0x60] sm:$0xff]  ;;  %v465_v24 = vld [vmem:[%s631_s0 + $0x30] ss:$8 sps:$4 sm:$0xff]  }
   0x8   :  { %v458_v19 = vld [vmem:[%s631_s0 + $0x24] ss:$8 sps:$4 sm:$0xff]   ;;  %v375_v20 = vcombine.high %v27_v16, %v27_v16  ;;  %v460_v21 = vld [vmem:[%s631_s0 + $0x20] ss:$8 sps:$4 sm:$0xff]   ;;  %v374_v22 = vcombine.low %v27_v16, %v27_v16 }
   0x9   :  { %v563_v25 = vld [vmem:[%s632_s2] ss:$0 sm:$0xff] }
   0xa   :  { %194 = vmatpush1.bf16.msra.mxu0 %v439_v3  ;;  %429 = vmatpush1.bf16.msra.mxu1 %v439_v3 }
   0xb   :  { %195 = vmatprep.subr.bf16.mxu0 %v466_v0  ;;  %421 = vmatprep.subr.bf16.mxu1 %v466_v0 }
   0xe   :  { %196 = vmatpush1.bf16.msra.mxu0 %v440_v4  ;;  %430 = vmatpush1.bf16.msra.mxu1 %v440_v4 }
   0xf   :  { %197 = vmatprep.subr.bf16.mxu0 %v466_v0  ;;  %422 = vmatprep.subr.bf16.mxu1 %v466_v0 }
  0x12   :  { %198 = vmatpush1.bf16.msra.mxu0 %v441_v7  ;;  %431 = vmatpush1.bf16.msra.mxu1 %v441_v7 }
  0x13   :  { %199 = vmatprep.subr.bf16.mxu0 %v466_v0  ;;  %423 = vmatprep.subr.bf16.mxu1 %v466_v0 }
  0x16   :  { %200 = vmatpush1.bf16.msra.mxu0 %v442_v8  ;;  %432 = vmatpush1.bf16.msra.mxu1 %v442_v8 }
  0x17   :  { %201 = vmatprep.subr.bf16.mxu0 %v466_v0  ;;  %424 = vmatprep.subr.bf16.mxu1 %v466_v0 }
  0x1a   :  { %202 = vmatpush1.bf16.msra.mxu0 %v443_v9  ;;  %433 = vmatpush1.bf16.msra.mxu1 %v443_v9 }
  0x1b   :  { %203 = vmatprep.subr.bf16.mxu0 %v466_v0  ;;  %425 = vmatprep.subr.bf16.mxu1 %v466_v0 }
  0x1e   :  { %204 = vmatpush1.bf16.msra.mxu0 %v444_v10  ;;  %434 = vmatpush1.bf16.msra.mxu1 %v444_v10 }
  0x1f   :  { %219 = vmatprep.subr.bf16.mxu0 %v466_v0  ;;  %426 = vmatprep.subr.bf16.mxu1 %v466_v0 }
  0x22   :  { %220 = vmatpush2.bf16.msra.mxu0 %v445_v11  ;;  %435 = vmatpush2.bf16.msra.mxu1 %v445_v11 }
  0x25   :  { %222 = vmatmul.mubr.bf16.vlgmr.msra.gmra.mxu0 %v446_v12  ;;  %254 = vmatmul.mubr.bf16.vlgmr.msra.gmra.mxu1 %v449_v13 }
  0x26   :  { %386 = vmatprep.mubr.msk.bf16.mxu0 %vm167_vm0, %v452_v14  ;;  %390 = vmatprep.mubr.msk.bf16.mxu1 %vm167_vm0, %v455_v15 }
  0x2d   :  { %230 = vmatmul.mubr.bf16.gmra.mxu0 %v454_v17  ;;  %262 = vmatmul.mubr.bf16.gmra.mxu1 %v457_v18 }
  0x2e   :  { %387 = vmatprep.mubr.msk.bf16.mxu0 %vm167_vm0, %v458_v19  ;;  %391 = vmatprep.mubr.msk.bf16.mxu1 %vm167_vm0, %v375_v20 }
  0x35   :  { %238 = vmatmul.mubr.bf16.gmra.mxu0 %v460_v21  ;;  %270 = vmatmul.mubr.bf16.gmra.mxu1 %v374_v22 }
  0x36   :  { %388 = vmatprep.mubr.msk.bf16.mxu0 %vm167_vm0, %v463_v23 }
  0x3d   :  { %246 = vmatmul.mubr.bf16.gmra.mxu0 %v465_v24 }
  0xe5   :  { %v223_v26 = vpop.f32.mrf.mxu0  ;;  %v255_v27 = vpop.f32.mrf.mxu1 }
  0xe6   :  { %v224_v28 = vadd.f32 %v563_v25, %v223_v26  ;;  %v256_v29 = vadd.f32 %v563_v25, %v255_v27 }
  0xe7   :  { %v225_v30 = vpop.f32.mrf.mxu0  ;;  %v257_v31 = vpop.f32.mrf.mxu1 }
  0xe8   :  { %v277_v32 = vmax.f32 %v224_v28, 0.0  ;;  %v285_v33 = vmax.f32 %v256_v29, 0.0 }
  0xe9   :  { %v226_v34 = vpop.f32.mrf.mxu0  ;;  %v258_v35 = vpop.f32.mrf.mxu1 }
  0xea   :  { %v405_v36 = vpack.c.bf16 %v277_v32, %v277_v32  ;;  %v227_v37 = vadd.f32 %v563_v25, %v226_v34  ;;  %v413_v38 = vpack.c.bf16 %v285_v33, %v285_v33  ;;  %v259_v39 = vadd.f32 %v563_v25, %v258_v35 }
  0xeb   :  { %v228_v40 = vpop.f32.mrf.mxu0  ;;  %v260_v41 = vpop.f32.mrf.mxu1 }
  0xec   :  { %344 = vst.msk [vmem:[%s633_s3] sm:$0xf] %vm343_vm1, %v405_v36  ;;  %v278_v42 = vmax.f32 %v227_v37, 0.0  ;;  %352 = vst.msk [vmem:[%s633_s3 + $0x20] sm:$0xf] %vm343_vm1, %v413_v38  ;;  %v286_v43 = vmax.f32 %v259_v39, 0.0 }
  0xed   :  { %v231_v44 = vpop.f32.mrf.mxu0  ;;  %v263_v45 = vpop.f32.mrf.mxu1 }
  0xee   :  { %v406_v46 = vpack.c.bf16 %v278_v42, %v278_v42  ;;  %v232_v47 = vadd.f32 %v563_v25, %v231_v44  ;;  %v414_v48 = vpack.c.bf16 %v286_v43, %v286_v43  ;;  %v264_v49 = vadd.f32 %v563_v25, %v263_v45 }
  0xef   :  { %v233_v50 = vpop.f32.mrf.mxu0  ;;  %v265_v51 = vpop.f32.mrf.mxu1 }
  0xf0   :  { %345 = vst.msk [vmem:[%s633_s3 + $0x4] sm:$0xf] %vm343_vm1, %v406_v46  ;;  %v279_v52 = vmax.f32 %v232_v47, 0.0  ;;  %353 = vst.msk [vmem:[%s633_s3 + $0x24] sm:$0xf] %vm343_vm1, %v414_v48  ;;  %v287_v53 = vmax.f32 %v264_v49, 0.0 }
  0xf1   :  { %v234_v54 = vpop.f32.mrf.mxu0  ;;  %v266_v55 = vpop.f32.mrf.mxu1 }
  0xf2   :  { %v407_v56 = vpack.c.bf16 %v279_v52, %v279_v52  ;;  %v235_v57 = vadd.f32 %v563_v25, %v234_v54  ;;  %v415_v58 = vpack.c.bf16 %v287_v53, %v287_v53  ;;  %v267_v59 = vadd.f32 %v563_v25, %v266_v55 }
  0xf3   :  { %v236_v60 = vpop.f32.mrf.mxu0  ;;  %v268_v61 = vpop.f32.mrf.mxu1 }
  0xf4   :  { %346 = vst.msk [vmem:[%s633_s3 + $0x8] sm:$0xf] %vm343_vm1, %v407_v56  ;;  %v280_v62 = vmax.f32 %v235_v57, 0.0  ;;  %354 = vst.msk [vmem:[%s633_s3 + $0x28] sm:$0xf] %vm343_vm1, %v415_v58  ;;  %v288_v63 = vmax.f32 %v267_v59, 0.0 }
  0xf5   :  { %v239_v0 = vpop.f32.mrf.mxu0  ;;  %v271_v1 = vpop.f32.mrf.mxu1 }
  0xf6   :  { %v408_v2 = vpack.c.bf16 %v280_v62, %v280_v62  ;;  %v240_v3 = vadd.f32 %v563_v25, %v239_v0  ;;  %v416_v4 = vpack.c.bf16 %v288_v63, %v288_v63  ;;  %v272_v5 = vadd.f32 %v563_v25, %v271_v1 }
  0xf7   :  { %v241_v6 = vpop.f32.mrf.mxu0  ;;  %v273_v7 = vpop.f32.mrf.mxu1 }
  0xf8   :  { %347 = vst.msk [vmem:[%s633_s3 + $0xc] sm:$0xf] %vm343_vm1, %v408_v2  ;;  %v281_v8 = vmax.f32 %v240_v3, 0.0  ;;  %355 = vst.msk [vmem:[%s633_s3 + $0x2c] sm:$0xf] %vm343_vm1, %v416_v4  ;;  %v289_v9 = vmax.f32 %v272_v5, 0.0 }
  0xf9   :  { %v242_v10 = vpop.f32.mrf.mxu0  ;;  %v274_v11 = vpop.f32.mrf.mxu1 }
  0xfa   :  { %v409_v12 = vpack.c.bf16 %v281_v8, %v281_v8  ;;  %v243_v13 = vadd.f32 %v563_v25, %v242_v10  ;;  %v417_v14 = vpack.c.bf16 %v289_v9, %v289_v9 }
  0xfb   :  { %v244_v15 = vpop.f32.mrf.mxu0  ;;  %v275_v16 = vpop.f32.mrf.mxu1 }
  0xfc   :  { %348 = vst.msk [vmem:[%s633_s3 + $0x10] sm:$0xf] %vm343_vm1, %v409_v12  ;;  %v282_v17 = vmax.f32 %v243_v13, 0.0  ;;  %356 = vst.msk [vmem:[%s633_s3 + $0x30] sm:$0xf] %vm343_vm1, %v417_v14 }
  0xfd   :  { %v247_v18 = vpop.f32.mrf.mxu0 }
  0xfe   :  { %v410_v19 = vpack.c.bf16 %v282_v17, %v282_v17  ;;  %v248_v20 = vadd.f32 %v563_v25, %v247_v18 }
  0xff   :  { %v249_v21 = vpop.f32.mrf.mxu0 }
 0x100   :  { %349 = vst.msk [vmem:[%s633_s3 + $0x14] sm:$0xf] %vm343_vm1, %v410_v19  ;;  %v283_v22 = vmax.f32 %v248_v20, 0.0 }
 0x101   :  { %v250_v23 = vpop.f32.mrf.mxu0 }
 0x102   :  { %v411_v24 = vpack.c.bf16 %v283_v22, %v283_v22  ;;  %v251_v26 = vadd.f32 %v563_v25, %v250_v23 }
 0x103   :  { %v252_v27 = vpop.f32.mrf.mxu0 }
 0x104   :  { %350 = vst.msk [vmem:[%s633_s3 + $0x18] sm:$0xf] %vm343_vm1, %v411_v24  ;;  %v284_v28 = vmax.f32 %v251_v26, 0.0 }
 0x106   :  { %v412_v29 = vpack.c.bf16 %v284_v28, %v284_v28 }
 0x108   :  { %351 = vst.msk [vmem:[%s633_s3 + $0x1c] sm:$0xf] %vm343_vm1, %v412_v29 }

// kernel: autoencoder_forward.8
= control target key start
LH: loop header
LB: loop body
LE: loop exit
PB: predicated region body
PF: predicated region fallthrough
CT: control target
= control target key end

     0   :  { %vm1519_vm0 = vmmov 0   ;;  %vm858_vm1 = vcmask 261120   ;;  %vm1143_vm2 = vcmask 519168   ;;  %s1861_s1 = inlined_call_operand.vmem [shape: bf16[1568,64], index: 1, kind: input, shape index: {}]   ;;  %s1862_s0 = inlined_call_operand.vmem [shape: bf16[8,1568], index: 0, kind: input, shape index: {}]   ;;  %s1863_s2 = inlined_call_operand.vmem [shape: f32[1,64], index: 2, kind: input, shape index: {}]   ;;  %s1864_s3 = inlined_call_operand.vmem [shape: bf16[8,64], index: 3, kind: output, shape index: {}]  }
   0x1   :  { %v1407_v0 = vld [vmem:[%s1861_s1 + $0x78] sm:$0xff]   ;;  %v1411_v4 = vld [vmem:[%s1861_s1 + $0x70] sm:$0xff]   ;;  %v1415_v8 = vld [vmem:[%s1861_s1 + $0x68] sm:$0xff]  }
   0x2   :  { %v1408_v1 = vld [vmem:[%s1861_s1 + $0xf8] sm:$0xff]   ;;  %1262 = vmatprep.subr.bf16.mxu0 %v1407_v0  ;;  %v1412_v5 = vld [vmem:[%s1861_s1 + $0xf0] sm:$0xff]   ;;  %v1416_v9 = vld [vmem:[%s1861_s1 + $0xe8] sm:$0xff]  }
   0x3   :  { %v1409_v2 = vld [vmem:[%s1861_s1 + $0x38] sm:$0xff]   ;;  %1284 = vmatprep.subr.bf16.mxu1 %v1408_v1  ;;  %v1413_v6 = vld [vmem:[%s1861_s1 + $0x30] sm:$0xff]   ;;  %v1417_v10 = vld [vmem:[%s1861_s1 + $0x28] sm:$0xff]  }
   0x4   :  { %v1410_v3 = vld [vmem:[%s1861_s1 + $0xb8] sm:$0xff]   ;;  %1263 = vmatpush3.bf16.msra.mxu0 %v1409_v2  ;;  %v1414_v7 = vld [vmem:[%s1861_s1 + $0xb0] sm:$0xff]   ;;  %v1418_v11 = vld [vmem:[%s1861_s1 + $0xa8] sm:$0xff]  }
   0x5   :  { %1285 = vmatpush3.bf16.msra.mxu1 %v1410_v3  ;;  %1264 = vmatprep.subr.bf16.mxu0 %v1411_v4  ;;  %v1419_v12 = vld [vmem:[%s1861_s1 + $0x60] sm:$0xff]   ;;  %v1423_v16 = vld [vmem:[%s1861_s1 + $0x58] sm:$0xff]   ;;  %v1427_v20 = vld [vmem:[%s1861_s1 + $0x50] sm:$0xff]  }
   0x6   :  { %1286 = vmatprep.subr.bf16.mxu1 %v1412_v5  ;;  %v1420_v13 = vld [vmem:[%s1861_s1 + $0xe0] sm:$0xff]   ;;  %v1424_v17 = vld [vmem:[%s1861_s1 + $0xd8] sm:$0xff]   ;;  %v1428_v21 = vld [vmem:[%s1861_s1 + $0xd0] sm:$0xff]  }
   0x7   :  { %v1421_v14 = vld [vmem:[%s1861_s1 + $0x20] sm:$0xff]   ;;  %v1425_v18 = vld [vmem:[%s1861_s1 + $0x18] sm:$0xff]   ;;  %v1429_v22 = vld [vmem:[%s1861_s1 + $0x10] sm:$0xff]  }
   0x8   :  { %1265 = vmatpush3.bf16.msra.mxu0 %v1413_v6  ;;  %v1422_v15 = vld [vmem:[%s1861_s1 + $0xa0] sm:$0xff]   ;;  %v1426_v19 = vld [vmem:[%s1861_s1 + $0x98] sm:$0xff]   ;;  %v1430_v23 = vld [vmem:[%s1861_s1 + $0x90] sm:$0xff]  }
   0x9   :  { %1287 = vmatpush3.bf16.msra.mxu1 %v1414_v7  ;;  %1266 = vmatprep.subr.bf16.mxu0 %v1415_v8  ;;  %v1431_v24 = vld [vmem:[%s1861_s1 + $0x48] sm:$0xff]   ;;  %v1435_v28 = vld [vmem:[%s1861_s1 + $0x40] sm:$0xff]   ;;  %v1443_v38 = vld [vmem:[%s1861_s1 + $0x178] sm:$0xff]  }
   0xa   :  { %1288 = vmatprep.subr.bf16.mxu1 %v1416_v9  ;;  %v1432_v25 = vld [vmem:[%s1861_s1 + $0xc8] sm:$0xff]   ;;  %v1436_v29 = vld [vmem:[%s1861_s1 + $0xc0] sm:$0xff]   ;;  %v1444_v39 = vld [vmem:[%s1861_s1 + $0x1f8] sm:$0xff]  }
   0xb   :  { %v1433_v26 = vld [vmem:[%s1861_s1 + $0x8] sm:$0xff]   ;;  %v1437_v30 = vld [vmem:[%s1861_s1] sm:$0xff]   ;;  %v1445_v40 = vld [vmem:[%s1861_s1 + $0x138] sm:$0xff]  }
   0xc   :  { %1267 = vmatpush3.bf16.msra.mxu0 %v1417_v10  ;;  %v1434_v27 = vld [vmem:[%s1861_s1 + $0x88] sm:$0xff]   ;;  %v1438_v31 = vld [vmem:[%s1861_s1 + $0x80] sm:$0xff]   ;;  %v1446_v41 = vld [vmem:[%s1861_s1 + $0x1b8] sm:$0xff]  }
   0xd   :  { %1289 = vmatpush3.bf16.msra.mxu1 %v1418_v11  ;;  %1268 = vmatprep.subr.bf16.mxu0 %v1419_v12  ;;  %v15_v32 = vld [vmem:[%s1862_s0] sm:$0xff]  ;;  %v16_v33 = vld [vmem:[%s1862_s0 + $0x8] sm:$0xff]  ;;  %v1447_v42 = vld [vmem:[%s1861_s1 + $0x170] sm:$0xff]  }
   0xe   :  { %1290 = vmatprep.subr.bf16.mxu1 %v1420_v13  ;;  %v1150_v34 = vcombine.low %v15_v32, %v15_v32  ;;  %v1151_v35 = vcombine.high %v15_v32, %v15_v32  ;;  %v1152_v36 = vcombine.low %v16_v33, %v16_v33  ;;  %v1153_v37 = vcombine.high %v16_v33, %v16_v33  ;;  %v1448_v43 = vld [vmem:[%s1861_s1 + $0x1f0] sm:$0xff]   ;;  %v1451_v46 = vld [vmem:[%s1861_s1 + $0x168] sm:$0xff]   ;;  %v1455_v50 = vld [vmem:[%s1861_s1 + $0x160] sm:$0xff]  }
   0xf   :  { %v1449_v44 = vld [vmem:[%s1861_s1 + $0x130] sm:$0xff]   ;;  %v1452_v47 = vld [vmem:[%s1861_s1 + $0x1e8] sm:$0xff]   ;;  %v1456_v51 = vld [vmem:[%s1861_s1 + $0x1e0] sm:$0xff]  }
  0x10   :  { %1269 = vmatpush3.bf16.msra.mxu0 %v1421_v14  ;;  %894 = vmatprep.mubr.bf16.mxu0 %v1151_v35  ;;  %v1450_v45 = vld [vmem:[%s1861_s1 + $0x1b0] sm:$0xff]   ;;  %v1453_v48 = vld [vmem:[%s1861_s1 + $0x128] sm:$0xff]   ;;  %v1457_v52 = vld [vmem:[%s1861_s1 + $0x120] sm:$0xff]  }
  0x11   :  { %1291 = vmatpush3.bf16.msra.mxu1 %v1422_v15  ;;  %1270 = vmatprep.subr.bf16.mxu0 %v1423_v16  ;;  %v1454_v49 = vld [vmem:[%s1861_s1 + $0x1a8] sm:$0xff]   ;;  %v1458_v53 = vld [vmem:[%s1861_s1 + $0x1a0] sm:$0xff]   ;;  %v1459_v54 = vld [vmem:[%s1861_s1 + $0x158] sm:$0xff]  }
  0x12   :  { %1292 = vmatprep.subr.bf16.mxu1 %v1424_v17  ;;  %934 = vmatprep.mubr.bf16.mxu1 %v1153_v37  ;;  %v1460_v55 = vld [vmem:[%s1861_s1 + $0x1d8] sm:$0xff]   ;;  %v1463_v58 = vld [vmem:[%s1861_s1 + $0x150] sm:$0xff]   ;;  %v1467_v62 = vld [vmem:[%s1861_s1 + $0x148] sm:$0xff]  }
  0x13   :  { %v1461_v56 = vld [vmem:[%s1861_s1 + $0x118] sm:$0xff]   ;;  %v1464_v59 = vld [vmem:[%s1861_s1 + $0x1d0] sm:$0xff]   ;;  %v1468_v63 = vld [vmem:[%s1861_s1 + $0x1c8] sm:$0xff]  }
  0x14   :  { %1271 = vmatpush3.bf16.msra.mxu0 %v1425_v18  ;;  %v1462_v57 = vld [vmem:[%s1861_s1 + $0x198] sm:$0xff]   ;;  %v1465_v60 = vld [vmem:[%s1861_s1 + $0x110] sm:$0xff]   ;;  %v1469_v0 = vld [vmem:[%s1861_s1 + $0x108] sm:$0xff]  }
  0x15   :  { %1293 = vmatpush3.bf16.msra.mxu1 %v1426_v19  ;;  %1272 = vmatprep.subr.bf16.mxu0 %v1427_v20  ;;  %v1466_v61 = vld [vmem:[%s1861_s1 + $0x190] sm:$0xff]   ;;  %v1470_v1 = vld [vmem:[%s1861_s1 + $0x188] sm:$0xff]   ;;  %v1471_v2 = vld [vmem:[%s1861_s1 + $0x140] sm:$0xff]  }
  0x16   :  { %1294 = vmatprep.subr.bf16.mxu1 %v1428_v21  ;;  %v1472_v3 = vld [vmem:[%s1861_s1 + $0x1c0] sm:$0xff]   ;;  %v17_v6 = vld [vmem:[%s1862_s0 + $0x10] sm:$0xff]  ;;  %v18_v9 = vld [vmem:[%s1862_s0 + $0x18] sm:$0xff] }
  0x17   :  { %v1473_v4 = vld [vmem:[%s1861_s1 + $0x100] sm:$0xff]   ;;  %v1154_v7 = vcombine.low %v17_v6, %v17_v6  ;;  %v1155_v8 = vcombine.high %v17_v6, %v17_v6  ;;  %v1156_v10 = vcombine.low %v18_v9, %v18_v9  ;;  %v1157_v11 = vcombine.high %v18_v9, %v18_v9  ;;  %v1479_v12 = vld [vmem:[%s1861_s1 + $0x278] sm:$0xff]   ;;  %v1483_v16 = vld [vmem:[%s1861_s1 + $0x270] sm:$0xff]  }
  0x18   :  { %1273 = vmatpush3.bf16.msra.mxu0 %v1429_v22  ;;  %v1474_v5 = vld [vmem:[%s1861_s1 + $0x180] sm:$0xff]   ;;  %v1480_v13 = vld [vmem:[%s1861_s1 + $0x2f8] sm:$0xff]   ;;  %v1484_v17 = vld [vmem:[%s1861_s1 + $0x2f0] sm:$0xff]  }
  0x19   :  { %1295 = vmatpush3.bf16.msra.mxu1 %v1430_v23  ;;  %1274 = vmatprep.subr.bf16.mxu0 %v1431_v24  ;;  %v1481_v14 = vld [vmem:[%s1861_s1 + $0x238] sm:$0xff]   ;;  %v1485_v18 = vld [vmem:[%s1861_s1 + $0x230] sm:$0xff]   ;;  %v1487_v20 = vld [vmem:[%s1861_s1 + $0x268] sm:$0xff]  }
  0x1a   :  { %1296 = vmatprep.subr.bf16.mxu1 %v1432_v25  ;;  %v1482_v15 = vld [vmem:[%s1861_s1 + $0x2b8] sm:$0xff]   ;;  %v1486_v19 = vld [vmem:[%s1861_s1 + $0x2b0] sm:$0xff]   ;;  %v1488_v21 = vld [vmem:[%s1861_s1 + $0x2e8] sm:$0xff]  }
  0x1b   :  { %v1489_v22 = vld [vmem:[%s1861_s1 + $0x228] sm:$0xff]   ;;  %v1491_v24 = vld [vmem:[%s1861_s1 + $0x260] sm:$0xff]   ;;  %v1499_v32 = vld [vmem:[%s1861_s1 + $0x250] sm:$0xff]  }
  0x1c   :  { %1275 = vmatpush3.bf16.msra.mxu0 %v1433_v26  ;;  %v1490_v23 = vld [vmem:[%s1861_s1 + $0x2a8] sm:$0xff]   ;;  %v1492_v25 = vld [vmem:[%s1861_s1 + $0x2e0] sm:$0xff]   ;;  %v1500_v33 = vld [vmem:[%s1861_s1 + $0x2d0] sm:$0xff]  }
  0x1d   :  { %1297 = vmatpush3.bf16.msra.mxu1 %v1434_v27  ;;  %1276 = vmatprep.subr.bf16.mxu0 %v1435_v28  ;;  %v1493_v26 = vld [vmem:[%s1861_s1 + $0x220] sm:$0xff]   ;;  %v1495_v28 = vld [vmem:[%s1861_s1 + $0x258] sm:$0xff]   ;;  %v1502_v35 = vld [vmem:[%s1861_s1 + $0x290] sm:$0xff]  }
  0x1e   :  { %1298 = vmatprep.subr.bf16.mxu1 %v1436_v29  ;;  %v1494_v27 = vld [vmem:[%s1861_s1 + $0x2a0] sm:$0xff]   ;;  %v1496_v29 = vld [vmem:[%s1861_s1 + $0x2d8] sm:$0xff]   ;;  %v1504_v37 = vld [vmem:[%s1861_s1 + $0x2c8] sm:$0xff]  }
  0x20   :  { %1277 = vmatpush3.bf16.msra.mxu0 %v1437_v30  ;;  %v1497_v30 = vld [vmem:[%s1861_s1 + $0x218] sm:$0xff]  }
  0x21   :  { %1299 = vmatpush3.bf16.msra.mxu1 %v1438_v31  ;;  %1306 = vmatprep.subr.bf16.mxu0 %v1443_v38  ;;  %v1498_v31 = vld [vmem:[%s1861_s1 + $0x298] sm:$0xff]   ;;  %v1505_v38 = vld [vmem:[%s1861_s1 + $0x208] sm:$0xff]  }
  0x22   :  { %1328 = vmatprep.subr.bf16.mxu1 %v1444_v39  ;;  %v1506_v39 = vld [vmem:[%s1861_s1 + $0x288] sm:$0xff]  }
  0x23   :  { %895 = vmatmul.mubr.bf16.vlgmr.msra.gmra.mxu0 %v1150_v34  ;;  %v1501_v34 = vld [vmem:[%s1861_s1 + $0x210] sm:$0xff]  }
  0x24   :  { %935 = vmatmul.mubr.bf16.vlgmr.msra.gmra.mxu1 %v1152_v36  ;;  %1307 = vmatpush3.bf16.msra.mxu0 %v1445_v40  ;;  %v1503_v36 = vld [vmem:[%s1861_s1 + $0x248] sm:$0xff]   ;;  %v1507_v40 = vld [vmem:[%s1861_s1 + $0x240] sm:$0xff]  }
  0x25   :  { %1329 = vmatpush3.bf16.msra.mxu1 %v1446_v41  ;;  %1308 = vmatprep.subr.bf16.mxu0 %v1447_v42  ;;  %v1508_v41 = vld [vmem:[%s1861_s1 + $0x2c0] sm:$0xff]  }
  0x26   :  { %1330 = vmatprep.subr.bf16.mxu1 %v1448_v43  ;;  %974 = vmatprep.mubr.bf16.mxu0 %v1155_v8  ;;  %v1509_v42 = vld [vmem:[%s1861_s1 + $0x200] sm:$0xff]  }
  0x27   :  { %1014 = vmatprep.mubr.bf16.mxu1 %v1157_v11  ;;  %v1510_v43 = vld [vmem:[%s1861_s1 + $0x280] sm:$0xff]  }
  0x28   :  { %1309 = vmatpush3.bf16.msra.mxu0 %v1449_v44  ;;  %v19_v44 = vld [vmem:[%s1862_s0 + $0x20] sm:$0xff] }
  0x29   :  { %1331 = vmatpush3.bf16.msra.mxu1 %v1450_v45  ;;  %1310 = vmatprep.subr.bf16.mxu0 %v1451_v46  ;;  %v20_v45 = vld [vmem:[%s1862_s0 + $0x28] sm:$0xff]  ;;  %v1158_v46 = vcombine.low %v19_v44, %v19_v44 }
  0x2a   :  { %1332 = vmatprep.subr.bf16.mxu1 %v1452_v47  ;;  %v1159_v47 = vcombine.high %v19_v44, %v19_v44 }
  0x2c   :  { %1311 = vmatpush3.bf16.msra.mxu0 %v1453_v48  ;;  %v1160_v48 = vcombine.low %v20_v45, %v20_v45 }
  0x2d   :  { %1333 = vmatpush3.bf16.msra.mxu1 %v1454_v49  ;;  %1312 = vmatprep.subr.bf16.mxu0 %v1455_v50  ;;  %v1161_v49 = vcombine.high %v20_v45, %v20_v45  ;;  %v1515_v50 = vld [vmem:[%s1861_s1 + $0x308] sm:$0xff]  }
  0x2e   :  { %1334 = vmatprep.subr.bf16.mxu1 %v1456_v51  ;;  %v1518_v51 = vmov 0.0  }
  0x30   :  { %1313 = vmatpush3.bf16.msra.mxu0 %v1457_v52  ;;  %v1516_v52 = vld [vmem:[%s1861_s1 + $0x300] sm:$0xff]  }
  0x31   :  { %1335 = vmatpush3.bf16.msra.mxu1 %v1458_v53  ;;  %1314 = vmatprep.subr.bf16.mxu0 %v1459_v54  ;;  %v1517_v53 = vld [vmem:[%s1862_s0 + $0x30] ss:$0 sps:$4 sm:$0xff]  }
  0x32   :  { %1336 = vmatprep.subr.bf16.mxu1 %v1460_v55 }
  0x34   :  { %1315 = vmatpush3.bf16.msra.mxu0 %v1461_v56 }
  0x35   :  { %1337 = vmatpush3.bf16.msra.mxu1 %v1462_v57  ;;  %1316 = vmatprep.subr.bf16.mxu0 %v1463_v58 }
  0x36   :  { %1338 = vmatprep.subr.bf16.mxu1 %v1464_v59 }
  0x38   :  { %1317 = vmatpush3.bf16.msra.mxu0 %v1465_v60 }
  0x39   :  { %1339 = vmatpush3.bf16.msra.mxu1 %v1466_v61  ;;  %1318 = vmatprep.subr.bf16.mxu0 %v1467_v62 }
  0x3a   :  { %1340 = vmatprep.subr.bf16.mxu1 %v1468_v63 }
  0x3c   :  { %1319 = vmatpush3.bf16.msra.mxu0 %v1469_v0 }
  0x3d   :  { %1341 = vmatpush3.bf16.msra.mxu1 %v1470_v1  ;;  %1320 = vmatprep.subr.bf16.mxu0 %v1471_v2 }
  0x3e   :  { %1342 = vmatprep.subr.bf16.mxu1 %v1472_v3 }
  0x40   :  { %1321 = vmatpush3.bf16.msra.mxu0 %v1473_v4 }
  0x41   :  { %1343 = vmatpush3.bf16.msra.mxu1 %v1474_v5  ;;  %1350 = vmatprep.subr.bf16.mxu0 %v1479_v12 }
  0x42   :  { %1372 = vmatprep.subr.bf16.mxu1 %v1480_v13 }
  0x43   :  { %975 = vmatmul.mubr.bf16.vlgmr.msra.gmra.mxu0 %v1154_v7  ;;  %v1149_v7 = vld [vmem:[%s1863_s2] ss:$0 sm:$0xff] }
  0x44   :  { %1015 = vmatmul.mubr.bf16.vlgmr.msra.gmra.mxu1 %v1156_v10  ;;  %1351 = vmatpush3.bf16.msra.mxu0 %v1481_v14 }
  0x45   :  { %1373 = vmatpush3.bf16.msra.mxu1 %v1482_v15  ;;  %1352 = vmatprep.subr.bf16.mxu0 %v1483_v16 }
  0x46   :  { %1374 = vmatprep.subr.bf16.mxu1 %v1484_v17  ;;  %1054 = vmatprep.mubr.bf16.mxu0 %v1159_v47 }
  0x47   :  { %1094 = vmatprep.mubr.bf16.mxu1 %v1161_v49 }
  0x48   :  { %1353 = vmatpush3.bf16.msra.mxu0 %v1485_v18 }
  0x49   :  { %1375 = vmatpush3.bf16.msra.mxu1 %v1486_v19  ;;  %1354 = vmatprep.subr.bf16.mxu0 %v1487_v20 }
  0x4a   :  { %1376 = vmatprep.subr.bf16.mxu1 %v1488_v21 }
  0x4c   :  { %1355 = vmatpush3.bf16.msra.mxu0 %v1489_v22 }
  0x4d   :  { %1377 = vmatpush3.bf16.msra.mxu1 %v1490_v23  ;;  %1356 = vmatprep.subr.bf16.mxu0 %v1491_v24 }
  0x4e   :  { %1378 = vmatprep.subr.bf16.mxu1 %v1492_v25 }
  0x50   :  { %1357 = vmatpush3.bf16.msra.mxu0 %v1493_v26 }
  0x51   :  { %1379 = vmatpush3.bf16.msra.mxu1 %v1494_v27  ;;  %1358 = vmatprep.subr.bf16.mxu0 %v1495_v28 }
  0x52   :  { %1380 = vmatprep.subr.bf16.mxu1 %v1496_v29 }
  0x54   :  { %1359 = vmatpush3.bf16.msra.mxu0 %v1497_v30 }
  0x55   :  { %1381 = vmatpush3.bf16.msra.mxu1 %v1498_v31  ;;  %1360 = vmatprep.subr.bf16.mxu0 %v1499_v32 }
  0x56   :  { %1382 = vmatprep.subr.bf16.mxu1 %v1500_v33 }
  0x58   :  { %1361 = vmatpush3.bf16.msra.mxu0 %v1501_v34 }
  0x59   :  { %1383 = vmatpush3.bf16.msra.mxu1 %v1502_v35  ;;  %1362 = vmatprep.subr.bf16.mxu0 %v1503_v36 }
  0x5a   :  { %1384 = vmatprep.subr.bf16.mxu1 %v1504_v37 }
  0x5c   :  { %1363 = vmatpush3.bf16.msra.mxu0 %v1505_v38 }
  0x5d   :  { %1385 = vmatpush3.bf16.msra.mxu1 %v1506_v39  ;;  %1364 = vmatprep.subr.bf16.mxu0 %v1507_v40 }
  0x5e   :  { %1386 = vmatprep.subr.bf16.mxu1 %v1508_v41 }
  0x60   :  { %1365 = vmatpush3.bf16.msra.mxu0 %v1509_v42 }
  0x61   :  { %1387 = vmatpush3.bf16.msra.mxu1 %v1510_v43  ;;  %1397 = vmatprep.subr.bf16.mxu0 %v1518_v51 }
  0x63   :  { %1055 = vmatmul.mubr.bf16.vlgmr.msra.gmra.mxu0 %v1158_v46 }
  0x64   :  { %1095 = vmatmul.mubr.bf16.vlgmr.msra.gmra.mxu1 %v1160_v48  ;;  %1398 = vmatpush3.bf16.msra.mxu0 %v1515_v50 }
  0x65   :  { %1399 = vmatprep.subr.bf16.mxu0 %v1518_v51  ;;  %1401 = vmatprep.mubr.msk.bf16.mxu0 %vm1519_vm0, %v1518_v51 }
  0x68   :  { %1400 = vmatpush3.bf16.msra.mxu0 %v1516_v52 }
  0x6b   :  { %1402 = vmatmul.mubr.msk.bf16.vlgmr.msra.gmra.mxu0 %vm858_vm1, %v1517_v53 }
  0xe3   :  { %v1278_v54 = vpop.f32.mrf.mxu0 }
  0xe4   :  { %v1300_v55 = vpop.f32.mrf.mxu1 }
  0xe5   :  { %v1279_v56 = vpop.f32.mrf.mxu0 }
  0xe6   :  { %v1301_v57 = vpop.f32.mrf.mxu1  ;;  %v1280_v6 = vadd.f32 %v1279_v56, %v1278_v54 }
  0xe7   :  { %v1281_v58 = vpop.f32.mrf.mxu0  ;;  %v1302_v9 = vadd.f32 %v1301_v57, %v1300_v55 }
  0xe8   :  { %v1303_v59 = vpop.f32.mrf.mxu1  ;;  %v897_v8 = vadd.f32 %v1280_v6, %v1149_v7 }
  0xe9   :  { %v1282_v60 = vpop.f32.mrf.mxu0 }
  0xea   :  { %v1304_v61 = vpop.f32.mrf.mxu1  ;;  %v937_v11 = vadd.f32 %v1302_v9, %v897_v8 }
 0x103   :  { %v1322_v62 = vpop.f32.mrf.mxu0 }
 0x104   :  { %v1344_v63 = vpop.f32.mrf.mxu1 }
 0x105   :  { %v1323_v0 = vpop.f32.mrf.mxu0 }
 0x106   :  { %v1345_v1 = vpop.f32.mrf.mxu1  ;;  %v1324_v10 = vadd.f32 %v1323_v0, %v1322_v62 }
 0x107   :  { %v1325_v2 = vpop.f32.mrf.mxu0  ;;  %v1346_v13 = vadd.f32 %v1345_v1, %v1344_v63 }
 0x108   :  { %v1347_v3 = vpop.f32.mrf.mxu1  ;;  %v977_v12 = vadd.f32 %v1324_v10, %v937_v11 }
 0x109   :  { %v1326_v4 = vpop.f32.mrf.mxu0 }
 0x10a   :  { %v1348_v5 = vpop.f32.mrf.mxu1  ;;  %v1017_v17 = vadd.f32 %v1346_v13, %v977_v12 }
 0x123   :  { %v1366_v14 = vpop.f32.mrf.mxu0 }
 0x124   :  { %v1388_v15 = vpop.f32.mrf.mxu1 }
 0x125   :  { %v1367_v16 = vpop.f32.mrf.mxu0 }
 0x126   :  { %v1368_v18 = vadd.f32 %v1367_v16, %v1366_v14  ;;  %v1389_v19 = vpop.f32.mrf.mxu1 }
 0x127   :  { %v1390_v20 = vadd.f32 %v1389_v19, %v1388_v15  ;;  %v1369_v21 = vpop.f32.mrf.mxu0 }
 0x128   :  { %v1057_v22 = vadd.f32 %v1368_v18, %v1017_v17  ;;  %v1391_v23 = vpop.f32.mrf.mxu1 }
 0x129   :  { %v1370_v24 = vpop.f32.mrf.mxu0 }
 0x12a   :  { %v1392_v25 = vpop.f32.mrf.mxu1  ;;  %v1097_v26 = vadd.f32 %v1390_v20, %v1057_v22 }
 0x12b   :  { %v1136_v27 = vpop.f32.mrf.mxu0 }
 0x12c   :  { %v1137_v28 = vadd.f32 %v1136_v27, %v1097_v26 }
 0x12d   :  { %v1403_v29 = vpop.f32.mrf.mxu0 }
 0x12e   :  { %v1142_v30 = vpack.c.bf16 %v1137_v28, %v1137_v28 }
 0x12f   :  { %v1139_v31 = vpop.f32.mrf.mxu0 }
 0x130   :  { %1144 = vst.msk [vmem:[%s1864_s3] sm:$0xf] %vm1143_vm2, %v1142_v30 }
 0x131   :  { %v1404_v32 = vpop.f32.mrf.mxu0 }

// kernel: autoencoder_forward.9
= control target key start
LH: loop header
LB: loop body
LE: loop exit
PB: predicated region body
PF: predicated region fallthrough
CT: control target
= control target key end

     0   :  { %vm5456_vm0 = vmmov 0   ;;  %vm2596_vm1 = vcmask 523264   ;;  %vm3828_vm2 = vcmask 257024   ;;  %s6973_s1 = inlined_call_operand.vmem [shape: bf16[3136,32], index: 1, kind: input, shape index: {}]   ;;  %s6974_s0 = inlined_call_operand.vmem [shape: bf16[104,3136], index: 0, kind: input, shape index: {}]   ;;  %s6975_s2 = inlined_call_operand.vmem [shape: f32[1,32], index: 2, kind: input, shape index: {}]   ;;  %s6976_s3 = inlined_call_operand.vmem [shape: bf16[104,32], index: 3, kind: output, shape index: {}]  }
   0x1   :  { %v5012_v0 = vld [vmem:[%s6973_s1 + $0x78] sm:$0xff]   ;;  %v5014_v2 = vld [vmem:[%s6973_s1 + $0x70] sm:$0xff]   ;;  %v5016_v4 = vld [vmem:[%s6973_s1 + $0x68] sm:$0xff]  }
   0x2   :  { %v5013_v1 = vld [vmem:[%s6973_s1 + $0x38] sm:$0xff]   ;;  %4994 = vmatprep.subr.bf16.mxu1 %v5012_v0  ;;  %4251 = vmatprep.subr.bf16.mxu0 %v5012_v0  ;;  %v5015_v3 = vld [vmem:[%s6973_s1 + $0x30] sm:$0xff]   ;;  %v5017_v5 = vld [vmem:[%s6973_s1 + $0x28] sm:$0xff]  }
   0x3   :  { %5002 = vmatpush3.bf16.msra.mxu1 %v5013_v1  ;;  %4252 = vmatpush3.bf16.msra.mxu0 %v5013_v1  ;;  %v5018_v6 = vld [vmem:[%s6973_s1 + $0x60] sm:$0xff]   ;;  %v5020_v8 = vld [vmem:[%s6973_s1 + $0x58] sm:$0xff]   ;;  %v5022_v10 = vld [vmem:[%s6973_s1 + $0x50] sm:$0xff]  }
   0x4   :  { %4995 = vmatprep.subr.bf16.mxu1 %v5014_v2  ;;  %4253 = vmatprep.subr.bf16.mxu0 %v5014_v2  ;;  %v5019_v7 = vld [vmem:[%s6973_s1 + $0x20] sm:$0xff]   ;;  %v5021_v9 = vld [vmem:[%s6973_s1 + $0x18] sm:$0xff]   ;;  %v5023_v13 = vld [vmem:[%s6973_s1 + $0x10] sm:$0xff]  }
   0x5   :  { %v5030_v11 = vld [vmem:[%s6974_s0 + $0x324] ss:$100 sps:$4 sm:$0xff]   ;;  %v5034_v20 = vld [vmem:[%s6973_s1 + $0xf8] sm:$0xff]   ;;  %v5038_v24 = vld [vmem:[%s6973_s1 + $0xf0] sm:$0xff]  }
   0x6   :  { %v5033_v12 = vld [vmem:[%s6974_s0 + $0x4] ss:$100 sps:$4 sm:$0xff]   ;;  %2682 = vmatprep.mubr.bf16.mxu1 %v5030_v11  ;;  %v5036_v21 = vld [vmem:[%s6973_s1 + $0x178] sm:$0xff]   ;;  %v5040_v25 = vld [vmem:[%s6973_s1 + $0x170] sm:$0xff]  }
   0x7   :  { %5003 = vmatpush3.bf16.msra.mxu1 %v5015_v3  ;;  %4254 = vmatpush3.bf16.msra.mxu0 %v5015_v3  ;;  %v5024_v14 = vld [vmem:[%s6973_s1 + $0x48] sm:$0xff]   ;;  %v5026_v16 = vld [vmem:[%s6973_s1 + $0x40] sm:$0xff]   ;;  %v5035_v22 = vld [vmem:[%s6973_s1 + $0xb8] sm:$0xff]  }
   0x8   :  { %4996 = vmatprep.subr.bf16.mxu1 %v5016_v4  ;;  %4255 = vmatprep.subr.bf16.mxu0 %v5016_v4  ;;  %v5025_v15 = vld [vmem:[%s6973_s1 + $0x8] sm:$0xff]   ;;  %v5027_v17 = vld [vmem:[%s6973_s1] sm:$0xff]   ;;  %v5037_v23 = vld [vmem:[%s6973_s1 + $0x138] sm:$0xff]  }
   0x9   :  { %2650 = vmatprep.mubr.bf16.mxu0 %v5033_v12  ;;  %v5028_v18 = vld [vmem:[%s6974_s0 + $0x320] ss:$100 sps:$4 sm:$0xff]   ;;  %v5042_v26 = vld [vmem:[%s6974_s0 + $0xcc] ss:$100 sps:$4 sm:$0xff]   ;;  %v5056_v39 = vld [vmem:[%s6974_s0 + $0x194] ss:$100 sps:$4 sm:$0xff]  }
   0xa   :  { %v5031_v19 = vld [vmem:[%s6974_s0] ss:$100 sps:$4 sm:$0xff]   ;;  %v5039_v27 = vld [vmem:[%s6973_s1 + $0xb0] sm:$0xff]   ;;  %v5044_v30 = vld [vmem:[%s6973_s1 + $0xe8] sm:$0xff]  }
   0xb   :  { %5004 = vmatpush3.bf16.msra.mxu1 %v5017_v5  ;;  %4256 = vmatpush3.bf16.msra.mxu0 %v5017_v5  ;;  %v5048_v28 = vld [vmem:[%s6974_s0 + $0x3ec] ss:$100 sps:$4 sm:$0xff]   ;;  %v5052_v36 = vld [vmem:[%s6973_s1 + $0xe0] sm:$0xff]   ;;  %v5058_v43 = vld [vmem:[%s6973_s1 + $0xd8] sm:$0xff]  }
   0xc   :  { %4997 = vmatprep.subr.bf16.mxu1 %v5018_v6  ;;  %4257 = vmatprep.subr.bf16.mxu0 %v5018_v6  ;;  %v5041_v29 = vld [vmem:[%s6973_s1 + $0x130] sm:$0xff]   ;;  %v5045_v31 = vld [vmem:[%s6974_s0 + $0xc8] ss:$100 sps:$4 sm:$0xff]   ;;  %v5054_v37 = vld [vmem:[%s6973_s1 + $0x160] sm:$0xff]  }
   0xd   :  { %v5047_v32 = vld [vmem:[%s6973_s1 + $0x168] sm:$0xff]   ;;  %v5053_v38 = vld [vmem:[%s6973_s1 + $0xa0] sm:$0xff]   ;;  %v171_v40 = vld [vmem:[%s6974_s0 + $0x4b0] sm:$0xff] }
   0xe   :  { %v5046_v33 = vld [vmem:[%s6973_s1 + $0xa8] sm:$0xff]   ;;  %v5055_v41 = vld [vmem:[%s6973_s1 + $0x120] sm:$0xff]   ;;  %v3998_v42 = vcombine.high %v171_v40, %v171_v40  ;;  %v5059_v44 = vld [vmem:[%s6974_s0 + $0x190] ss:$100 sps:$4 sm:$0xff]   ;;  %v3997_v48 = vcombine.low %v171_v40, %v171_v40 }
   0xf   :  { %5005 = vmatpush3.bf16.msra.mxu1 %v5019_v7  ;;  %4258 = vmatpush3.bf16.msra.mxu0 %v5019_v7  ;;  %v5051_v34 = vld [vmem:[%s6974_s0 + $0x3e8] ss:$100 sps:$4 sm:$0xff]   ;;  %v5061_v45 = vld [vmem:[%s6973_s1 + $0x158] sm:$0xff]   ;;  %v5065_v49 = vld [vmem:[%s6973_s1 + $0xd0] sm:$0xff]  }
  0x10   :  { %4998 = vmatprep.subr.bf16.mxu1 %v5020_v8  ;;  %4259 = vmatprep.subr.bf16.mxu0 %v5020_v8  ;;  %v5050_v35 = vld [vmem:[%s6973_s1 + $0x128] sm:$0xff]   ;;  %v5060_v46 = vld [vmem:[%s6973_s1 + $0x98] sm:$0xff]   ;;  %v5067_v50 = vld [vmem:[%s6973_s1 + $0x150] sm:$0xff]  }
  0x11   :  { %v5063_v47 = vld [vmem:[%s6973_s1 + $0x118] sm:$0xff]   ;;  %v5066_v51 = vld [vmem:[%s6973_s1 + $0x90] sm:$0xff]   ;;  %v5071_v54 = vld [vmem:[%s6973_s1 + $0xc8] sm:$0xff]  }
  0x12   :  { %v5069_v52 = vld [vmem:[%s6974_s0 + $0x25c] ss:$100 sps:$4 sm:$0xff]   ;;  %v5068_v53 = vld [vmem:[%s6973_s1 + $0x110] sm:$0xff]   ;;  %v5074_v56 = vld [vmem:[%s6973_s1 + $0x148] sm:$0xff]  }
  0x13   :  { %5006 = vmatpush3.bf16.msra.mxu1 %v5021_v9  ;;  %4260 = vmatpush3.bf16.msra.mxu0 %v5021_v9  ;;  %v5072_v55 = vld [vmem:[%s6974_s0 + $0x258] ss:$100 sps:$4 sm:$0xff]   ;;  %v5073_v57 = vld [vmem:[%s6973_s1 + $0x88] sm:$0xff]   ;;  %v5076_v59 = vld [vmem:[%s6973_s1 + $0xc0] sm:$0xff]  }
  0x14   :  { %4999 = vmatprep.subr.bf16.mxu1 %v5022_v10  ;;  %4261 = vmatprep.subr.bf16.mxu0 %v5022_v10  ;;  %v5075_v58 = vld [vmem:[%s6973_s1 + $0x108] sm:$0xff]   ;;  %v5078_v60 = vld [vmem:[%s6973_s1 + $0x140] sm:$0xff]   ;;  %v5085_v63 = vld [vmem:[%s6974_s0 + $0x14] ss:$100 sps:$4 sm:$0xff]  }
  0x15   :  { %v5082_v61 = vld [vmem:[%s6974_s0 + $0xc] ss:$100 sps:$4 sm:$0xff]   ;;  %v5077_v62 = vld [vmem:[%s6973_s1 + $0x80] sm:$0xff]   ;;  %v5086_v3 = vld [vmem:[%s6973_s1 + $0x1f8] sm:$0xff]  }
  0x16   :  { %v5079_v0 = vld [vmem:[%s6973_s1 + $0x100] sm:$0xff]   ;;  %v5080_v1 = vld [vmem:[%s6974_s0 + $0x8] ss:$100 sps:$4 sm:$0xff]   ;;  %v5083_v2 = vld [vmem:[%s6974_s0 + $0x10] ss:$100 sps:$4 sm:$0xff]  }
  0x17   :  { %5007 = vmatpush3.bf16.msra.mxu1 %v5023_v13  ;;  %4262 = vmatpush3.bf16.msra.mxu0 %v5023_v13  ;;  %v5087_v4 = vld [vmem:[%s6973_s1 + $0x1b8] sm:$0xff]   ;;  %v5091_v7 = vld [vmem:[%s6973_s1 + $0x1f0] sm:$0xff]  }
  0x18   :  { %5000 = vmatprep.subr.bf16.mxu1 %v5024_v14  ;;  %4263 = vmatprep.subr.bf16.mxu0 %v5024_v14  ;;  %v5088_v5 = vld [vmem:[%s6973_s1 + $0x278] sm:$0xff]   ;;  %v5096_v10 = vld [vmem:[%s6973_s1 + $0x1b0] sm:$0xff]   ;;  %v5099_v14 = vld [vmem:[%s6973_s1 + $0x1e8] sm:$0xff]  }
  0x19   :  { %v5089_v6 = vld [vmem:[%s6974_s0 + $0xd4] ss:$100 sps:$4 sm:$0xff]   ;;  %v5094_v9 = vld [vmem:[%s6974_s0 + $0xdc] ss:$100 sps:$4 sm:$0xff]  }
  0x1a   :  { %v5092_v8 = vld [vmem:[%s6973_s1 + $0x238] sm:$0xff]   ;;  %v5093_v11 = vld [vmem:[%s6974_s0 + $0xd0] ss:$100 sps:$4 sm:$0xff]  }
  0x1b   :  { %5008 = vmatpush3.bf16.msra.mxu1 %v5025_v15  ;;  %4264 = vmatpush3.bf16.msra.mxu0 %v5025_v15  ;;  %v5097_v12 = vld [vmem:[%s6974_s0 + $0xd8] ss:$100 sps:$4 sm:$0xff]   ;;  %v5098_v13 = vld [vmem:[%s6973_s1 + $0x270] sm:$0xff]  }
  0x1c   :  { %5001 = vmatprep.subr.bf16.mxu1 %v5026_v16  ;;  %4265 = vmatprep.subr.bf16.mxu0 %v5026_v16  ;;  %v5100_v15 = vld [vmem:[%s6973_s1 + $0x230] sm:$0xff]   ;;  %v5101_v16 = vld [vmem:[%s6974_s0 + $0x19c] ss:$100 sps:$4 sm:$0xff]  }
  0x1d   :  { %v5127_v40 = vld [vmem:[%s6974_s0 + $0x330] ss:$100 sps:$4 sm:$0xff]  }
  0x1f   :  { %5009 = vmatpush3.bf16.msra.mxu1 %v5027_v17  ;;  %4266 = vmatpush3.bf16.msra.mxu0 %v5027_v17  ;;  %v5103_v17 = vld [vmem:[%s6973_s1 + $0x1a8] sm:$0xff]  }
  0x20   :  { %4309 = vmatprep.subr.bf16.mxu1 %v5034_v20  ;;  %4367 = vmatprep.subr.bf16.mxu0 %v5036_v21  ;;  %v5104_v20 = vld [vmem:[%s6974_s0 + $0x198] ss:$100 sps:$4 sm:$0xff]   ;;  %v5107_v21 = vld [vmem:[%s6974_s0 + $0x1a0] ss:$100 sps:$4 sm:$0xff]  }
  0x22   :  { %2683 = vmatmul.mubr.bf16.vlgmr.msra.gmra.mxu1 %v5028_v18  ;;  %2651 = vmatmul.mubr.bf16.vlgmr.msra.gmra.mxu0 %v5031_v19  ;;  %v5105_v18 = vld [vmem:[%s6974_s0 + $0x1a4] ss:$100 sps:$4 sm:$0xff]  }
  0x23   :  { %4310 = vmatpush3.bf16.msra.mxu1 %v5035_v22  ;;  %4368 = vmatpush3.bf16.msra.mxu0 %v5037_v23  ;;  %v5108_v19 = vld [vmem:[%s6973_s1 + $0x268] sm:$0xff]   ;;  %v5109_v22 = vld [vmem:[%s6973_s1 + $0x1e0] sm:$0xff]  }
  0x24   :  { %4311 = vmatprep.subr.bf16.mxu1 %v5038_v24  ;;  %4369 = vmatprep.subr.bf16.mxu0 %v5040_v25  ;;  %v5110_v23 = vld [vmem:[%s6973_s1 + $0x228] sm:$0xff]   ;;  %v5111_v24 = vld [vmem:[%s6973_s1 + $0x1a0] sm:$0xff]  }
  0x25   :  { %2658 = vmatprep.mubr.bf16.mxu0 %v5042_v26  ;;  %2690 = vmatprep.mubr.bf16.mxu1 %v5048_v28  ;;  %v5112_v25 = vld [vmem:[%s6974_s0 + $0x264] ss:$100 sps:$4 sm:$0xff]   ;;  %v5115_v26 = vld [vmem:[%s6974_s0 + $0x26c] ss:$100 sps:$4 sm:$0xff]   ;;  %v5119_v28 = vld [vmem:[%s6973_s1 + $0x1d8] sm:$0xff]  }
  0x27   :  { %4312 = vmatpush3.bf16.msra.mxu1 %v5039_v27  ;;  %4370 = vmatpush3.bf16.msra.mxu0 %v5041_v29  ;;  %v5118_v27 = vld [vmem:[%s6973_s1 + $0x260] sm:$0xff]  }
  0x28   :  { %4313 = vmatprep.subr.bf16.mxu1 %v5044_v30  ;;  %4371 = vmatprep.subr.bf16.mxu0 %v5047_v32  ;;  %v5120_v29 = vld [vmem:[%s6973_s1 + $0x220] sm:$0xff]   ;;  %v5121_v30 = vld [vmem:[%s6973_s1 + $0x198] sm:$0xff]   ;;  %v5117_v32 = vld [vmem:[%s6974_s0 + $0x268] ss:$100 sps:$4 sm:$0xff]  }
  0x2a   :  { %2659 = vmatmul.mubr.bf16.gmra.mxu0 %v5045_v31  ;;  %2691 = vmatmul.mubr.bf16.gmra.mxu1 %v5051_v34  ;;  %v5114_v31 = vld [vmem:[%s6974_s0 + $0x260] ss:$100 sps:$4 sm:$0xff]   ;;  %v5125_v34 = vld [vmem:[%s6974_s0 + $0x334] ss:$100 sps:$4 sm:$0xff]  }
  0x2b   :  { %4314 = vmatpush3.bf16.msra.mxu1 %v5046_v33  ;;  %4372 = vmatpush3.bf16.msra.mxu0 %v5050_v35  ;;  %v5122_v33 = vld [vmem:[%s6974_s0 + $0x32c] ss:$100 sps:$4 sm:$0xff]   ;;  %v5128_v35 = vld [vmem:[%s6973_s1 + $0x258] sm:$0xff]  }
  0x2c   :  { %4315 = vmatprep.subr.bf16.mxu1 %v5052_v36  ;;  %4373 = vmatprep.subr.bf16.mxu0 %v5054_v37  ;;  %v5129_v36 = vld [vmem:[%s6973_s1 + $0x1d0] sm:$0xff]   ;;  %v5130_v37 = vld [vmem:[%s6973_s1 + $0x218] sm:$0xff]  }
  0x2d   :  { %2666 = vmatprep.mubr.bf16.mxu0 %v5056_v39  ;;  %2698 = vmatprep.mubr.bf16.mxu1 %v3998_v42  ;;  %v5124_v39 = vld [vmem:[%s6974_s0 + $0x328] ss:$100 sps:$4 sm:$0xff]   ;;  %v5135_v42 = vld [vmem:[%s6974_s0 + $0x3fc] ss:$100 sps:$4 sm:$0xff]  }
  0x2f   :  { %4316 = vmatpush3.bf16.msra.mxu1 %v5053_v38  ;;  %4374 = vmatpush3.bf16.msra.mxu0 %v5055_v41  ;;  %v5131_v38 = vld [vmem:[%s6973_s1 + $0x190] sm:$0xff]  }
  0x30   :  { %4317 = vmatprep.subr.bf16.mxu1 %v5058_v43  ;;  %4375 = vmatprep.subr.bf16.mxu0 %v5061_v45  ;;  %v5132_v41 = vld [vmem:[%s6974_s0 + $0x3f4] ss:$100 sps:$4 sm:$0xff]  }
  0x31   :  { %v5138_v43 = vld [vmem:[%s6973_s1 + $0x250] sm:$0xff]  }
  0x32   :  { %2667 = vmatmul.mubr.bf16.gmra.mxu0 %v5059_v44  ;;  %2699 = vmatmul.mubr.bf16.gmra.mxu1 %v3997_v48  ;;  %v5139_v44 = vld [vmem:[%s6973_s1 + $0x1c8] sm:$0xff]   ;;  %v5140_v45 = vld [vmem:[%s6973_s1 + $0x210] sm:$0xff]   ;;  %v173_v48 = vld [vmem:[%s6974_s0 + $0x4c0] sm:$0xff] }
  0x33   :  { %4318 = vmatpush3.bf16.msra.mxu1 %v5060_v46  ;;  %4376 = vmatpush3.bf16.msra.mxu0 %v5063_v47  ;;  %v5141_v46 = vld [vmem:[%s6973_s1 + $0x188] sm:$0xff]   ;;  %v172_v47 = vld [vmem:[%s6974_s0 + $0x4b8] sm:$0xff] }
  0x34   :  { %4319 = vmatprep.subr.bf16.mxu1 %v5065_v49  ;;  %4377 = vmatprep.subr.bf16.mxu0 %v5067_v50  ;;  %v5145_v49 = vld [vmem:[%s6973_s1 + $0x248] sm:$0xff]   ;;  %v5134_v50 = vld [vmem:[%s6974_s0 + $0x3f0] ss:$100 sps:$4 sm:$0xff]  }
  0x35   :  { %2674 = vmatprep.mubr.bf16.mxu0 %v5069_v52  ;;  %2738 = vmatprep.mubr.bf16.mxu1 %v5082_v61  ;;  %v5147_v52 = vld [vmem:[%s6973_s1 + $0x1c0] sm:$0xff]   ;;  %v3999_v61 = vcombine.low %v172_v47, %v172_v47 }
  0x37   :  { %4320 = vmatpush3.bf16.msra.mxu1 %v5066_v51  ;;  %4378 = vmatpush3.bf16.msra.mxu0 %v5068_v53  ;;  %v5137_v51 = vld [vmem:[%s6974_s0 + $0x3f8] ss:$100 sps:$4 sm:$0xff]   ;;  %v5148_v53 = vld [vmem:[%s6973_s1 + $0x208] sm:$0xff]  }
  0x38   :  { %4321 = vmatprep.subr.bf16.mxu1 %v5071_v54  ;;  %4379 = vmatprep.subr.bf16.mxu0 %v5074_v56  ;;  %v5149_v54 = vld [vmem:[%s6973_s1 + $0x180] sm:$0xff]   ;;  %v4002_v56 = vcombine.high %v173_v48, %v173_v48 }
  0x3a   :  { %2675 = vmatmul.mubr.bf16.gmra.mxu0 %v5072_v55  ;;  %v4000_v55 = vcombine.high %v172_v47, %v172_v47  ;;  %v5220_v47 = vld [vmem:[%s6973_s1 + $0x308] sm:$0xff]  }
  0x3b   :  { %4322 = vmatpush3.bf16.msra.mxu1 %v5073_v57  ;;  %4380 = vmatpush3.bf16.msra.mxu0 %v5075_v58  ;;  %v5150_v57 = vld [vmem:[%s6973_s1 + $0x240] sm:$0xff]  }
  0x3c   :  { %4323 = vmatprep.subr.bf16.mxu1 %v5076_v59  ;;  %4381 = vmatprep.subr.bf16.mxu0 %v5078_v60  ;;  %v5151_v58 = vld [vmem:[%s6973_s1 + $0x200] sm:$0xff]   ;;  %v5158_v59 = vld [vmem:[%s6973_s1 + $0x2f8] sm:$0xff]  }
  0x3d   :  { %2826 = vmatprep.mubr.bf16.mxu0 %v5085_v63  ;;  %v5154_v60 = vld [vmem:[%s6974_s0 + $0x1c] ss:$100 sps:$4 sm:$0xff]  }
  0x3e   :  { %v5160_v63 = vld [vmem:[%s6973_s1 + $0x378] sm:$0xff]  }
  0x3f   :  { %4324 = vmatpush3.bf16.msra.mxu1 %v5077_v62  ;;  %4382 = vmatpush3.bf16.msra.mxu0 %v5079_v0  ;;  %v4001_v62 = vcombine.low %v173_v48, %v173_v48  ;;  %v5157_v0 = vld [vmem:[%s6974_s0 + $0x24] ss:$100 sps:$4 sm:$0xff]  }
  0x40   :  { %4425 = vmatprep.subr.bf16.mxu1 %v5086_v3  ;;  %4483 = vmatprep.subr.bf16.mxu0 %v5088_v5  ;;  %v5159_v3 = vld [vmem:[%s6973_s1 + $0x2b8] sm:$0xff]   ;;  %v5163_v5 = vld [vmem:[%s6973_s1 + $0x2f0] sm:$0xff]   ;;  %v5221_v48 = vld [vmem:[%s6973_s1 + $0x280] sm:$0xff]  }
  0x42   :  { %2739 = vmatmul.mubr.bf16.vlgmr.msra.gmra.mxu1 %v5080_v1  ;;  %2827 = vmatmul.mubr.bf16.vlgmr.msra.gmra.mxu0 %v5083_v2  ;;  %v5152_v1 = vld [vmem:[%s6974_s0 + $0x18] ss:$100 sps:$4 sm:$0xff]   ;;  %v5155_v2 = vld [vmem:[%s6974_s0 + $0x20] ss:$100 sps:$4 sm:$0xff]  }
  0x43   :  { %4426 = vmatpush3.bf16.msra.mxu1 %v5087_v4  ;;  %2746 = vmatprep.mubr.bf16.mxu1 %v5089_v6  ;;  %v5161_v4 = vld [vmem:[%s6974_s0 + $0xe4] ss:$100 sps:$4 sm:$0xff]   ;;  %v5164_v6 = vld [vmem:[%s6973_s1 + $0x338] sm:$0xff]  }
  0x44   :  { %4427 = vmatprep.subr.bf16.mxu1 %v5091_v7  ;;  %4484 = vmatpush3.bf16.msra.mxu0 %v5092_v8  ;;  %v5166_v7 = vld [vmem:[%s6974_s0 + $0xec] ss:$100 sps:$4 sm:$0xff]  }
  0x45   :  { %2834 = vmatprep.mubr.bf16.mxu0 %v5094_v9  ;;  %4485 = vmatprep.subr.bf16.mxu0 %v5098_v13  ;;  %v5170_v8 = vld [vmem:[%s6973_s1 + $0x370] sm:$0xff]  }
  0x46   :  { %v5168_v9 = vld [vmem:[%s6973_s1 + $0x2b0] sm:$0xff]  }
  0x47   :  { %4428 = vmatpush3.bf16.msra.mxu1 %v5096_v10  ;;  %v5171_v10 = vld [vmem:[%s6973_s1 + $0x2e8] sm:$0xff]   ;;  %v5172_v13 = vld [vmem:[%s6973_s1 + $0x330] sm:$0xff]  }
  0x48   :  { %4429 = vmatprep.subr.bf16.mxu1 %v5099_v14  ;;  %4486 = vmatpush3.bf16.msra.mxu0 %v5100_v15  ;;  %v5173_v14 = vld [vmem:[%s6974_s0 + $0x1ac] ss:$100 sps:$4 sm:$0xff]  }
  0x49   :  { %4487 = vmatprep.subr.bf16.mxu0 %v5108_v19  ;;  %v5180_v15 = vld [vmem:[%s6973_s1 + $0x368] sm:$0xff]  }
  0x4a   :  { %2747 = vmatmul.mubr.bf16.gmra.mxu1 %v5093_v11  ;;  %2835 = vmatmul.mubr.bf16.gmra.mxu0 %v5097_v12  ;;  %v5165_v11 = vld [vmem:[%s6974_s0 + $0xe0] ss:$100 sps:$4 sm:$0xff]   ;;  %v5169_v12 = vld [vmem:[%s6974_s0 + $0xe8] ss:$100 sps:$4 sm:$0xff]  }
  0x4b   :  { %2754 = vmatprep.mubr.bf16.mxu1 %v5101_v16  ;;  %4430 = vmatpush3.bf16.msra.mxu1 %v5103_v17  ;;  %v5175_v16 = vld [vmem:[%s6973_s1 + $0x2a8] sm:$0xff]   ;;  %v5177_v17 = vld [vmem:[%s6974_s0 + $0x1b4] ss:$100 sps:$4 sm:$0xff]  }
  0x4c   :  { %2842 = vmatprep.mubr.bf16.mxu0 %v5105_v18  ;;  %4431 = vmatprep.subr.bf16.mxu1 %v5109_v22  ;;  %v5181_v18 = vld [vmem:[%s6973_s1 + $0x2e0] sm:$0xff]   ;;  %v5182_v19 = vld [vmem:[%s6973_s1 + $0x328] sm:$0xff]  }
  0x4d   :  { %4488 = vmatpush3.bf16.msra.mxu0 %v5110_v23  ;;  %v5176_v22 = vld [vmem:[%s6974_s0 + $0x1a8] ss:$100 sps:$4 sm:$0xff]   ;;  %v5191_v23 = vld [vmem:[%s6973_s1 + $0x2d8] sm:$0xff]  }
  0x4e   :  { %4489 = vmatprep.subr.bf16.mxu0 %v5118_v27  ;;  %v5187_v27 = vld [vmem:[%s6974_s0 + $0x27c] ss:$100 sps:$4 sm:$0xff]  }
  0x4f   :  { %4432 = vmatpush3.bf16.msra.mxu1 %v5111_v24  ;;  %v5192_v24 = vld [vmem:[%s6973_s1 + $0x320] sm:$0xff]  }
  0x50   :  { %4433 = vmatprep.subr.bf16.mxu1 %v5119_v28  ;;  %v5193_v28 = vld [vmem:[%s6973_s1 + $0x298] sm:$0xff]  }
  0x51   :  { %4490 = vmatpush3.bf16.msra.mxu0 %v5120_v29  ;;  %v5200_v29 = vld [vmem:[%s6973_s1 + $0x358] sm:$0xff]  }
  0x52   :  { %2755 = vmatmul.mubr.bf16.gmra.mxu1 %v5104_v20  ;;  %2843 = vmatmul.mubr.bf16.gmra.mxu0 %v5107_v21  ;;  %v5190_v20 = vld [vmem:[%s6973_s1 + $0x360] sm:$0xff]  }
  0x53   :  { %2762 = vmatprep.mubr.bf16.mxu1 %v5112_v25  ;;  %2850 = vmatprep.mubr.bf16.mxu0 %v5115_v26  ;;  %v5183_v21 = vld [vmem:[%s6973_s1 + $0x2a0] sm:$0xff]   ;;  %v5179_v25 = vld [vmem:[%s6974_s0 + $0x1b0] ss:$100 sps:$4 sm:$0xff]  }
  0x54   :  { %4434 = vmatpush3.bf16.msra.mxu1 %v5121_v30  ;;  %4491 = vmatprep.subr.bf16.mxu0 %v5128_v35  ;;  %v5184_v26 = vld [vmem:[%s6974_s0 + $0x274] ss:$100 sps:$4 sm:$0xff]   ;;  %v5194_v35 = vld [vmem:[%s6974_s0 + $0x33c] ss:$100 sps:$4 sm:$0xff]  }
  0x55   :  { %4435 = vmatprep.subr.bf16.mxu1 %v5129_v36  ;;  %4492 = vmatpush3.bf16.msra.mxu0 %v5130_v37  ;;  %v5201_v30 = vld [vmem:[%s6973_s1 + $0x2d0] sm:$0xff]   ;;  %v5197_v36 = vld [vmem:[%s6974_s0 + $0x344] ss:$100 sps:$4 sm:$0xff]  }
  0x56   :  { %4493 = vmatprep.subr.bf16.mxu0 %v5138_v43  ;;  %v5210_v37 = vld [vmem:[%s6973_s1 + $0x350] sm:$0xff]   ;;  %v5217_v43 = vld [vmem:[%s6973_s1 + $0x348] sm:$0xff]  }
  0x58   :  { %4436 = vmatpush3.bf16.msra.mxu1 %v5131_v38  ;;  %v5211_v38 = vld [vmem:[%s6973_s1 + $0x2c8] sm:$0xff]  }
  0x59   :  { %4437 = vmatprep.subr.bf16.mxu1 %v5139_v44  ;;  %4494 = vmatpush3.bf16.msra.mxu0 %v5140_v45  ;;  %v5204_v44 = vld [vmem:[%s6974_s0 + $0x404] ss:$100 sps:$4 sm:$0xff]   ;;  %v5207_v45 = vld [vmem:[%s6974_s0 + $0x40c] ss:$100 sps:$4 sm:$0xff]  }
  0x5a   :  { %2763 = vmatmul.mubr.bf16.gmra.mxu1 %v5114_v31  ;;  %2851 = vmatmul.mubr.bf16.gmra.mxu0 %v5117_v32  ;;  %v5202_v31 = vld [vmem:[%s6973_s1 + $0x318] sm:$0xff]   ;;  %v5203_v32 = vld [vmem:[%s6973_s1 + $0x290] sm:$0xff]  }
  0x5b   :  { %2770 = vmatprep.mubr.bf16.mxu1 %v5122_v33  ;;  %2858 = vmatprep.mubr.bf16.mxu0 %v5125_v34  ;;  %v5186_v33 = vld [vmem:[%s6974_s0 + $0x270] ss:$100 sps:$4 sm:$0xff]   ;;  %v5189_v34 = vld [vmem:[%s6974_s0 + $0x278] ss:$100 sps:$4 sm:$0xff]  }
  0x5c   :  { %4438 = vmatpush3.bf16.msra.mxu1 %v5141_v46  ;;  %4495 = vmatprep.subr.bf16.mxu0 %v5145_v49  ;;  %v5219_v46 = vld [vmem:[%s6973_s1 + $0x2c0] sm:$0xff]  }
  0x5d   :  { %4439 = vmatprep.subr.bf16.mxu1 %v5147_v52  ;;  %4496 = vmatpush3.bf16.msra.mxu0 %v5148_v53  ;;  %v5222_v49 = vld [vmem:[%s6973_s1 + $0x340] sm:$0xff]   ;;  %v175_v53 = vld [vmem:[%s6974_s0 + $0x4d0] sm:$0xff] }
  0x5e   :  { %4497 = vmatprep.subr.bf16.mxu0 %v5150_v57  ;;  %v5206_v52 = vld [vmem:[%s6974_s0 + $0x400] ss:$100 sps:$4 sm:$0xff]   ;;  %v4006_v57 = vcombine.high %v175_v53, %v175_v53 }
  0x60   :  { %4440 = vmatpush3.bf16.msra.mxu1 %v5149_v54  ;;  %v5230_v54 = vld [vmem:[%s6973_s1 + $0x3f8] sm:$0xff]  }
  0x61   :  { %4498 = vmatpush3.bf16.msra.mxu0 %v5151_v58  ;;  %4541 = vmatprep.subr.bf16.mxu1 %v5158_v59  ;;  %v5232_v58 = vld [vmem:[%s6973_s1 + $0x478] sm:$0xff]  }
  0x62   :  { %2771 = vmatmul.mubr.bf16.gmra.mxu1 %v5124_v39  ;;  %2859 = vmatmul.mubr.bf16.gmra.mxu0 %v5127_v40  ;;  %v5212_v39 = vld [vmem:[%s6973_s1 + $0x310] sm:$0xff]   ;;  %v5213_v40 = vld [vmem:[%s6973_s1 + $0x288] sm:$0xff]  }
  0x63   :  { %2778 = vmatprep.mubr.bf16.mxu1 %v5132_v41  ;;  %2866 = vmatprep.mubr.bf16.mxu0 %v5135_v42  ;;  %v5196_v41 = vld [vmem:[%s6974_s0 + $0x338] ss:$100 sps:$4 sm:$0xff]   ;;  %v5199_v42 = vld [vmem:[%s6974_s0 + $0x340] ss:$100 sps:$4 sm:$0xff]  }
  0x64   :  { %4599 = vmatprep.subr.bf16.mxu0 %v5160_v63  ;;  %v5224_v63 = vld [vmem:[%s6974_s0 + $0x28] ss:$100 sps:$4 sm:$0xff]  }
  0x6a   :  { %2779 = vmatmul.mubr.bf16.gmra.mxu1 %v5134_v50  ;;  %2867 = vmatmul.mubr.bf16.gmra.mxu0 %v5137_v51  ;;  %v5223_v50 = vld [vmem:[%s6973_s1 + $0x300] sm:$0xff]   ;;  %v174_v51 = vld [vmem:[%s6974_s0 + $0x4c8] sm:$0xff] }
  0x6b   :  { %2786 = vmatprep.mubr.bf16.mxu1 %v4000_v55  ;;  %2874 = vmatprep.mubr.bf16.mxu0 %v4002_v56  ;;  %v5209_v55 = vld [vmem:[%s6974_s0 + $0x408] ss:$100 sps:$4 sm:$0xff]   ;;  %v4004_v56 = vcombine.high %v174_v51, %v174_v51  ;;  %v4003_v59 = vcombine.low %v174_v51, %v174_v51  ;;  %v176_v51 = vld [vmem:[%s6974_s0 + $0x4d8] sm:$0xff] }
  0x72   :  { %2787 = vmatmul.mubr.bf16.gmra.mxu1 %v3999_v61  ;;  %2875 = vmatmul.mubr.bf16.gmra.mxu0 %v4001_v62  ;;  %v5226_v61 = vld [vmem:[%s6974_s0 + $0x2c] ss:$100 sps:$4 sm:$0xff]   ;;  %v5229_v62 = vld [vmem:[%s6974_s0 + $0x34] ss:$100 sps:$4 sm:$0xff]  }
  0x73   :  { %2914 = vmatprep.mubr.bf16.mxu1 %v5154_v60  ;;  %3002 = vmatprep.mubr.bf16.mxu0 %v5157_v0  ;;  %v4005_v60 = vcombine.low %v175_v53, %v175_v53  ;;  %v5227_v0 = vld [vmem:[%s6974_s0 + $0x30] ss:$100 sps:$4 sm:$0xff]  }
  0x74   :  { %v5278_v53 = vld [vmem:[%s6974_s0 + $0x410] ss:$100 sps:$4 sm:$0xff]  }
  0x7a   :  { %2915 = vmatmul.mubr.bf16.vlgmr.msra.gmra.mxu1 %v5152_v1  ;;  %3003 = vmatmul.mubr.bf16.vlgmr.msra.gmra.mxu0 %v5155_v2  ;;  %v5231_v1 = vld [vmem:[%s6973_s1 + $0x3b8] sm:$0xff]  }
  0x7b   :  { %4542 = vmatpush3.bf16.msra.mxu1 %v5159_v3  ;;  %2922 = vmatprep.mubr.bf16.mxu1 %v5161_v4  ;;  %v5233_v2 = vld [vmem:[%s6974_s0 + $0xf4] ss:$100 sps:$4 sm:$0xff]  }
  0x7c   :  { %4543 = vmatprep.subr.bf16.mxu1 %v5163_v5  ;;  %4600 = vmatpush3.bf16.msra.mxu0 %v5164_v6  ;;  %v5235_v3 = vld [vmem:[%s6973_s1 + $0x3f0] sm:$0xff]   ;;  %v5236_v4 = vld [vmem:[%s6973_s1 + $0x438] sm:$0xff]  }
  0x7d   :  { %3010 = vmatprep.mubr.bf16.mxu0 %v5166_v7  ;;  %4601 = vmatprep.subr.bf16.mxu0 %v5170_v8  ;;  %v5238_v5 = vld [vmem:[%s6974_s0 + $0xfc] ss:$100 sps:$4 sm:$0xff]   ;;  %v5242_v6 = vld [vmem:[%s6973_s1 + $0x470] sm:$0xff]   ;;  %v5243_v8 = vld [vmem:[%s6973_s1 + $0x3e8] sm:$0xff]  }
  0x7e   :  { %v5240_v7 = vld [vmem:[%s6973_s1 + $0x3b0] sm:$0xff]  }
  0x7f   :  { %4544 = vmatpush3.bf16.msra.mxu1 %v5168_v9  ;;  %v5237_v9 = vld [vmem:[%s6974_s0 + $0xf0] ss:$100 sps:$4 sm:$0xff]  }
  0x80   :  { %4545 = vmatprep.subr.bf16.mxu1 %v5171_v10  ;;  %4602 = vmatpush3.bf16.msra.mxu0 %v5172_v13  ;;  %v5244_v10 = vld [vmem:[%s6973_s1 + $0x430] sm:$0xff]   ;;  %v5245_v13 = vld [vmem:[%s6974_s0 + $0x1bc] ss:$100 sps:$4 sm:$0xff]  }
  0x81   :  { %4603 = vmatprep.subr.bf16.mxu0 %v5180_v15  ;;  %v5249_v15 = vld [vmem:[%s6974_s0 + $0x1c4] ss:$100 sps:$4 sm:$0xff]  }
  0x82   :  { %2923 = vmatmul.mubr.bf16.gmra.mxu1 %v5165_v11  ;;  %3011 = vmatmul.mubr.bf16.gmra.mxu0 %v5169_v12  ;;  %v5252_v11 = vld [vmem:[%s6973_s1 + $0x468] sm:$0xff]   ;;  %v5241_v12 = vld [vmem:[%s6974_s0 + $0xf8] ss:$100 sps:$4 sm:$0xff]  }
  0x83   :  { %2930 = vmatprep.mubr.bf16.mxu1 %v5173_v14  ;;  %4546 = vmatpush3.bf16.msra.mxu1 %v5175_v16  ;;  %v5247_v14 = vld [vmem:[%s6973_s1 + $0x3a8] sm:$0xff]   ;;  %v5253_v16 = vld [vmem:[%s6973_s1 + $0x3e0] sm:$0xff]  }
  0x84   :  { %3018 = vmatprep.mubr.bf16.mxu0 %v5177_v17  ;;  %4547 = vmatprep.subr.bf16.mxu1 %v5181_v18  ;;  %v5254_v17 = vld [vmem:[%s6973_s1 + $0x428] sm:$0xff]   ;;  %v5262_v18 = vld [vmem:[%s6973_s1 + $0x460] sm:$0xff]  }
  0x85   :  { %4604 = vmatpush3.bf16.msra.mxu0 %v5182_v19  ;;  %v5255_v19 = vld [vmem:[%s6973_s1 + $0x3a0] sm:$0xff]  }
  0x86   :  { %4605 = vmatprep.subr.bf16.mxu0 %v5190_v20  ;;  %v5248_v20 = vld [vmem:[%s6974_s0 + $0x1b8] ss:$100 sps:$4 sm:$0xff]  }
  0x87   :  { %4548 = vmatpush3.bf16.msra.mxu1 %v5183_v21  ;;  %v5251_v21 = vld [vmem:[%s6974_s0 + $0x1c0] ss:$100 sps:$4 sm:$0xff]  }
  0x88   :  { %4549 = vmatprep.subr.bf16.mxu1 %v5191_v23  ;;  %v5256_v23 = vld [vmem:[%s6974_s0 + $0x284] ss:$100 sps:$4 sm:$0xff]  }
  0x89   :  { %4606 = vmatpush3.bf16.msra.mxu0 %v5192_v24  ;;  %v5264_v24 = vld [vmem:[%s6973_s1 + $0x420] sm:$0xff]  }
  0x8a   :  { %2931 = vmatmul.mubr.bf16.gmra.mxu1 %v5176_v22  ;;  %3019 = vmatmul.mubr.bf16.gmra.mxu0 %v5179_v25  ;;  %v5263_v22 = vld [vmem:[%s6973_s1 + $0x3d8] sm:$0xff]   ;;  %v5259_v25 = vld [vmem:[%s6974_s0 + $0x28c] ss:$100 sps:$4 sm:$0xff]  }
  0x8b   :  { %2938 = vmatprep.mubr.bf16.mxu1 %v5184_v26  ;;  %3026 = vmatprep.mubr.bf16.mxu0 %v5187_v27  ;;  %v5265_v26 = vld [vmem:[%s6973_s1 + $0x398] sm:$0xff]  }
  0x8c   :  { %4550 = vmatpush3.bf16.msra.mxu1 %v5193_v28  ;;  %4607 = vmatprep.subr.bf16.mxu0 %v5200_v29  ;;  %v5272_v27 = vld [vmem:[%s6973_s1 + $0x458] sm:$0xff]   ;;  %v5273_v28 = vld [vmem:[%s6973_s1 + $0x3d0] sm:$0xff]  }
  0x8d   :  { %4551 = vmatprep.subr.bf16.mxu1 %v5201_v30  ;;  %4608 = vmatpush3.bf16.msra.mxu0 %v5202_v31  ;;  %v5274_v29 = vld [vmem:[%s6973_s1 + $0x418] sm:$0xff]   ;;  %v5282_v30 = vld [vmem:[%s6973_s1 + $0x450] sm:$0xff]  }
  0x8e   :  { %4609 = vmatprep.subr.bf16.mxu0 %v5210_v37  ;;  %v5275_v31 = vld [vmem:[%s6973_s1 + $0x390] sm:$0xff]  }
  0x8f   :  { %v5269_v37 = vld [vmem:[%s6974_s0 + $0x354] ss:$100 sps:$4 sm:$0xff]  }
  0x90   :  { %4552 = vmatpush3.bf16.msra.mxu1 %v5203_v32  ;;  %v5258_v32 = vld [vmem:[%s6974_s0 + $0x280] ss:$100 sps:$4 sm:$0xff]  }
  0x91   :  { %4553 = vmatprep.subr.bf16.mxu1 %v5211_v38  ;;  %4610 = vmatpush3.bf16.msra.mxu0 %v5212_v39  ;;  %v5285_v38 = vld [vmem:[%s6973_s1 + $0x388] sm:$0xff]  }
  0x92   :  { %2939 = vmatmul.mubr.bf16.gmra.mxu1 %v5186_v33  ;;  %3027 = vmatmul.mubr.bf16.gmra.mxu0 %v5189_v34  ;;  %v5261_v33 = vld [vmem:[%s6974_s0 + $0x288] ss:$100 sps:$4 sm:$0xff]  }
  0x93   :  { %2946 = vmatprep.mubr.bf16.mxu1 %v5194_v35  ;;  %3034 = vmatprep.mubr.bf16.mxu0 %v5197_v36  ;;  %v5283_v34 = vld [vmem:[%s6973_s1 + $0x3c8] sm:$0xff]   ;;  %v5284_v36 = vld [vmem:[%s6973_s1 + $0x410] sm:$0xff]  }
  0x94   :  { %4554 = vmatpush3.bf16.msra.mxu1 %v5213_v40  ;;  %4611 = vmatprep.subr.bf16.mxu0 %v5217_v43  ;;  %v5266_v35 = vld [vmem:[%s6974_s0 + $0x34c] ss:$100 sps:$4 sm:$0xff]   ;;  %v5291_v40 = vld [vmem:[%s6973_s1 + $0x3c0] sm:$0xff]  }
  0x95   :  { %4555 = vmatprep.subr.bf16.mxu1 %v5219_v46  ;;  %4612 = vmatpush3.bf16.msra.mxu0 %v5220_v47  ;;  %v5289_v39 = vld [vmem:[%s6973_s1 + $0x448] sm:$0xff]   ;;  %v5276_v46 = vld [vmem:[%s6974_s0 + $0x414] ss:$100 sps:$4 sm:$0xff]   ;;  %v5295_v47 = vld [vmem:[%s6973_s1 + $0x400] sm:$0xff]  }
  0x96   :  { %4613 = vmatprep.subr.bf16.mxu0 %v5222_v49  ;;  %v5268_v43 = vld [vmem:[%s6974_s0 + $0x348] ss:$100 sps:$4 sm:$0xff]   ;;  %v5279_v49 = vld [vmem:[%s6974_s0 + $0x41c] ss:$100 sps:$4 sm:$0xff]  }
  0x98   :  { %4556 = vmatpush3.bf16.msra.mxu1 %v5221_v48  ;;  %v5302_v48 = vld [vmem:[%s6973_s1 + $0x4f8] sm:$0xff]  }
  0x99   :  { %4614 = vmatpush3.bf16.msra.mxu0 %v5223_v50  ;;  %4657 = vmatprep.subr.bf16.mxu1 %v5230_v54  ;;  %v5304_v50 = vld [vmem:[%s6973_s1 + $0x578] sm:$0xff]  }
  0x9a   :  { %2947 = vmatmul.mubr.bf16.gmra.mxu1 %v5196_v41  ;;  %3035 = vmatmul.mubr.bf16.gmra.mxu0 %v5199_v42  ;;  %v5292_v41 = vld [vmem:[%s6973_s1 + $0x408] sm:$0xff]   ;;  %v5294_v42 = vld [vmem:[%s6973_s1 + $0x440] sm:$0xff]   ;;  %v5281_v54 = vld [vmem:[%s6974_s0 + $0x418] ss:$100 sps:$4 sm:$0xff]  }
  0x9b   :  { %2954 = vmatprep.mubr.bf16.mxu1 %v5204_v44  ;;  %3042 = vmatprep.mubr.bf16.mxu0 %v5207_v45  ;;  %v5271_v44 = vld [vmem:[%s6974_s0 + $0x350] ss:$100 sps:$4 sm:$0xff]   ;;  %v5293_v45 = vld [vmem:[%s6973_s1 + $0x380] sm:$0xff]  }
  0x9c   :  { %4715 = vmatprep.subr.bf16.mxu0 %v5232_v58 }
  0xa2   :  { %2955 = vmatmul.mubr.bf16.gmra.mxu1 %v5206_v52  ;;  %3043 = vmatmul.mubr.bf16.gmra.mxu0 %v5209_v55  ;;  %v177_v52 = vld [vmem:[%s6974_s0 + $0x4e0] sm:$0xff]  ;;  %v4008_v55 = vcombine.high %v176_v51, %v176_v51 }
  0xa3   :  { %2962 = vmatprep.mubr.bf16.mxu1 %v4004_v56  ;;  %3050 = vmatprep.mubr.bf16.mxu0 %v4006_v57  ;;  %v4010_v56 = vcombine.high %v177_v52, %v177_v52  ;;  %v4007_v57 = vcombine.low %v176_v51, %v176_v51  ;;  %v4009_v58 = vcombine.low %v177_v52, %v177_v52  ;;  %v5328_v51 = vld [vmem:[%s6974_s0 + $0x294] ss:$100 sps:$4 sm:$0xff]   ;;  %v5333_v52 = vld [vmem:[%s6974_s0 + $0x29c] ss:$100 sps:$4 sm:$0xff]  }
  0xaa   :  { %2963 = vmatmul.mubr.bf16.gmra.mxu1 %v4003_v59  ;;  %3051 = vmatmul.mubr.bf16.gmra.mxu0 %v4005_v60  ;;  %v5298_v59 = vld [vmem:[%s6974_s0 + $0x3c] ss:$100 sps:$4 sm:$0xff]   ;;  %v5301_v60 = vld [vmem:[%s6974_s0 + $0x44] ss:$100 sps:$4 sm:$0xff]  }
  0xab   :  { %3090 = vmatprep.mubr.bf16.mxu1 %v5226_v61  ;;  %3178 = vmatprep.mubr.bf16.mxu0 %v5229_v62 }
  0xb2   :  { %3091 = vmatmul.mubr.bf16.vlgmr.msra.gmra.mxu1 %v5224_v63  ;;  %3179 = vmatmul.mubr.bf16.vlgmr.msra.gmra.mxu0 %v5227_v0 }
  0xb3   :  { %4658 = vmatpush3.bf16.msra.mxu1 %v5231_v1  ;;  %3098 = vmatprep.mubr.bf16.mxu1 %v5233_v2  ;;  %v5296_v1 = vld [vmem:[%s6974_s0 + $0x38] ss:$100 sps:$4 sm:$0xff]  }
  0xb4   :  { %4659 = vmatprep.subr.bf16.mxu1 %v5235_v3  ;;  %4716 = vmatpush3.bf16.msra.mxu0 %v5236_v4  ;;  %v5299_v4 = vld [vmem:[%s6974_s0 + $0x40] ss:$100 sps:$4 sm:$0xff]  }
  0xb5   :  { %3186 = vmatprep.mubr.bf16.mxu0 %v5238_v5  ;;  %4717 = vmatprep.subr.bf16.mxu0 %v5242_v6 }
  0xb7   :  { %4660 = vmatpush3.bf16.msra.mxu1 %v5240_v7  ;;  %v5303_v7 = vld [vmem:[%s6973_s1 + $0x4b8] sm:$0xff]  }
  0xb8   :  { %4661 = vmatprep.subr.bf16.mxu1 %v5243_v8  ;;  %4718 = vmatpush3.bf16.msra.mxu0 %v5244_v10  ;;  %v5305_v8 = vld [vmem:[%s6974_s0 + $0x104] ss:$100 sps:$4 sm:$0xff]  }
  0xb9   :  { %4719 = vmatprep.subr.bf16.mxu0 %v5252_v11  ;;  %v5307_v11 = vld [vmem:[%s6973_s1 + $0x4f0] sm:$0xff]  }
  0xba   :  { %3099 = vmatmul.mubr.bf16.gmra.mxu1 %v5237_v9  ;;  %3187 = vmatmul.mubr.bf16.gmra.mxu0 %v5241_v12  ;;  %v5308_v12 = vld [vmem:[%s6973_s1 + $0x538] sm:$0xff]  }
  0xbb   :  { %3106 = vmatprep.mubr.bf16.mxu1 %v5245_v13  ;;  %4662 = vmatpush3.bf16.msra.mxu1 %v5247_v14 }
  0xbc   :  { %3194 = vmatprep.mubr.bf16.mxu0 %v5249_v15  ;;  %4663 = vmatprep.subr.bf16.mxu1 %v5253_v16  ;;  %v5310_v15 = vld [vmem:[%s6974_s0 + $0x10c] ss:$100 sps:$4 sm:$0xff]  }
  0xbd   :  { %4720 = vmatpush3.bf16.msra.mxu0 %v5254_v17  ;;  %v5314_v16 = vld [vmem:[%s6973_s1 + $0x570] sm:$0xff]  }
  0xbe   :  { %4721 = vmatprep.subr.bf16.mxu0 %v5262_v18 }
  0xbf   :  { %4664 = vmatpush3.bf16.msra.mxu1 %v5255_v19  ;;  %v5312_v19 = vld [vmem:[%s6973_s1 + $0x4b0] sm:$0xff]  }
  0xc0   :  { %4665 = vmatprep.subr.bf16.mxu1 %v5263_v22 }
  0xc1   :  { %4722 = vmatpush3.bf16.msra.mxu0 %v5264_v24  ;;  %v5313_v24 = vld [vmem:[%s6974_s0 + $0x108] ss:$100 sps:$4 sm:$0xff]  }
  0xc2   :  { %3107 = vmatmul.mubr.bf16.gmra.mxu1 %v5248_v20  ;;  %3195 = vmatmul.mubr.bf16.gmra.mxu0 %v5251_v21  ;;  %v5315_v20 = vld [vmem:[%s6973_s1 + $0x4e8] sm:$0xff]  }
  0xc3   :  { %3114 = vmatprep.mubr.bf16.mxu1 %v5256_v23  ;;  %3202 = vmatprep.mubr.bf16.mxu0 %v5259_v25  ;;  %v5309_v23 = vld [vmem:[%s6974_s0 + $0x100] ss:$100 sps:$4 sm:$0xff]   ;;  %v5316_v25 = vld [vmem:[%s6973_s1 + $0x530] sm:$0xff]  }
  0xc4   :  { %4666 = vmatpush3.bf16.msra.mxu1 %v5265_v26  ;;  %4723 = vmatprep.subr.bf16.mxu0 %v5272_v27 }
  0xc5   :  { %4667 = vmatprep.subr.bf16.mxu1 %v5273_v28  ;;  %4724 = vmatpush3.bf16.msra.mxu0 %v5274_v29  ;;  %v5324_v28 = vld [vmem:[%s6973_s1 + $0x568] sm:$0xff]  }
  0xc6   :  { %4725 = vmatprep.subr.bf16.mxu0 %v5282_v30 }
  0xc8   :  { %4668 = vmatpush3.bf16.msra.mxu1 %v5275_v31  ;;  %v5317_v31 = vld [vmem:[%s6974_s0 + $0x1cc] ss:$100 sps:$4 sm:$0xff]  }
  0xc9   :  { %4669 = vmatprep.subr.bf16.mxu1 %v5283_v34  ;;  %4726 = vmatpush3.bf16.msra.mxu0 %v5284_v36  ;;  %v5325_v36 = vld [vmem:[%s6973_s1 + $0x4e0] sm:$0xff]  }
  0xca   :  { %3115 = vmatmul.mubr.bf16.gmra.mxu1 %v5258_v32  ;;  %3203 = vmatmul.mubr.bf16.gmra.mxu0 %v5261_v33  ;;  %v5319_v32 = vld [vmem:[%s6973_s1 + $0x4a8] sm:$0xff]  }
  0xcb   :  { %3122 = vmatprep.mubr.bf16.mxu1 %v5266_v35  ;;  %3210 = vmatprep.mubr.bf16.mxu0 %v5269_v37  ;;  %v5321_v35 = vld [vmem:[%s6974_s0 + $0x1d4] ss:$100 sps:$4 sm:$0xff]  }
  0xcc   :  { %4670 = vmatpush3.bf16.msra.mxu1 %v5285_v38  ;;  %4727 = vmatprep.subr.bf16.mxu0 %v5289_v39  ;;  %v5326_v39 = vld [vmem:[%s6973_s1 + $0x528] sm:$0xff]  }
  0xcd   :  { %4671 = vmatprep.subr.bf16.mxu1 %v5291_v40  ;;  %4728 = vmatpush3.bf16.msra.mxu0 %v5292_v41 }
  0xce   :  { %4729 = vmatprep.subr.bf16.mxu0 %v5294_v42  ;;  %v5334_v42 = vld [vmem:[%s6973_s1 + $0x560] sm:$0xff]  }
  0xd0   :  { %4672 = vmatpush3.bf16.msra.mxu1 %v5293_v45 }
  0xd1   :  { %4730 = vmatpush3.bf16.msra.mxu0 %v5295_v47  ;;  %4773 = vmatprep.subr.bf16.mxu1 %v5302_v48  ;;  %v5323_v47 = vld [vmem:[%s6974_s0 + $0x1d0] ss:$100 sps:$4 sm:$0xff]   ;;  %v5335_v48 = vld [vmem:[%s6973_s1 + $0x4d8] sm:$0xff]  }
  0xd2   :  { %3123 = vmatmul.mubr.bf16.gmra.mxu1 %v5268_v43  ;;  %3211 = vmatmul.mubr.bf16.gmra.mxu0 %v5271_v44  ;;  %v5327_v43 = vld [vmem:[%s6973_s1 + $0x4a0] sm:$0xff]  }
  0xd3   :  { %3130 = vmatprep.mubr.bf16.mxu1 %v5276_v46  ;;  %3218 = vmatprep.mubr.bf16.mxu0 %v5279_v49  ;;  %v5320_v46 = vld [vmem:[%s6974_s0 + $0x1c8] ss:$100 sps:$4 sm:$0xff]  }
  0xd4   :  { %4831 = vmatprep.subr.bf16.mxu0 %v5304_v50 }
  0xda   :  { %3131 = vmatmul.mubr.bf16.gmra.mxu1 %v5278_v53  ;;  %3219 = vmatmul.mubr.bf16.gmra.mxu0 %v5281_v54  ;;  %v5336_v53 = vld [vmem:[%s6973_s1 + $0x520] sm:$0xff]  }
  0xdb   :  { %3138 = vmatprep.mubr.bf16.mxu1 %v4008_v55  ;;  %3226 = vmatprep.mubr.bf16.mxu0 %v4010_v56  ;;  %v5337_v56 = vld [vmem:[%s6973_s1 + $0x498] sm:$0xff]  }
  0xe2   :  { %v4291_v61 = vpop.f32.mrf.mxu1  ;;  %3139 = vmatmul.mubr.bf16.gmra.mxu1 %v4007_v57  ;;  %v4267_v62 = vpop.f32.mrf.mxu0  ;;  %3227 = vmatmul.mubr.bf16.gmra.mxu0 %v4009_v58  ;;  %v5344_v57 = vld [vmem:[%s6973_s1 + $0x558] sm:$0xff]  }
  0xe3   :  { %3266 = vmatprep.mubr.bf16.mxu1 %v5298_v59  ;;  %3354 = vmatprep.mubr.bf16.mxu0 %v5301_v60  ;;  %v5345_v60 = vld [vmem:[%s6973_s1 + $0x4d0] sm:$0xff]  }
  0xe4   :  { %v4292_v63 = vpop.f32.mrf.mxu1  ;;  %v4268_v0 = vpop.f32.mrf.mxu0 }
  0xe5   :  { %v6197_v2 = vadd.f32 %v4292_v63, %v4291_v61  ;;  %v6199_v3 = vadd.f32 %v4268_v0, %v4267_v62  ;;  %v5346_v62 = vld [vmem:[%s6973_s1 + $0x518] sm:$0xff]   ;;  %v5354_v0 = vld [vmem:[%s6973_s1 + $0x550] sm:$0xff]  }
  0xe6   :  { %v4294_v5 = vpop.f32.mrf.mxu1  ;;  %v4270_v6 = vpop.f32.mrf.mxu0 }
  0xe8   :  { %v4295_v9 = vpop.f32.mrf.mxu1  ;;  %v4271_v10 = vpop.f32.mrf.mxu0 }
  0xe9   :  { %v6216_v13 = vadd.f32 %v4295_v9, %v4294_v5  ;;  %v6218_v14 = vadd.f32 %v4271_v10, %v4270_v6  ;;  %v5331_v5 = vld [vmem:[%s6974_s0 + $0x298] ss:$100 sps:$4 sm:$0xff]   ;;  %v5347_v6 = vld [vmem:[%s6973_s1 + $0x490] sm:$0xff]   ;;  %v5343_v9 = vld [vmem:[%s6974_s0 + $0x364] ss:$100 sps:$4 sm:$0xff]  }
  0xea   :  { %3267 = vmatmul.mubr.bf16.vlgmr.msra.gmra.mxu1 %v5296_v1  ;;  %v4273_v17 = vpop.f32.mrf.mxu0  ;;  %3355 = vmatmul.mubr.bf16.vlgmr.msra.gmra.mxu0 %v5299_v4  ;;  %v4297_v18 = vpop.f32.mrf.mxu1  ;;  %v5330_v4 = vld [vmem:[%s6974_s0 + $0x290] ss:$100 sps:$4 sm:$0xff]   ;;  %v5355_v10 = vld [vmem:[%s6973_s1 + $0x4c8] sm:$0xff]  }
  0xeb   :  { %4774 = vmatpush3.bf16.msra.mxu1 %v5303_v7  ;;  %3274 = vmatprep.mubr.bf16.mxu1 %v5305_v8  ;;  %v5340_v8 = vld [vmem:[%s6974_s0 + $0x35c] ss:$100 sps:$4 sm:$0xff]  }
  0xec   :  { %v4274_v21 = vpop.f32.mrf.mxu0  ;;  %v4298_v22 = vpop.f32.mrf.mxu1  ;;  %4775 = vmatprep.subr.bf16.mxu1 %v5307_v11  ;;  %4832 = vmatpush3.bf16.msra.mxu0 %v5308_v12  ;;  %v5356_v11 = vld [vmem:[%s6973_s1 + $0x510] sm:$0xff]  }
  0xed   :  { %v6241_v26 = vadd.f32 %v4274_v21, %v4273_v17  ;;  %v6243_v27 = vadd.f32 %v4298_v22, %v4297_v18  ;;  %3362 = vmatprep.mubr.bf16.mxu0 %v5310_v15  ;;  %4833 = vmatprep.subr.bf16.mxu0 %v5314_v16  ;;  %v5357_v15 = vld [vmem:[%s6973_s1 + $0x488] sm:$0xff]   ;;  %v5363_v18 = vld [vmem:[%s6973_s1 + $0x4c0] sm:$0xff]  }
  0xee   :  { %v4276_v29 = vpop.f32.mrf.mxu0  ;;  %v4300_v30 = vpop.f32.mrf.mxu1  ;;  %v5362_v16 = vld [vmem:[%s6973_s1 + $0x548] sm:$0xff]  }
  0xef   :  { %4776 = vmatpush3.bf16.msra.mxu1 %v5312_v19 }
  0xf0   :  { %v4277_v33 = vpop.f32.mrf.mxu0  ;;  %v4301_v34 = vpop.f32.mrf.mxu1  ;;  %4777 = vmatprep.subr.bf16.mxu1 %v5315_v20  ;;  %4834 = vmatpush3.bf16.msra.mxu0 %v5316_v25  ;;  %v5364_v20 = vld [vmem:[%s6973_s1 + $0x508] sm:$0xff]  }
  0xf1   :  { %v6260_v37 = vadd.f32 %v4277_v33, %v4276_v29  ;;  %v6262_v38 = vadd.f32 %v4301_v34, %v4300_v30  ;;  %4835 = vmatprep.subr.bf16.mxu0 %v5324_v28  ;;  %v5338_v29 = vld [vmem:[%s6974_s0 + $0x358] ss:$100 sps:$4 sm:$0xff]   ;;  %v5365_v30 = vld [vmem:[%s6973_s1 + $0x480] sm:$0xff]  }
  0xf2   :  { %3275 = vmatmul.mubr.bf16.gmra.mxu1 %v5309_v23  ;;  %v4279_v40 = vpop.f32.mrf.mxu0  ;;  %3363 = vmatmul.mubr.bf16.gmra.mxu0 %v5313_v24  ;;  %v4303_v41 = vpop.f32.mrf.mxu1  ;;  %v5366_v23 = vld [vmem:[%s6973_s1 + $0x540] sm:$0xff]  }
  0xf3   :  { %3282 = vmatprep.mubr.bf16.mxu1 %v5317_v31  ;;  %4778 = vmatpush3.bf16.msra.mxu1 %v5319_v32  ;;  %v6355_v24 = vld [vmem:[%s6975_s2] ss:$0 sm:$0xff] }
  0xf4   :  { %v4280_v44 = vpop.f32.mrf.mxu0  ;;  %v4304_v45 = vpop.f32.mrf.mxu1  ;;  %3370 = vmatprep.mubr.bf16.mxu0 %v5321_v35  ;;  %4779 = vmatprep.subr.bf16.mxu1 %v5325_v36  ;;  %v5367_v31 = vld [vmem:[%s6973_s1 + $0x500] sm:$0xff]   ;;  %v2653_v32 = vadd.f32 %v6199_v3, %v6355_v24  ;;  %v5374_v35 = vld [vmem:[%s6973_s1 + $0x5f8] sm:$0xff]  }
  0xf5   :  { %v6282_v49 = vadd.f32 %v4280_v44, %v4279_v40  ;;  %v6284_v50 = vadd.f32 %v4304_v45, %v4303_v41  ;;  %4836 = vmatpush3.bf16.msra.mxu0 %v5326_v39  ;;  %v5341_v40 = vld [vmem:[%s6974_s0 + $0x360] ss:$100 sps:$4 sm:$0xff]  }
  0xf6   :  { %v4282_v54 = vpop.f32.mrf.mxu0  ;;  %v4306_v55 = vpop.f32.mrf.mxu1  ;;  %4837 = vmatprep.subr.bf16.mxu0 %v5334_v42  ;;  %v5350_v3 = vld [vmem:[%s6974_s0 + $0x424] ss:$100 sps:$4 sm:$0xff]   ;;  %v5353_v42 = vld [vmem:[%s6974_s0 + $0x42c] ss:$100 sps:$4 sm:$0xff]  }
  0xf7   :  { %4780 = vmatpush3.bf16.msra.mxu1 %v5327_v43  ;;  %v2656_v43 = vadd.f32 %v6218_v14, %v6355_v24  ;;  %v178_v14 = vld [vmem:[%s6974_s0 + $0x4e8] sm:$0xff] }
  0xf8   :  { %v4283_v58 = vpop.f32.mrf.mxu0  ;;  %v4307_v59 = vpop.f32.mrf.mxu1  ;;  %4781 = vmatprep.subr.bf16.mxu1 %v5335_v48 }
  0xf9   :  { %v6304_v61 = vadd.f32 %v4283_v58, %v4282_v54  ;;  %4838 = vmatpush3.bf16.msra.mxu0 %v5336_v53  ;;  %v2661_v58 = vadd.f32 %v6241_v26, %v6355_v24  ;;  %v2664_v26 = vadd.f32 %v6260_v37, %v6355_v24 }
  0xfa   :  { %3283 = vmatmul.mubr.bf16.gmra.mxu1 %v5320_v46  ;;  %v4285_v63 = vpop.f32.mrf.mxu0  ;;  %3371 = vmatmul.mubr.bf16.gmra.mxu0 %v5323_v47 }
  0xfb   :  { %3290 = vmatprep.mubr.bf16.mxu1 %v5328_v51  ;;  %3378 = vmatprep.mubr.bf16.mxu0 %v5333_v52 }
  0xfc   :  { %v4286_v1 = vpop.f32.mrf.mxu0  ;;  %4782 = vmatpush3.bf16.msra.mxu1 %v5337_v56  ;;  %4839 = vmatprep.subr.bf16.mxu0 %v5344_v57  ;;  %v179_v56 = vld [vmem:[%s6974_s0 + $0x4f0] sm:$0xff]  ;;  %v5455_v57 = vmov 0.0  }
  0xfd   :  { %v6321_v7 = vadd.f32 %v4286_v1, %v4285_v63  ;;  %4783 = vmatprep.subr.bf16.mxu1 %v5345_v60  ;;  %4840 = vmatpush3.bf16.msra.mxu0 %v5346_v62  ;;  %v5348_v1 = vld [vmem:[%s6974_s0 + $0x420] ss:$100 sps:$4 sm:$0xff]  }
  0xfe   :  { %v4288_v12 = vpop.f32.mrf.mxu0  ;;  %4841 = vmatprep.subr.bf16.mxu0 %v5354_v0 }
 0x100   :  { %v4289_v17 = vpop.f32.mrf.mxu0  ;;  %4784 = vmatpush3.bf16.msra.mxu1 %v5347_v6  ;;  %v4012_v6 = vcombine.high %v178_v14, %v178_v14 }
 0x101   :  { %v6344_v19 = vadd.f32 %v4289_v17, %v4288_v12  ;;  %4785 = vmatprep.subr.bf16.mxu1 %v5355_v10  ;;  %4842 = vmatpush3.bf16.msra.mxu0 %v5356_v11 }
 0x102   :  { %v4325_v21 = vpop.f32.mrf.mxu1  ;;  %3291 = vmatmul.mubr.bf16.gmra.mxu1 %v5330_v4  ;;  %v4383_v22 = vpop.f32.mrf.mxu0  ;;  %3379 = vmatmul.mubr.bf16.gmra.mxu0 %v5331_v5  ;;  %v5351_v4 = vld [vmem:[%s6974_s0 + $0x428] ss:$100 sps:$4 sm:$0xff]  }
 0x103   :  { %3298 = vmatprep.mubr.bf16.mxu1 %v5340_v8  ;;  %3386 = vmatprep.mubr.bf16.mxu0 %v5343_v9  ;;  %v4014_v8 = vcombine.high %v179_v56, %v179_v56 }
 0x104   :  { %v4326_v25 = vpop.f32.mrf.mxu1  ;;  %v4384_v28 = vpop.f32.mrf.mxu0  ;;  %4786 = vmatpush3.bf16.msra.mxu1 %v5357_v15  ;;  %4843 = vmatprep.subr.bf16.mxu0 %v5362_v16 }
 0x105   :  { %v4327_v33 = vadd.f32 %v4326_v25, %v4325_v21  ;;  %v4385_v34 = vadd.f32 %v4384_v28, %v4383_v22  ;;  %4787 = vmatprep.subr.bf16.mxu1 %v5363_v18  ;;  %4844 = vmatpush3.bf16.msra.mxu0 %v5364_v20  ;;  %v2669_v22 = vadd.f32 %v6282_v49, %v6355_v24 }
 0x106   :  { %v4328_v36 = vpop.f32.mrf.mxu1  ;;  %v4386_v39 = vpop.f32.mrf.mxu0  ;;  %4845 = vmatprep.subr.bf16.mxu0 %v5366_v23  ;;  %v2672_v49 = vadd.f32 %v6304_v61, %v6355_v24  ;;  %v5371_v61 = vld [vmem:[%s6974_s0 + $0x50] ss:$100 sps:$4 sm:$0xff]  }
 0x107   :  { %v2741_v41 = vadd.f32 %v4327_v33, %v2653_v32  ;;  %v5370_v32 = vld [vmem:[%s6974_s0 + $0x4c] ss:$100 sps:$4 sm:$0xff]  }
 0x108   :  { %v4329_v44 = vpop.f32.mrf.mxu1  ;;  %v4387_v45 = vpop.f32.mrf.mxu0  ;;  %4788 = vmatpush3.bf16.msra.mxu1 %v5365_v30  ;;  %v4011_v30 = vcombine.low %v178_v14, %v178_v14  ;;  %v5375_v14 = vld [vmem:[%s6973_s1 + $0x5b8] sm:$0xff]  }
 0x109   :  { %v6382_v46 = vadd.f32 %v4385_v34, %v2741_v41  ;;  %v4330_v47 = vadd.f32 %v4329_v44, %v4328_v36  ;;  %v4388_v48 = vadd.f32 %v4387_v45, %v4386_v39  ;;  %4846 = vmatpush3.bf16.msra.mxu0 %v5367_v31  ;;  %4889 = vmatprep.subr.bf16.mxu1 %v5374_v35  ;;  %v5373_v34 = vld [vmem:[%s6974_s0 + $0x54] ss:$100 sps:$4 sm:$0xff]  }
 0x10a   :  { %v4331_v51 = vpop.f32.mrf.mxu1  ;;  %3299 = vmatmul.mubr.bf16.gmra.mxu1 %v5338_v29  ;;  %v4389_v52 = vpop.f32.mrf.mxu0  ;;  %3387 = vmatmul.mubr.bf16.gmra.mxu0 %v5341_v40  ;;  %v4013_v31 = vcombine.low %v179_v56, %v179_v56  ;;  %v5378_v56 = vld [vmem:[%s6974_s0 + $0x114] ss:$100 sps:$4 sm:$0xff]  }
 0x10b   :  { %v2744_v53 = vadd.f32 %v4330_v47, %v2656_v43  ;;  %3306 = vmatprep.mubr.bf16.mxu1 %v5350_v3  ;;  %3394 = vmatprep.mubr.bf16.mxu0 %v5353_v42  ;;  %v5368_v47 = vld [vmem:[%s6974_s0 + $0x48] ss:$100 sps:$4 sm:$0xff]  }
 0x10c   :  { %v4332_v54 = vpop.f32.mrf.mxu1  ;;  %v4390_v55 = vpop.f32.mrf.mxu0  ;;  %4958 = vmatprep.subr.bf16.mxu0 %v5455_v57 }
 0x10d   :  { %v6393_v59 = vadd.f32 %v4388_v48, %v2744_v53  ;;  %v4333_v60 = vadd.f32 %v4332_v54, %v4331_v51  ;;  %v4391_v62 = vadd.f32 %v4390_v55, %v4389_v52  ;;  %v2677_v48 = vadd.f32 %v6321_v7, %v6355_v24 }
 0x10e   :  { %v4334_v63 = vpop.f32.mrf.mxu1  ;;  %v4392_v0 = vpop.f32.mrf.mxu0 }
 0x10f   :  { %v2749_v5 = vadd.f32 %v4333_v60, %v2661_v58  ;;  %v5379_v60 = vld [vmem:[%s6973_s1 + $0x5f0] sm:$0xff]  }
 0x110   :  { %v4335_v9 = vpop.f32.mrf.mxu1  ;;  %v4393_v10 = vpop.f32.mrf.mxu0 }
 0x111   :  { %v6403_v11 = vadd.f32 %v4391_v62, %v2749_v5  ;;  %v4336_v12 = vadd.f32 %v4335_v9, %v4334_v63  ;;  %v4394_v15 = vadd.f32 %v4393_v10, %v4392_v0  ;;  %v5380_v63 = vld [vmem:[%s6973_s1 + $0x618] sm:$0xff]   ;;  %v2680_v0 = vadd.f32 %v6344_v19, %v6355_v24  ;;  %v5385_v19 = vld [vmem:[%s6973_s1 + $0x5e8] sm:$0xff]  }
 0x112   :  { %v4337_v16 = vpop.f32.mrf.mxu1  ;;  %3307 = vmatmul.mubr.bf16.gmra.mxu1 %v5348_v1  ;;  %v4395_v17 = vpop.f32.mrf.mxu0  ;;  %3395 = vmatmul.mubr.bf16.gmra.mxu0 %v5351_v4 }
 0x113   :  { %v2752_v18 = vadd.f32 %v4336_v12, %v2664_v26  ;;  %3314 = vmatprep.mubr.bf16.mxu1 %v4012_v6  ;;  %3402 = vmatprep.mubr.bf16.mxu0 %v4014_v8  ;;  %v5383_v6 = vld [vmem:[%s6974_s0 + $0x11c] ss:$100 sps:$4 sm:$0xff]   ;;  %v5384_v26 = vld [vmem:[%s6973_s1 + $0x5b0] sm:$0xff]   ;;  %v2685_v12 = vadd.f32 %v6197_v2, %v6355_v24 }
 0x114   :  { %v4338_v20 = vpop.f32.mrf.mxu1  ;;  %v4396_v21 = vpop.f32.mrf.mxu0  ;;  %v5381_v2 = vld [vmem:[%s6974_s0 + $0x118] ss:$100 sps:$4 sm:$0xff]  }
 0x115   :  { %v6407_v23 = vadd.f32 %v4394_v15, %v2752_v18  ;;  %v4339_v25 = vadd.f32 %v4338_v20, %v4337_v16  ;;  %v4397_v37 = vadd.f32 %v4396_v21, %v4395_v17  ;;  %v5376_v17 = vld [vmem:[%s6974_s0 + $0x110] ss:$100 sps:$4 sm:$0xff]  }
 0x116   :  { %v4340_v28 = vpop.f32.mrf.mxu1  ;;  %v4398_v29 = vpop.f32.mrf.mxu0  ;;  %v5394_v18 = vld [vmem:[%s6973_s1 + $0x610] sm:$0xff]  }
 0x117   :  { %v2757_v33 = vadd.f32 %v4339_v25, %v2669_v22  ;;  %v5388_v25 = vld [vmem:[%s6974_s0 + $0x1dc] ss:$100 sps:$4 sm:$0xff]  }
 0x118   :  { %v4341_v35 = vpop.f32.mrf.mxu1  ;;  %v4399_v36 = vpop.f32.mrf.mxu0 }
 0x119   :  { %v6417_v39 = vadd.f32 %v4397_v37, %v2757_v33  ;;  %v4342_v40 = vadd.f32 %v4341_v35, %v4340_v28  ;;  %v4400_v41 = vadd.f32 %v4399_v36, %v4398_v29  ;;  %v5389_v29 = vld [vmem:[%s6973_s1 + $0x5a8] sm:$0xff]   ;;  %v2688_v35 = vadd.f32 %v6216_v13, %v6355_v24  ;;  %v5395_v13 = vld [vmem:[%s6973_s1 + $0x5a0] sm:$0xff]  }
 0x11a   :  { %v4343_v3 = vpop.f32.mrf.mxu1  ;;  %3315 = vmatmul.mubr.bf16.gmra.mxu1 %v4011_v30  ;;  %v4401_v42 = vpop.f32.mrf.mxu0  ;;  %3403 = vmatmul.mubr.bf16.gmra.mxu0 %v4013_v31  ;;  %v5392_v31 = vld [vmem:[%s6974_s0 + $0x1e4] ss:$100 sps:$4 sm:$0xff]  }
 0x11b   :  { %v2760_v43 = vadd.f32 %v4342_v40, %v2672_v49  ;;  %3442 = vmatprep.mubr.bf16.mxu1 %v5370_v32  ;;  %3530 = vmatprep.mubr.bf16.mxu0 %v5373_v34  ;;  %v5393_v34 = vld [vmem:[%s6973_s1 + $0x5e0] sm:$0xff]  }
 0x11c   :  { %v4344_v44 = vpop.f32.mrf.mxu1  ;;  %v4402_v45 = vpop.f32.mrf.mxu0 }
 0x11d   :  { %v6427_v51 = vadd.f32 %v4400_v41, %v2760_v43  ;;  %v4345_v52 = vadd.f32 %v4344_v44, %v4343_v3  ;;  %v4403_v53 = vadd.f32 %v4402_v45, %v4401_v42  ;;  %v5411_v41 = vld [vmem:[%s6973_s1 + $0x608] sm:$0xff]  }
 0x11e   :  { %v4346_v54 = vpop.f32.mrf.mxu1  ;;  %v4404_v55 = vpop.f32.mrf.mxu0 }
 0x11f   :  { %v2765_v58 = vadd.f32 %v4345_v52, %v2677_v48 }
 0x120   :  { %v4347_v7 = vpop.f32.mrf.mxu1  ;;  %v4405_v62 = vpop.f32.mrf.mxu0 }
 0x121   :  { %v6443_v1 = vadd.f32 %v4403_v53, %v2765_v58  ;;  %v4348_v4 = vadd.f32 %v4347_v7, %v4346_v54  ;;  %v4406_v5 = vadd.f32 %v4405_v62, %v4404_v55  ;;  %v5390_v58 = vld [vmem:[%s6974_s0 + $0x1e0] ss:$100 sps:$4 sm:$0xff]   ;;  %v5401_v7 = vld [vmem:[%s6974_s0 + $0x2ac] ss:$100 sps:$4 sm:$0xff]  }
 0x122   :  { %v4349_v8 = vpop.f32.mrf.mxu1  ;;  %3443 = vmatmul.mubr.bf16.vlgmr.msra.gmra.mxu1 %v5368_v47  ;;  %v4407_v9 = vpop.f32.mrf.mxu0  ;;  %3531 = vmatmul.mubr.bf16.vlgmr.msra.gmra.mxu0 %v5371_v61  ;;  %v5402_v47 = vld [vmem:[%s6973_s1 + $0x5d8] sm:$0xff]   ;;  %v2693_v61 = vadd.f32 %v6243_v27, %v6355_v24 }
 0x123   :  { %v2768_v10 = vadd.f32 %v4348_v4, %v2680_v0  ;;  %4890 = vmatpush3.bf16.msra.mxu1 %v5375_v14  ;;  %3450 = vmatprep.mubr.bf16.mxu1 %v5378_v56  ;;  %v5426_v14 = vld [vmem:[%s6973_s1 + $0x600] sm:$0xff]   ;;  %v5386_v56 = vld [vmem:[%s6974_s0 + $0x1d8] ss:$100 sps:$4 sm:$0xff]   ;;  %v2696_v4 = vadd.f32 %v6262_v38, %v6355_v24  ;;  %v5412_v38 = vld [vmem:[%s6973_s1 + $0x590] sm:$0xff]  }
 0x124   :  { %v4350_v15 = vpop.f32.mrf.mxu1  ;;  %v4408_v16 = vpop.f32.mrf.mxu0  ;;  %4891 = vmatprep.subr.bf16.mxu1 %v5379_v60  ;;  %4959 = vmatpush3.bf16.msra.mxu0 %v5380_v63  ;;  %v5398_v60 = vld [vmem:[%s6974_s0 + $0x2a4] ss:$100 sps:$4 sm:$0xff]   ;;  %v5403_v0 = vld [vmem:[%s6973_s1 + $0x598] sm:$0xff]  }
 0x125   :  { %v6462_v20 = vadd.f32 %v4406_v5, %v2768_v10  ;;  %v4351_v21 = vadd.f32 %v4350_v15, %v4349_v8  ;;  %v4409_v22 = vadd.f32 %v4408_v16, %v4407_v9  ;;  %3538 = vmatprep.mubr.bf16.mxu0 %v5383_v6  ;;  %4960 = vmatprep.subr.bf16.mxu0 %v5455_v57  ;;  %v5410_v9 = vld [vmem:[%s6973_s1 + $0x5d0] sm:$0xff]  }
 0x126   :  { %v4352_v37 = vpop.f32.mrf.mxu1  ;;  %v4410_v28 = vpop.f32.mrf.mxu0  ;;  %v2701_v16 = vadd.f32 %v6284_v50, %v6355_v24  ;;  %v5406_v24 = vld [vmem:[%s6974_s0 + $0x36c] ss:$100 sps:$4 sm:$0xff]  }
 0x127   :  { %v2773_v30 = vadd.f32 %v4351_v21, %v2685_v12  ;;  %4892 = vmatpush3.bf16.msra.mxu1 %v5384_v26 }
 0x128   :  { %v4353_v32 = vpop.f32.mrf.mxu1  ;;  %v4411_v33 = vpop.f32.mrf.mxu0  ;;  %4893 = vmatprep.subr.bf16.mxu1 %v5385_v19  ;;  %4961 = vmatpush3.bf16.msra.mxu0 %v5394_v18 }
 0x129   :  { %v6482_v36 = vadd.f32 %v4409_v22, %v2773_v30  ;;  %v4354_v49 = vadd.f32 %v4353_v32, %v4352_v37  ;;  %v4412_v40 = vadd.f32 %v4411_v33, %v4410_v28  ;;  %4962 = vmatprep.subr.bf16.mxu0 %v5455_v57  ;;  %v5419_v22 = vld [vmem:[%s6973_s1 + $0x5c8] sm:$0xff]   ;;  %v5396_v37 = vld [vmem:[%s6974_s0 + $0x2a0] ss:$100 sps:$4 sm:$0xff]  }
 0x12a   :  { %v4355_v3 = vpop.f32.mrf.mxu1  ;;  %3451 = vmatmul.mubr.bf16.gmra.mxu1 %v5376_v17  ;;  %v4413_v42 = vpop.f32.mrf.mxu0  ;;  %3539 = vmatmul.mubr.bf16.gmra.mxu0 %v5381_v2  ;;  %v5399_v28 = vld [vmem:[%s6974_s0 + $0x2a8] ss:$100 sps:$4 sm:$0xff]  }
 0x12b   :  { %v2776_v43 = vadd.f32 %v4354_v49, %v2688_v35  ;;  %3458 = vmatprep.mubr.bf16.mxu1 %v5388_v25  ;;  %4894 = vmatpush3.bf16.msra.mxu1 %v5389_v29  ;;  %v5409_v29 = vld [vmem:[%s6974_s0 + $0x374] ss:$100 sps:$4 sm:$0xff]   ;;  %v5420_v32 = vld [vmem:[%s6973_s1 + $0x588] sm:$0xff]  }
 0x12c   :  { %v4356_v44 = vpop.f32.mrf.mxu1  ;;  %v4414_v45 = vpop.f32.mrf.mxu0  ;;  %3546 = vmatprep.mubr.bf16.mxu0 %v5392_v31  ;;  %4895 = vmatprep.subr.bf16.mxu1 %v5393_v34  ;;  %v5425_v34 = vld [vmem:[%s6973_s1 + $0x5c0] sm:$0xff]  }
 0x12d   :  { %v6496_v48 = vadd.f32 %v4412_v40, %v2776_v43  ;;  %v4357_v52 = vadd.f32 %v4356_v44, %v4355_v3  ;;  %v4415_v53 = vadd.f32 %v4414_v45, %v4413_v42  ;;  %4963 = vmatpush3.bf16.msra.mxu0 %v5411_v41  ;;  %v5427_v3 = vld [vmem:[%s6973_s1 + $0x580] sm:$0xff]   ;;  %v5404_v45 = vld [vmem:[%s6974_s0 + $0x368] ss:$100 sps:$4 sm:$0xff]  }
 0x12e   :  { %v4358_v54 = vpop.f32.mrf.mxu1  ;;  %v4416_v55 = vpop.f32.mrf.mxu0  ;;  %4964 = vmatprep.subr.bf16.mxu0 %v5455_v57 }
 0x12f   :  { %v2781_v27 = vadd.f32 %v4357_v52, %v2693_v61  ;;  %4896 = vmatpush3.bf16.msra.mxu1 %v5395_v13  ;;  %v5415_v52 = vld [vmem:[%s6974_s0 + $0x434] ss:$100 sps:$4 sm:$0xff]  }
 0x130   :  { %v4359_v62 = vpop.f32.mrf.mxu1  ;;  %v4417_v63 = vpop.f32.mrf.mxu0  ;;  %4897 = vmatprep.subr.bf16.mxu1 %v5402_v47  ;;  %v5407_v47 = vld [vmem:[%s6974_s0 + $0x370] ss:$100 sps:$4 sm:$0xff]  }
 0x131   :  { %v6519_v5 = vadd.f32 %v4415_v53, %v2781_v27  ;;  %v4360_v6 = vadd.f32 %v4359_v62, %v4358_v54  ;;  %v4418_v8 = vadd.f32 %v4417_v63, %v4416_v55  ;;  %4965 = vmatpush3.bf16.msra.mxu0 %v5426_v14  ;;  %v5418_v53 = vld [vmem:[%s6974_s0 + $0x43c] ss:$100 sps:$4 sm:$0xff]  }
 0x132   :  { %v4361_v10 = vpop.f32.mrf.mxu1  ;;  %3459 = vmatmul.mubr.bf16.gmra.mxu1 %v5386_v56  ;;  %v4419_v26 = vpop.f32.mrf.mxu0  ;;  %3547 = vmatmul.mubr.bf16.gmra.mxu0 %v5390_v58  ;;  %v180_v63 = vld [vmem:[%s6974_s0 + $0x4f8] sm:$0xff] }
 0x133   :  { %v2784_v19 = vadd.f32 %v4360_v6, %v2696_v4  ;;  %3466 = vmatprep.mubr.bf16.mxu1 %v5398_v60  ;;  %3554 = vmatprep.mubr.bf16.mxu0 %v5401_v7 }
 0x134   :  { %v4362_v12 = vpop.f32.mrf.mxu1  ;;  %v4420_v15 = vpop.f32.mrf.mxu0  ;;  %4898 = vmatpush3.bf16.msra.mxu1 %v5403_v0  ;;  %v181_v0 = vld [vmem:[%s6974_s0 + $0x500] sm:$0xff] }
 0x135   :  { %v6529_v17 = vadd.f32 %v4418_v8, %v2784_v19  ;;  %v4363_v18 = vadd.f32 %v4362_v12, %v4361_v10  ;;  %v4421_v21 = vadd.f32 %v4420_v15, %v4419_v26  ;;  %4899 = vmatprep.subr.bf16.mxu1 %v5410_v9  ;;  %v5416_v26 = vld [vmem:[%s6974_s0 + $0x438] ss:$100 sps:$4 sm:$0xff]   ;;  %v4016_v12 = vcombine.high %v180_v63, %v180_v63 }
 0x136   :  { %v4364_v2 = vpop.f32.mrf.mxu1  ;;  %v4422_v25 = vpop.f32.mrf.mxu0  ;;  %v4018_v15 = vcombine.high %v181_v0, %v181_v0 }
 0x137   :  { %v2789_v50 = vadd.f32 %v4363_v18, %v2701_v16 }
 0x138   :  { %v4365_v30 = vpop.f32.mrf.mxu1  ;;  %v4423_v31 = vpop.f32.mrf.mxu0  ;;  %4900 = vmatpush3.bf16.msra.mxu1 %v5412_v38 }
 0x139   :  { %v6549_v33 = vadd.f32 %v4421_v21, %v2789_v50  ;;  %4901 = vmatprep.subr.bf16.mxu1 %v5419_v22 }
 0x13a   :  { %v4441_v35 = vpop.f32.mrf.mxu1  ;;  %3467 = vmatmul.mubr.bf16.gmra.mxu1 %v5396_v37  ;;  %v4499_v49 = vpop.f32.mrf.mxu0  ;;  %3555 = vmatmul.mubr.bf16.gmra.mxu0 %v5399_v28 }
 0x13b   :  { %3474 = vmatprep.mubr.bf16.mxu1 %v5406_v24  ;;  %3562 = vmatprep.mubr.bf16.mxu0 %v5409_v29 }
 0x13c   :  { %v4442_v40 = vpop.f32.mrf.mxu1  ;;  %v4500_v41 = vpop.f32.mrf.mxu0  ;;  %4902 = vmatpush3.bf16.msra.mxu1 %v5420_v32  ;;  %v4015_v32 = vcombine.low %v180_v63, %v180_v63 }
 0x13d   :  { %v4443_v42 = vadd.f32 %v4442_v40, %v4441_v35  ;;  %v4501_v43 = vadd.f32 %v4500_v41, %v4499_v49  ;;  %4903 = vmatprep.subr.bf16.mxu1 %v5425_v34  ;;  %v4017_v34 = vcombine.low %v181_v0, %v181_v0  ;;  %v5430_v49 = vld [vmem:[%s6974_s0 + $0x5c] ss:$100 sps:$4 sm:$0xff]  }
 0x13e   :  { %v4444_v13 = vpop.f32.mrf.mxu1  ;;  %v4502_v44 = vpop.f32.mrf.mxu0 }
 0x13f   :  { %v2917_v61 = vadd.f32 %v4443_v42, %v6382_v46 }
 0x140   :  { %v4445_v14 = vpop.f32.mrf.mxu1  ;;  %v4503_v54 = vpop.f32.mrf.mxu0  ;;  %4904 = vmatpush3.bf16.msra.mxu1 %v5427_v3 }
 0x141   :  { %v6570_v55 = vadd.f32 %v4501_v43, %v2917_v61  ;;  %v4446_v56 = vadd.f32 %v4445_v14, %v4444_v13  ;;  %v4504_v58 = vadd.f32 %v4503_v54, %v4502_v44  ;;  %v5428_v54 = vld [vmem:[%s6974_s0 + $0x58] ss:$100 sps:$4 sm:$0xff]  }
 0x142   :  { %v4447_v27 = vpop.f32.mrf.mxu1  ;;  %3475 = vmatmul.mubr.bf16.gmra.mxu1 %v5404_v45  ;;  %v4505_v60 = vpop.f32.mrf.mxu0  ;;  %3563 = vmatmul.mubr.bf16.gmra.mxu0 %v5407_v47 }
 0x143   :  { %v2920_v46 = vadd.f32 %v4446_v56, %v6393_v59  ;;  %3482 = vmatprep.mubr.bf16.mxu1 %v5415_v52  ;;  %3570 = vmatprep.mubr.bf16.mxu0 %v5418_v53  ;;  %v5413_v59 = vld [vmem:[%s6974_s0 + $0x430] ss:$100 sps:$4 sm:$0xff]  }
 0x144   :  { %v4448_v7 = vpop.f32.mrf.mxu1  ;;  %v4506_v62 = vpop.f32.mrf.mxu0 }
 0x145   :  { %v6579_v4 = vadd.f32 %v4504_v58, %v2920_v46  ;;  %v4449_v6 = vadd.f32 %v4448_v7, %v4447_v27  ;;  %v4507_v8 = vadd.f32 %v4506_v62, %v4505_v60  ;;  %v5434_v58 = vld [vmem:[%s6974_s0 + $0x124] ss:$100 sps:$4 sm:$0xff]  }
 0x146   :  { %v4450_v9 = vpop.f32.mrf.mxu1  ;;  %v4508_v10 = vpop.f32.mrf.mxu0 }
 0x147   :  { %v2925_v19 = vadd.f32 %v4449_v6, %v6403_v11 }
 0x148   :  { %v4451_v38 = vpop.f32.mrf.mxu1  ;;  %v4509_v16 = vpop.f32.mrf.mxu0 }
 0x149   :  { %v6588_v18 = vadd.f32 %v4507_v8, %v2925_v19  ;;  %v4452_v21 = vadd.f32 %v4451_v38, %v4450_v9  ;;  %v4510_v22 = vadd.f32 %v4509_v16, %v4508_v10  ;;  %v5438_v38 = vld [vmem:[%s6974_s0 + $0x1ec] ss:$100 sps:$4 sm:$0xff]  }
 0x14a   :  { %v4453_v2 = vpop.f32.mrf.mxu1  ;;  %3483 = vmatmul.mubr.bf16.gmra.mxu1 %v5413_v59  ;;  %v4511_v25 = vpop.f32.mrf.mxu0  ;;  %3571 = vmatmul.mubr.bf16.gmra.mxu0 %v5416_v26 }
 0x14b   :  { %v2928_v37 = vadd.f32 %v4452_v21, %v6407_v23  ;;  %3490 = vmatprep.mubr.bf16.mxu1 %v4016_v12  ;;  %3578 = vmatprep.mubr.bf16.mxu0 %v4018_v15  ;;  %v5432_v12 = vld [vmem:[%s6974_s0 + $0x120] ss:$100 sps:$4 sm:$0xff]  }
 0x14c   :  { %v4454_v28 = vpop.f32.mrf.mxu1  ;;  %v4512_v50 = vpop.f32.mrf.mxu0 }
 0x14d   :  { %v6591_v24 = vadd.f32 %v4510_v22, %v2928_v37  ;;  %v4455_v11 = vadd.f32 %v4454_v28, %v4453_v2  ;;  %v4513_v29 = vadd.f32 %v4512_v50, %v4511_v25 }
 0x14e   :  { %v4456_v30 = vpop.f32.mrf.mxu1  ;;  %v4514_v31 = vpop.f32.mrf.mxu0 }
 0x14f   :  { %v2933_v35 = vadd.f32 %v4455_v11, %v6417_v39 }
 0x150   :  { %v4457_v40 = vpop.f32.mrf.mxu1  ;;  %v4515_v23 = vpop.f32.mrf.mxu0 }
 0x151   :  { %v6597_v41 = vadd.f32 %v4513_v29, %v2933_v35  ;;  %v4458_v3 = vadd.f32 %v4457_v40, %v4456_v30  ;;  %v4516_v42 = vadd.f32 %v4515_v23, %v4514_v31  ;;  %v5436_v35 = vld [vmem:[%s6974_s0 + $0x1e8] ss:$100 sps:$4 sm:$0xff]   ;;  %v5442_v40 = vld [vmem:[%s6974_s0 + $0x2b4] ss:$100 sps:$4 sm:$0xff]  }
 0x152   :  { %v4459_v43 = vpop.f32.mrf.mxu1  ;;  %3491 = vmatmul.mubr.bf16.gmra.mxu1 %v4015_v32  ;;  %v4517_v13 = vpop.f32.mrf.mxu0  ;;  %3579 = vmatmul.mubr.bf16.gmra.mxu0 %v4017_v34 }
 0x153   :  { %v2936_v44 = vadd.f32 %v4458_v3, %v6427_v51  ;;  %3618 = vmatprep.mubr.bf16.mxu1 %v5430_v49  ;;  %4966 = vmatprep.mubr.msk.bf16.mxu0 %vm5456_vm0, %v5455_v57  ;;  %v5431_v51 = vld [vmem:[%s6974_s0 + $0x60] ss:$100 sps:$4 sm:$0xff]  }
 0x154   :  { %v4460_v39 = vpop.f32.mrf.mxu1  ;;  %v4518_v45 = vpop.f32.mrf.mxu0 }
 0x155   :  { %v6602_v47 = vadd.f32 %v4516_v42, %v2936_v44  ;;  %v4461_v61 = vadd.f32 %v4460_v39, %v4459_v43  ;;  %v4519_v52 = vadd.f32 %v4518_v45, %v4517_v13 }
 0x156   :  { %v4462_v53 = vpop.f32.mrf.mxu1  ;;  %v4520_v14 = vpop.f32.mrf.mxu0 }
 0x157   :  { %v2941_v56 = vadd.f32 %v4461_v61, %v6443_v1 }
 0x158   :  { %v4463_v27 = vpop.f32.mrf.mxu1  ;;  %v4521_v60 = vpop.f32.mrf.mxu0 }
 0x159   :  { %v6614_v46 = vadd.f32 %v4519_v52, %v2941_v56  ;;  %v4464_v7 = vadd.f32 %v4463_v27, %v4462_v53  ;;  %v4522_v62 = vadd.f32 %v4521_v60, %v4520_v14  ;;  %v5440_v56 = vld [vmem:[%s6974_s0 + $0x2b0] ss:$100 sps:$4 sm:$0xff]   ;;  %v5446_v27 = vld [vmem:[%s6974_s0 + $0x37c] ss:$100 sps:$4 sm:$0xff]  }
 0x15a   :  { %v4465_v63 = vpop.f32.mrf.mxu1  ;;  %3619 = vmatmul.mubr.bf16.vlgmr.msra.gmra.mxu1 %v5428_v54  ;;  %v4523_v0 = vpop.f32.mrf.mxu0  ;;  %4967 = vmatmul.mubr.msk.bf16.vlgmr.msra.gmra.mxu0 %vm2596_vm1, %v5431_v51 }
 0x15b   :  { %v2944_v6 = vadd.f32 %v4464_v7, %v6462_v20  ;;  %3626 = vmatprep.mubr.bf16.mxu1 %v5434_v58  ;;  %4970 = vmatprep.mubr.msk.bf16.mxu0 %vm5456_vm0, %v5455_v57  ;;  %v5435_v20 = vld [vmem:[%s6974_s0 + $0x128] ss:$100 sps:$4 sm:$0xff]  }
 0x15c   :  { %v4466_v1 = vpop.f32.mrf.mxu1  ;;  %v4524_v8 = vpop.f32.mrf.mxu0 }
 0x15d   :  { %v6620_v9 = vadd.f32 %v4522_v62, %v2944_v6  ;;  %v4467_v10 = vadd.f32 %v4466_v1, %v4465_v63  ;;  %v4525_v59 = vadd.f32 %v4524_v8, %v4523_v0 }
 0x15e   :  { %v4468_v26 = vpop.f32.mrf.mxu1  ;;  %v4526_v19 = vpop.f32.mrf.mxu0 }
 0x15f   :  { %v2949_v15 = vadd.f32 %v4467_v10, %v6482_v36 }
 0x160   :  { %v4469_v16 = vpop.f32.mrf.mxu1  ;;  %v4527_v21 = vpop.f32.mrf.mxu0 }
 0x161   :  { %v6632_v22 = vadd.f32 %v4525_v59, %v2949_v15  ;;  %v4470_v2 = vadd.f32 %v4469_v16, %v4468_v26  ;;  %v4528_v25 = vadd.f32 %v4527_v21, %v4526_v19  ;;  %v5444_v26 = vld [vmem:[%s6974_s0 + $0x378] ss:$100 sps:$4 sm:$0xff]   ;;  %v5447_v19 = vld [vmem:[%s6974_s0 + $0x380] ss:$100 sps:$4 sm:$0xff]  }
 0x162   :  { %v4471_v37 = vpop.f32.mrf.mxu1  ;;  %3627 = vmatmul.mubr.bf16.gmra.mxu1 %v5432_v12  ;;  %v4529_v28 = vpop.f32.mrf.mxu0  ;;  %4971 = vmatmul.mubr.msk.bf16.gmra.mxu0 %vm2596_vm1, %v5435_v20  ;;  %v5450_v20 = vld [vmem:[%s6974_s0 + $0x444] ss:$100 sps:$4 sm:$0xff]  }
 0x163   :  { %v2952_v50 = vadd.f32 %v4470_v2, %v6496_v48  ;;  %3634 = vmatprep.mubr.bf16.mxu1 %v5438_v38  ;;  %4974 = vmatprep.mubr.msk.bf16.mxu0 %vm5456_vm0, %v5455_v57  ;;  %v5439_v48 = vld [vmem:[%s6974_s0 + $0x1f0] ss:$100 sps:$4 sm:$0xff]  }
 0x164   :  { %v4472_v36 = vpop.f32.mrf.mxu1  ;;  %v4530_v11 = vpop.f32.mrf.mxu0 }
 0x165   :  { %v6638_v29 = vadd.f32 %v4528_v25, %v2952_v50  ;;  %v4473_v30 = vadd.f32 %v4472_v36, %v4471_v37  ;;  %v4531_v31 = vadd.f32 %v4530_v11, %v4529_v28  ;;  %v182_v36 = vld [vmem:[%s6974_s0 + $0x508] sm:$0xff] }
 0x166   :  { %v4474_v32 = vpop.f32.mrf.mxu1  ;;  %v4532_v34 = vpop.f32.mrf.mxu0 }
 0x167   :  { %v2957_v49 = vadd.f32 %v4473_v30, %v6519_v5 }
 0x168   :  { %v4475_v23 = vpop.f32.mrf.mxu1  ;;  %v4533_v3 = vpop.f32.mrf.mxu0 }
 0x169   :  { %v6650_v42 = vadd.f32 %v4531_v31, %v2957_v49  ;;  %v4476_v43 = vadd.f32 %v4475_v23, %v4474_v32  ;;  %v4534_v13 = vadd.f32 %v4533_v3, %v4532_v34  ;;  %v4020_v49 = vcombine.high %v182_v36, %v182_v36 }
 0x16a   :  { %v4477_v44 = vpop.f32.mrf.mxu1  ;;  %3635 = vmatmul.mubr.bf16.gmra.mxu1 %v5436_v35  ;;  %v4535_v39 = vpop.f32.mrf.mxu0  ;;  %4975 = vmatmul.mubr.msk.bf16.gmra.mxu0 %vm2596_vm1, %v5439_v48  ;;  %v5451_v35 = vld [vmem:[%s6974_s0 + $0x448] ss:$100 sps:$4 sm:$0xff]  }
 0x16b   :  { %v2960_v45 = vadd.f32 %v4476_v43, %v6529_v17  ;;  %3642 = vmatprep.mubr.bf16.mxu1 %v5442_v40  ;;  %4978 = vmatprep.mubr.msk.bf16.mxu0 %vm5456_vm0, %v5455_v57  ;;  %v5443_v17 = vld [vmem:[%s6974_s0 + $0x2b8] ss:$100 sps:$4 sm:$0xff]  }
 0x16c   :  { %v4478_v5 = vpop.f32.mrf.mxu1  ;;  %v4536_v61 = vpop.f32.mrf.mxu0 }
 0x16d   :  { %v6656_v52 = vadd.f32 %v4534_v13, %v2960_v45  ;;  %v4479_v53 = vadd.f32 %v4478_v5, %v4477_v44  ;;  %v4537_v14 = vadd.f32 %v4536_v61, %v4535_v39 }
 0x16e   :  { %v4480_v54 = vpop.f32.mrf.mxu1  ;;  %v4538_v51 = vpop.f32.mrf.mxu0 }
 0x16f   :  { %v2965_v58 = vadd.f32 %v4479_v53, %v6549_v33 }
 0x170   :  { %v4481_v60 = vpop.f32.mrf.mxu1  ;;  %v4539_v7 = vpop.f32.mrf.mxu0 }
 0x171   :  { %v6668_v62 = vadd.f32 %v4537_v14, %v2965_v58 }
 0x172   :  { %v4557_v63 = vpop.f32.mrf.mxu1  ;;  %3643 = vmatmul.mubr.bf16.gmra.mxu1 %v5440_v56  ;;  %v4615_v0 = vpop.f32.mrf.mxu0  ;;  %4979 = vmatmul.mubr.msk.bf16.gmra.mxu0 %vm2596_vm1, %v5443_v17  ;;  %v4019_v56 = vcombine.low %v182_v36, %v182_v36  ;;  %v5454_v17 = vld [vmem:[%s6974_s0 + $0x510] ss:$0 sps:$4 sm:$0xff]  }
 0x173   :  { %3650 = vmatprep.mubr.bf16.mxu1 %v5446_v27  ;;  %4982 = vmatprep.mubr.msk.bf16.mxu0 %vm5456_vm0, %v5455_v57 }
 0x174   :  { %v4558_v6 = vpop.f32.mrf.mxu1  ;;  %v4616_v1 = vpop.f32.mrf.mxu0 }
 0x175   :  { %v4559_v33 = vadd.f32 %v4558_v6, %v4557_v63  ;;  %v4617_v8 = vadd.f32 %v4616_v1, %v4615_v0 }
 0x176   :  { %v4560_v10 = vpop.f32.mrf.mxu1  ;;  %v4618_v59 = vpop.f32.mrf.mxu0 }
 0x177   :  { %v3093_v12 = vadd.f32 %v4559_v33, %v6570_v55 }
 0x178   :  { %v4561_v15 = vpop.f32.mrf.mxu1  ;;  %v4619_v38 = vpop.f32.mrf.mxu0 }
 0x179   :  { %v6683_v16 = vadd.f32 %v4617_v8, %v3093_v12  ;;  %v4562_v21 = vadd.f32 %v4561_v15, %v4560_v10  ;;  %v4620_v2 = vadd.f32 %v4619_v38, %v4618_v59 }
 0x17a   :  { %v4563_v25 = vpop.f32.mrf.mxu1  ;;  %3651 = vmatmul.mubr.bf16.gmra.mxu1 %v5444_v26  ;;  %v4621_v37 = vpop.f32.mrf.mxu0  ;;  %4983 = vmatmul.mubr.msk.bf16.gmra.mxu0 %vm2596_vm1, %v5447_v19 }
 0x17b   :  { %v3096_v28 = vadd.f32 %v4562_v21, %v6579_v4  ;;  %3658 = vmatprep.mubr.bf16.mxu1 %v5450_v20  ;;  %4986 = vmatprep.mubr.msk.bf16.mxu0 %vm5456_vm0, %v5455_v57  ;;  %v5448_v4 = vld [vmem:[%s6974_s0 + $0x440] ss:$100 sps:$4 sm:$0xff]  }
 0x17c   :  { %v4564_v55 = vpop.f32.mrf.mxu1  ;;  %v4622_v50 = vpop.f32.mrf.mxu0 }
 0x17d   :  { %v6692_v11 = vadd.f32 %v4620_v2, %v3096_v28  ;;  %v4565_v30 = vadd.f32 %v4564_v55, %v4563_v25  ;;  %v4623_v31 = vadd.f32 %v4622_v50, %v4621_v37 }
 0x17e   :  { %v4566_v32 = vpop.f32.mrf.mxu1  ;;  %v4624_v34 = vpop.f32.mrf.mxu0 }
 0x17f   :  { %v3101_v48 = vadd.f32 %v4565_v30, %v6588_v18 }
 0x180   :  { %v4567_v40 = vpop.f32.mrf.mxu1  ;;  %v4625_v23 = vpop.f32.mrf.mxu0 }
 0x181   :  { %v6701_v3 = vadd.f32 %v4623_v31, %v3101_v48  ;;  %v4568_v43 = vadd.f32 %v4567_v40, %v4566_v32  ;;  %v4626_v13 = vadd.f32 %v4625_v23, %v4624_v34 }
 0x182   :  { %v4569_v44 = vpop.f32.mrf.mxu1  ;;  %3659 = vmatmul.mubr.bf16.gmra.mxu1 %v5448_v4  ;;  %v4627_v39 = vpop.f32.mrf.mxu0  ;;  %4987 = vmatmul.mubr.msk.bf16.gmra.mxu0 %vm2596_vm1, %v5451_v35 }
 0x183   :  { %v3104_v45 = vadd.f32 %v4568_v43, %v6591_v24  ;;  %3666 = vmatprep.mubr.bf16.mxu1 %v4020_v49  ;;  %4990 = vmatprep.mubr.msk.bf16.mxu0 %vm5456_vm0, %v5455_v57 }
 0x184   :  { %v4570_v5 = vpop.f32.mrf.mxu1  ;;  %v4628_v18 = vpop.f32.mrf.mxu0 }
 0x185   :  { %v6707_v61 = vadd.f32 %v4626_v13, %v3104_v45  ;;  %v4571_v53 = vadd.f32 %v4570_v5, %v4569_v44  ;;  %v4629_v14 = vadd.f32 %v4628_v18, %v4627_v39 }
 0x186   :  { %v4572_v54 = vpop.f32.mrf.mxu1  ;;  %v4630_v51 = vpop.f32.mrf.mxu0 }
 0x187   :  { %v3109_v58 = vadd.f32 %v4571_v53, %v6597_v41 }
 0x188   :  { %v4573_v24 = vpop.f32.mrf.mxu1  ;;  %v4631_v27 = vpop.f32.mrf.mxu0 }
 0x189   :  { %v6713_v60 = vadd.f32 %v4629_v14, %v3109_v58  ;;  %v4574_v57 = vadd.f32 %v4573_v24, %v4572_v54  ;;  %v4632_v7 = vadd.f32 %v4631_v27, %v4630_v51 }
 0x18a   :  { %v4575_v63 = vpop.f32.mrf.mxu1  ;;  %3667 = vmatmul.mubr.bf16.gmra.mxu1 %v4019_v56  ;;  %v4633_v0 = vpop.f32.mrf.mxu0  ;;  %4991 = vmatmul.mubr.msk.bf16.gmra.mxu0 %vm2596_vm1, %v5454_v17 }
 0x18b   :  { %v3112_v6 = vadd.f32 %v4574_v57, %v6602_v47 }
 0x18c   :  { %v4576_v1 = vpop.f32.mrf.mxu1  ;;  %v4634_v33 = vpop.f32.mrf.mxu0 }
 0x18d   :  { %v6717_v8 = vadd.f32 %v4632_v7, %v3112_v6  ;;  %v4577_v10 = vadd.f32 %v4576_v1, %v4575_v63  ;;  %v4635_v59 = vadd.f32 %v4634_v33, %v4633_v0 }
 0x18e   :  { %v4578_v41 = vpop.f32.mrf.mxu1  ;;  %v4636_v26 = vpop.f32.mrf.mxu0 }
 0x18f   :  { %v3117_v19 = vadd.f32 %v4577_v10, %v6614_v46 }
 0x190   :  { %v4579_v12 = vpop.f32.mrf.mxu1  ;;  %v4637_v20 = vpop.f32.mrf.mxu0 }
 0x191   :  { %v6720_v15 = vadd.f32 %v4635_v59, %v3117_v19  ;;  %v4580_v38 = vadd.f32 %v4579_v12, %v4578_v41  ;;  %v4638_v21 = vadd.f32 %v4637_v20, %v4636_v26 }
 0x192   :  { %v4581_v2 = vpop.f32.mrf.mxu1  ;;  %v4639_v25 = vpop.f32.mrf.mxu0 }
 0x193   :  { %v3120_v47 = vadd.f32 %v4580_v38, %v6620_v9 }
 0x194   :  { %v4582_v37 = vpop.f32.mrf.mxu1  ;;  %v4640_v28 = vpop.f32.mrf.mxu0 }
 0x195   :  { %v6723_v55 = vadd.f32 %v4638_v21, %v3120_v47  ;;  %v4583_v50 = vadd.f32 %v4582_v37, %v4581_v2  ;;  %v4641_v36 = vadd.f32 %v4640_v28, %v4639_v25 }
 0x196   :  { %v4584_v30 = vpop.f32.mrf.mxu1  ;;  %v4642_v31 = vpop.f32.mrf.mxu0 }
 0x197   :  { %v3125_v46 = vadd.f32 %v4583_v50, %v6632_v22 }
 0x198   :  { %v4585_v32 = vpop.f32.mrf.mxu1  ;;  %v4643_v34 = vpop.f32.mrf.mxu0 }
 0x199   :  { %v6726_v4 = vadd.f32 %v4641_v36, %v3125_v46  ;;  %v4586_v35 = vadd.f32 %v4585_v32, %v4584_v30  ;;  %v4644_v48 = vadd.f32 %v4643_v34, %v4642_v31 }
 0x19a   :  { %v4587_v49 = vpop.f32.mrf.mxu1  ;;  %v4645_v40 = vpop.f32.mrf.mxu0 }
 0x19b   :  { %v3128_v9 = vadd.f32 %v4586_v35, %v6638_v29 }
 0x19c   :  { %v4588_v23 = vpop.f32.mrf.mxu1  ;;  %v4646_v43 = vpop.f32.mrf.mxu0 }
 0x19d   :  { %v6729_v13 = vadd.f32 %v4644_v48, %v3128_v9  ;;  %v4589_v44 = vadd.f32 %v4588_v23, %v4587_v49  ;;  %v4647_v39 = vadd.f32 %v4646_v43, %v4645_v40 }
 0x19e   :  { %v4590_v45 = vpop.f32.mrf.mxu1  ;;  %v4648_v5 = vpop.f32.mrf.mxu0 }
 0x19f   :  { %v3133_v22 = vadd.f32 %v4589_v44, %v6650_v42 }
 0x1a0   :  { %v4591_v18 = vpop.f32.mrf.mxu1  ;;  %v4649_v53 = vpop.f32.mrf.mxu0 }
 0x1a1   :  { %v6732_v14 = vadd.f32 %v4647_v39, %v3133_v22  ;;  %v4592_v54 = vadd.f32 %v4591_v18, %v4590_v45  ;;  %v4650_v51 = vadd.f32 %v4649_v53, %v4648_v5 }
 0x1a2   :  { %v4593_v56 = vpop.f32.mrf.mxu1  ;;  %v4651_v17 = vpop.f32.mrf.mxu0 }
 0x1a3   :  { %v3136_v29 = vadd.f32 %v4592_v54, %v6656_v52 }
 0x1a4   :  { %v4594_v58 = vpop.f32.mrf.mxu1  ;;  %v4652_v24 = vpop.f32.mrf.mxu0 }
 0x1a5   :  { %v6735_v27 = vadd.f32 %v4650_v51, %v3136_v29  ;;  %v4595_v57 = vadd.f32 %v4594_v58, %v4593_v56  ;;  %v4653_v7 = vadd.f32 %v4652_v24, %v4651_v17 }
 0x1a6   :  { %v4596_v63 = vpop.f32.mrf.mxu1  ;;  %v4654_v0 = vpop.f32.mrf.mxu0 }
 0x1a7   :  { %v3141_v42 = vadd.f32 %v4595_v57, %v6668_v62 }
 0x1a8   :  { %v4597_v6 = vpop.f32.mrf.mxu1  ;;  %v4655_v1 = vpop.f32.mrf.mxu0 }
 0x1a9   :  { %v6738_v33 = vadd.f32 %v4653_v7, %v3141_v42 }
 0x1aa   :  { %v4673_v10 = vpop.f32.mrf.mxu1  ;;  %v4731_v59 = vpop.f32.mrf.mxu0 }
 0x1ac   :  { %v4674_v41 = vpop.f32.mrf.mxu1  ;;  %v4732_v26 = vpop.f32.mrf.mxu0 }
 0x1ad   :  { %v4675_v19 = vadd.f32 %v4674_v41, %v4673_v10  ;;  %v4733_v52 = vadd.f32 %v4732_v26, %v4731_v59 }
 0x1ae   :  { %v4676_v12 = vpop.f32.mrf.mxu1  ;;  %v4734_v20 = vpop.f32.mrf.mxu0 }
 0x1af   :  { %v3269_v38 = vadd.f32 %v4675_v19, %v6683_v16 }
 0x1b0   :  { %v4677_v21 = vpop.f32.mrf.mxu1  ;;  %v4735_v2 = vpop.f32.mrf.mxu0 }
 0x1b1   :  { %v6741_v25 = vadd.f32 %v4733_v52, %v3269_v38  ;;  %v4678_v47 = vadd.f32 %v4677_v21, %v4676_v12  ;;  %v4736_v62 = vadd.f32 %v4735_v2, %v4734_v20 }
 0x1b2   :  { %v4679_v37 = vpop.f32.mrf.mxu1  ;;  %v4737_v28 = vpop.f32.mrf.mxu0 }
 0x1b3   :  { %v3272_v50 = vadd.f32 %v4678_v47, %v6692_v11 }
 0x1b4   :  { %v4680_v36 = vpop.f32.mrf.mxu1  ;;  %v4738_v30 = vpop.f32.mrf.mxu0 }
 0x1b5   :  { %v6744_v31 = vadd.f32 %v4736_v62, %v3272_v50  ;;  %v4681_v46 = vadd.f32 %v4680_v36, %v4679_v37  ;;  %v4739_v32 = vadd.f32 %v4738_v30, %v4737_v28 }
 0x1b6   :  { %v4682_v34 = vpop.f32.mrf.mxu1  ;;  %v4740_v35 = vpop.f32.mrf.mxu0 }
 0x1b7   :  { %v3277_v16 = vadd.f32 %v4681_v46, %v6701_v3 }
 0x1b8   :  { %v4683_v48 = vpop.f32.mrf.mxu1  ;;  %v4741_v49 = vpop.f32.mrf.mxu0 }
 0x1b9   :  { %v6747_v40 = vadd.f32 %v4739_v32, %v3277_v16  ;;  %v4684_v9 = vadd.f32 %v4683_v48, %v4682_v34  ;;  %v4742_v23 = vadd.f32 %v4741_v49, %v4740_v35 }
 0x1ba   :  { %v4685_v43 = vpop.f32.mrf.mxu1  ;;  %v4743_v44 = vpop.f32.mrf.mxu0 }
 0x1bb   :  { %v3280_v11 = vadd.f32 %v4684_v9, %v6707_v61 }
 0x1bc   :  { %v4686_v39 = vpop.f32.mrf.mxu1  ;;  %v4744_v45 = vpop.f32.mrf.mxu0 }
 0x1bd   :  { %v6750_v5 = vadd.f32 %v4742_v23, %v3280_v11  ;;  %v4687_v22 = vadd.f32 %v4686_v39, %v4685_v43  ;;  %v4745_v18 = vadd.f32 %v4744_v45, %v4743_v44 }
 0x1be   :  { %v4688_v53 = vpop.f32.mrf.mxu1  ;;  %v4746_v54 = vpop.f32.mrf.mxu0 }
 0x1bf   :  { %v3285_v3 = vadd.f32 %v4687_v22, %v6713_v60 }
 0x1c0   :  { %v4689_v51 = vpop.f32.mrf.mxu1  ;;  %v4747_v56 = vpop.f32.mrf.mxu0 }
 0x1c1   :  { %v6753_v17 = vadd.f32 %v4745_v18, %v3285_v3  ;;  %v4690_v29 = vadd.f32 %v4689_v51, %v4688_v53  ;;  %v4748_v58 = vadd.f32 %v4747_v56, %v4746_v54 }
 0x1c2   :  { %v4691_v24 = vpop.f32.mrf.mxu1  ;;  %v4749_v57 = vpop.f32.mrf.mxu0 }
 0x1c3   :  { %v3288_v61 = vadd.f32 %v4690_v29, %v6717_v8 }
 0x1c4   :  { %v4692_v7 = vpop.f32.mrf.mxu1  ;;  %v4750_v63 = vpop.f32.mrf.mxu0 }
 0x1c5   :  { %v6756_v0 = vadd.f32 %v4748_v58, %v3288_v61  ;;  %v4693_v42 = vadd.f32 %v4692_v7, %v4691_v24  ;;  %v4751_v6 = vadd.f32 %v4750_v63, %v4749_v57 }
 0x1c6   :  { %v4694_v1 = vpop.f32.mrf.mxu1  ;;  %v4752_v10 = vpop.f32.mrf.mxu0 }
 0x1c7   :  { %v3293_v60 = vadd.f32 %v4693_v42, %v6720_v15 }
 0x1c8   :  { %v4695_v59 = vpop.f32.mrf.mxu1  ;;  %v4753_v41 = vpop.f32.mrf.mxu0 }
 0x1c9   :  { %v6759_v26 = vadd.f32 %v4751_v6, %v3293_v60  ;;  %v4696_v19 = vadd.f32 %v4695_v59, %v4694_v1  ;;  %v4754_v52 = vadd.f32 %v4753_v41, %v4752_v10 }
 0x1ca   :  { %v4697_v12 = vpop.f32.mrf.mxu1  ;;  %v4755_v20 = vpop.f32.mrf.mxu0 }
 0x1cb   :  { %v3296_v8 = vadd.f32 %v4696_v19, %v6723_v55 }
 0x1cc   :  { %v4698_v38 = vpop.f32.mrf.mxu1  ;;  %v4756_v21 = vpop.f32.mrf.mxu0 }
 0x1cd   :  { %v6762_v2 = vadd.f32 %v4754_v52, %v3296_v8  ;;  %v4699_v47 = vadd.f32 %v4698_v38, %v4697_v12  ;;  %v4757_v62 = vadd.f32 %v4756_v21, %v4755_v20 }
 0x1ce   :  { %v4700_v37 = vpop.f32.mrf.mxu1  ;;  %v4758_v28 = vpop.f32.mrf.mxu0 }
 0x1cf   :  { %v3301_v15 = vadd.f32 %v4699_v47, %v6726_v4 }
 0x1d0   :  { %v4701_v50 = vpop.f32.mrf.mxu1  ;;  %v4759_v36 = vpop.f32.mrf.mxu0 }
 0x1d1   :  { %v6765_v30 = vadd.f32 %v4757_v62, %v3301_v15  ;;  %v4702_v46 = vadd.f32 %v4701_v50, %v4700_v37  ;;  %v4760_v32 = vadd.f32 %v4759_v36, %v4758_v28 }
 0x1d2   :  { %v4703_v34 = vpop.f32.mrf.mxu1  ;;  %v4761_v35 = vpop.f32.mrf.mxu0 }
 0x1d3   :  { %v3304_v55 = vadd.f32 %v4702_v46, %v6729_v13 }
 0x1d4   :  { %v4704_v16 = vpop.f32.mrf.mxu1  ;;  %v4762_v48 = vpop.f32.mrf.mxu0 }
 0x1d5   :  { %v6768_v49 = vadd.f32 %v4760_v32, %v3304_v55  ;;  %v4705_v9 = vadd.f32 %v4704_v16, %v4703_v34  ;;  %v4763_v23 = vadd.f32 %v4762_v48, %v4761_v35 }
 0x1d6   :  { %v4706_v43 = vpop.f32.mrf.mxu1  ;;  %v4764_v44 = vpop.f32.mrf.mxu0 }
 0x1d7   :  { %6977 = vst [vmem:[#allocation2_spill] sm:$0xff] %v6768_v49  ;;  %v3309_v4 = vadd.f32 %v4705_v9, %v6732_v14 }
 0x1d8   :  { %v4707_v11 = vpop.f32.mrf.mxu1  ;;  %v4765_v39 = vpop.f32.mrf.mxu0 }
 0x1d9   :  { %v6771_v45 = vadd.f32 %v4763_v23, %v3309_v4  ;;  %v4708_v22 = vadd.f32 %v4707_v11, %v4706_v43  ;;  %v4766_v18 = vadd.f32 %v4765_v39, %v4764_v44 }
 0x1da   :  { %v4709_v53 = vpop.f32.mrf.mxu1  ;;  %v4767_v54 = vpop.f32.mrf.mxu0 }
 0x1db   :  { %6978 = vst [vmem:[#allocation3_spill] sm:$0xff] %v6771_v45  ;;  %v3312_v13 = vadd.f32 %v4708_v22, %v6735_v27 }
 0x1dc   :  { %v4710_v3 = vpop.f32.mrf.mxu1  ;;  %v4768_v51 = vpop.f32.mrf.mxu0 }
 0x1dd   :  { %v6774_v56 = vadd.f32 %v4766_v18, %v3312_v13  ;;  %v4711_v29 = vadd.f32 %v4710_v3, %v4709_v53  ;;  %v4769_v58 = vadd.f32 %v4768_v51, %v4767_v54 }
 0x1de   :  { %v4712_v24 = vpop.f32.mrf.mxu1  ;;  %v4770_v57 = vpop.f32.mrf.mxu0 }
 0x1df   :  { %6979 = vst [vmem:[#allocation4_spill] sm:$0xff] %v6774_v56  ;;  %v3317_v14 = vadd.f32 %v4711_v29, %v6738_v33 }
 0x1e0   :  { %v4713_v61 = vpop.f32.mrf.mxu1  ;;  %v4771_v7 = vpop.f32.mrf.mxu0 }
 0x1e1   :  { %v6777_v63 = vadd.f32 %v4769_v58, %v3317_v14 }
 0x1e2   :  { %v4789_v42 = vpop.f32.mrf.mxu1  ;;  %v4847_v6 = vpop.f32.mrf.mxu0 }
 0x1e3   :  { %6980 = vst [vmem:[#allocation5_spill] sm:$0xff] %v6777_v63 }
 0x1e4   :  { %v4790_v1 = vpop.f32.mrf.mxu1  ;;  %v4848_v10 = vpop.f32.mrf.mxu0 }
 0x1e5   :  { %v4791_v56 = vadd.f32 %v4790_v1, %v4789_v42 }
 0x1e6   :  { %v4792_v60 = vpop.f32.mrf.mxu1  ;;  %v6779_v27 = vpop.f32.mrf.mxu0 }
 0x1e8   :  { %v4793_v59 = vpop.f32.mrf.mxu1  ;;  %v6781_v41 = vpop.f32.mrf.mxu0 }
 0x1ea   :  { %v4795_v19 = vpop.f32.mrf.mxu1  ;;  %v6783_v52 = vpop.f32.mrf.mxu0 }
 0x1ec   :  { %v4796_v12 = vpop.f32.mrf.mxu1  ;;  %v4854_v20 = vpop.f32.mrf.mxu0 }
 0x1ee   :  { %v6785_v33 = vpop.f32.mrf.mxu1  ;;  %v6787_v8 = vpop.f32.mrf.mxu0 }
 0x1f0   :  { %v6789_v38 = vpop.f32.mrf.mxu1  ;;  %v6791_v21 = vpop.f32.mrf.mxu0 }
 0x1f2   :  { %v6793_v47 = vpop.f32.mrf.mxu1  ;;  %v6795_v62 = vpop.f32.mrf.mxu0 }
 0x1f4   :  { %v6797_v37 = vpop.f32.mrf.mxu1  ;;  %v6799_v28 = vpop.f32.mrf.mxu0 }
 0x1f6   :  { %v6801_v15 = vpop.f32.mrf.mxu1  ;;  %v6803_v50 = vpop.f32.mrf.mxu0 }
 0x1f8   :  { %v6805_v36 = vpop.f32.mrf.mxu1  ;;  %v6807_v46 = vpop.f32.mrf.mxu0 }
 0x1fa   :  { %v6809_v32 = vpop.f32.mrf.mxu1  ;;  %v6811_v34 = vpop.f32.mrf.mxu0 }
 0x1fc   :  { %v6813_v35 = vpop.f32.mrf.mxu1  ;;  %v6815_v55 = vpop.f32.mrf.mxu0 }
 0x1fe   :  { %v6817_v16 = vpop.f32.mrf.mxu1  ;;  %v6819_v48 = vpop.f32.mrf.mxu0 }
 0x200   :  { %v6821_v9 = vpop.f32.mrf.mxu1  ;;  %v6823_v23 = vpop.f32.mrf.mxu0 }
 0x202   :  { %v6825_v43 = vpop.f32.mrf.mxu1  ;;  %v6827_v44 = vpop.f32.mrf.mxu0 }
 0x204   :  { %v6829_v4 = vpop.f32.mrf.mxu1  ;;  %v6831_v11 = vpop.f32.mrf.mxu0 }
 0x206   :  { %v6833_v39 = vpop.f32.mrf.mxu1  ;;  %v6835_v22 = vpop.f32.mrf.mxu0 }
 0x207   :  { %6981 = vst [vmem:[#allocation6_spill] sm:$0xff] %v6835_v22  ;;  %v4794_v22 = vadd.f32 %v4793_v59, %v4792_v60  ;;  %v4800_v60 = vadd.f32 %v6789_v38, %v6785_v33 }
 0x208   :  { %v6837_v18 = vpop.f32.mrf.mxu1  ;;  %v6839_v53 = vpop.f32.mrf.mxu0 }
 0x209   :  { %6982 = vst [vmem:[#allocation7_spill] sm:$0xff] %v6837_v18  ;;  %6983 = vst [vmem:[#allocation8_spill] sm:$0xff] %v6839_v53 }
 0x20a   :  { %v6841_v54 = vpop.f32.mrf.mxu1  ;;  %v6843_v13 = vpop.f32.mrf.mxu0 }
 0x20b   :  { %6984 = vst [vmem:[#allocation9_spill] sm:$0xff] %v6841_v54  ;;  %6985 = vst [vmem:[#allocation10_spill] sm:$0xff] %v6843_v13 }
 0x20c   :  { %v6845_v3 = vpop.f32.mrf.mxu1  ;;  %v6847_v51 = vpop.f32.mrf.mxu0 }
 0x20d   :  { %6986 = vst [vmem:[#allocation11_spill] sm:$0xff] %v6845_v3  ;;  %6987 = vst [vmem:[#allocation12_spill] sm:$0xff] %v6847_v51 }
 0x20e   :  { %v6849_v29 = vpop.f32.mrf.mxu1  ;;  %v6851_v58 = vpop.f32.mrf.mxu0 }
 0x20f   :  { %6988 = vst [vmem:[#allocation13_spill] sm:$0xff] %v6849_v29  ;;  %6989 = vst [vmem:[#allocation14_spill] sm:$0xff] %v6851_v58  ;;  %v3445_v29 = vadd.f32 %v4791_v56, %v6741_v25  ;;  %v4849_v58 = vadd.f32 %v4848_v10, %v4847_v6  ;;  %v4855_v25 = vadd.f32 %v4854_v20, %v6783_v52 }
 0x210   :  { %v6853_v24 = vpop.f32.mrf.mxu1  ;;  %v6855_v57 = vpop.f32.mrf.mxu0  ;;  %v3456_v52 = vadd.f32 %v4800_v60, %v6750_v5  ;;  %v4861_v5 = vadd.f32 %v6799_v28, %v6795_v62 }
 0x211   :  { %6990 = vst [vmem:[#allocation15_spill] sm:$0xff] %v6853_v24  ;;  %6991 = vst [vmem:[#allocation16_spill] sm:$0xff] %v6855_v57  ;;  %v4797_v57 = vadd.f32 %v4796_v12, %v4795_v19  ;;  %v3533_v54 = vadd.f32 %v4849_v58, %v3445_v29 }
 0x212   :  { %v6857_v14 = vpop.f32.mrf.mxu1  ;;  %v6859_v61 = vpop.f32.mrf.mxu0 }
 0x213   :  { %6992 = vst [vmem:[#allocation17_spill] sm:$0xff] %v6857_v14  ;;  %6993 = vst [vmem:[#allocation18_spill] sm:$0xff] %v6859_v61  ;;  %v3448_v61 = vadd.f32 %v4794_v22, %v6744_v31  ;;  %v3453_v1 = vadd.f32 %v4797_v57, %v6747_v40 }
 0x214   :  { %v6861_v7 = vpop.f32.mrf.mxu1  ;;  %v6863_v63 = vpop.f32.mrf.mxu0 }
 0x215   :  { %6994 = vst [vmem:[#allocation19_spill] sm:$0xff] %v6861_v7  ;;  %6995 = vst [vmem:[#allocation20_spill] sm:$0xff] %v6863_v63 }
 0x216   :  { %v4828_v13 = vpop.f32.mrf.mxu1  ;;  %v4886_v45 = vpop.f32.mrf.mxu0 }
 0x217   :  { %v4852_v45 = vadd.f32 %v6781_v41, %v6779_v27  ;;  %v3541_v13 = vadd.f32 %v4855_v25, %v3453_v1  ;;  %v4803_v27 = vadd.f32 %v6797_v37, %v6793_v47  ;;  %v4864_v25 = vadd.f32 %v6807_v46, %v6803_v50 }
 0x218   :  { %v4829_v51 = vpop.f32.mrf.mxu1  ;;  %v4887_v53 = vpop.f32.mrf.mxu0 }
 0x219   :  { %v3536_v10 = vadd.f32 %v4852_v45, %v3448_v61  ;;  %v3461_v37 = vadd.f32 %v4803_v27, %v6753_v17 }
 0x21a   :  { %v4905_v24 = vpop.f32.mrf.mxu1  ;;  %v3708_v49 = vpop.f32.mrf.mxu0 }
 0x21c   :  { %v4906_v3 = vpop.f32.mrf.mxu1  ;;  %v4968_v14 = vpop.f32.mrf.mxu0 }
 0x21d   :  { %v4907_v7 = vadd.f32 %v4906_v3, %v4905_v24 }
 0x21e   :  { %v4908_v18 = vpop.f32.mrf.mxu1  ;;  %v3711_v63 = vpop.f32.mrf.mxu0 }
 0x21f   :  { %v3621_v42 = vadd.f32 %v4907_v7, %v3533_v54  ;;  %v3549_v7 = vadd.f32 %v4861_v5, %v3461_v37 }
 0x220   :  { %v4909_v56 = vpop.f32.mrf.mxu1  ;;  %v4969_v6 = vpop.f32.mrf.mxu0 }
 0x221   :  { %v3709_v59 = vadd.f32 %v3708_v49, %v3621_v42  ;;  %v4910_v19 = vadd.f32 %v4909_v56, %v4908_v18  ;;  %v4858_v49 = vadd.f32 %v6791_v21, %v6787_v8 }
 0x222   :  { %v4911_v31 = vpop.f32.mrf.mxu1  ;;  %v3716_v12 = vpop.f32.mrf.mxu0 }
 0x223   :  { %v3762_v22 = vmax.f32 %v3709_v59, 0.0  ;;  %v3624_v53 = vadd.f32 %v4910_v19, %v3536_v10  ;;  %v3544_v58 = vadd.f32 %v4858_v49, %v3456_v52  ;;  %v4867_v59 = vadd.f32 %v6815_v55, %v6811_v34 }
 0x224   :  { %v4912_v40 = vpop.f32.mrf.mxu1  ;;  %v4972_v41 = vpop.f32.mrf.mxu0  ;;  %v4815_v55 = vadd.f32 %v6829_v4, %v6825_v43  ;;  %v4873_v4 = vadd.f32 %v6831_v11, %v6827_v44  ;;  %v6998_v44 = vld [vmem:[#allocation11_spill] sm:$0xff] }
 0x225   :  { %v4238_v20 = vpack.c.bf16 %v3762_v22, %v3762_v22  ;;  %v3712_v54 = vadd.f32 %v3711_v63, %v3624_v53  ;;  %v4913_v3 = vadd.f32 %v4912_v40, %v4911_v31  ;;  %v4806_v63 = vadd.f32 %v6805_v36, %v6801_v15 }
 0x226   :  { %v4914_v51 = vpop.f32.mrf.mxu1  ;;  %v3719_v33 = vpop.f32.mrf.mxu0  ;;  %v4809_v36 = vadd.f32 %v6813_v35, %v6809_v32  ;;  %v4812_v32 = vadd.f32 %v6821_v9, %v6817_v16  ;;  %v3477_v43 = vadd.f32 %v4815_v55, %v6765_v30 }
 0x227   :  { %3829 = vst.msk [vmem:[%s6976_s3] sm:$0xf] %vm3828_vm2, %v4238_v20  ;;  %v3763_v38 = vmax.f32 %v3712_v54, 0.0  ;;  %v3629_v47 = vadd.f32 %v4913_v3, %v3541_v13  ;;  %v3464_v62 = vadd.f32 %v4806_v63, %v6756_v0  ;;  %v4870_v20 = vadd.f32 %v6823_v23, %v6819_v48 }
 0x228   :  { %v4915_v18 = vpop.f32.mrf.mxu1  ;;  %v4973_v29 = vpop.f32.mrf.mxu0  ;;  %v3469_v50 = vadd.f32 %v4809_v36, %v6759_v26  ;;  %v3472_v34 = vadd.f32 %v4812_v32, %v6762_v2 }
 0x229   :  { %v4239_v24 = vpack.c.bf16 %v3763_v38, %v3763_v38  ;;  %v3717_v8 = vadd.f32 %v3716_v12, %v3629_v47  ;;  %v4916_v21 = vadd.f32 %v4915_v18, %v4914_v51  ;;  %v3552_v60 = vadd.f32 %v4864_v25, %v3464_v62  ;;  %v6996_v47 = vld [vmem:[#allocation7_spill] sm:$0xff] }
 0x22a   :  { %v4917_v57 = vpop.f32.mrf.mxu1  ;;  %v3724_v14 = vpop.f32.mrf.mxu0  ;;  %v3557_v26 = vadd.f32 %v4867_v59, %v3469_v50  ;;  %v4818_v48 = vadd.f32 %v6996_v47, %v6833_v39  ;;  %v7012_v47 = vld [vmem:[#allocation18_spill] sm:$0xff] }
 0x22b   :  { %3830 = vst.msk [vmem:[%s6976_s3 + $0x4] sm:$0xf] %vm3828_vm2, %v4239_v24  ;;  %v3764_v17 = vmax.f32 %v3717_v8, 0.0  ;;  %v3632_v61 = vadd.f32 %v4916_v21, %v3544_v58  ;;  %v3565_v58 = vadd.f32 %v4873_v4, %v3477_v43  ;;  %v6997_v24 = vld [vmem:[#allocation9_spill] sm:$0xff] }
 0x22c   :  { %v4918_v28 = vpop.f32.mrf.mxu1  ;;  %v4976_v15 = vpop.f32.mrf.mxu0  ;;  %v4821_v11 = vadd.f32 %v6998_v44, %v6997_v24 }
 0x22d   :  { %v4240_v45 = vpack.c.bf16 %v3764_v17, %v3764_v17  ;;  %v3720_v42 = vadd.f32 %v3719_v33, %v3632_v61  ;;  %v4919_v1 = vadd.f32 %v4918_v28, %v4917_v57  ;;  %v3560_v33 = vadd.f32 %v4870_v20, %v3472_v34  ;;  %v6999_v57 = vld [vmem:[#allocation2_spill] sm:$0xff]  ;;  %v7001_v15 = vld [vmem:[#allocation8_spill] sm:$0xff] }
 0x22e   :  { %v4920_v56 = vpop.f32.mrf.mxu1  ;;  %v3727_v6 = vpop.f32.mrf.mxu0  ;;  %v3480_v39 = vadd.f32 %v4818_v48, %v6999_v57  ;;  %v7000_v28 = vld [vmem:[#allocation6_spill] sm:$0xff]  ;;  %v7007_v34 = vld [vmem:[#allocation4_spill] sm:$0xff] }
 0x22f   :  { %3831 = vst.msk [vmem:[%s6976_s3 + $0x8] sm:$0xf] %vm3828_vm2, %v4240_v45  ;;  %v3765_v10 = vmax.f32 %v3720_v42, 0.0  ;;  %v3637_v0 = vadd.f32 %v4919_v1, %v3549_v7  ;;  %v4876_v36 = vadd.f32 %v7001_v15, %v7000_v28  ;;  %v7002_v1 = vld [vmem:[#allocation3_spill] sm:$0xff]  ;;  %v7013_v48 = vld [vmem:[#allocation20_spill] sm:$0xff] }
 0x230   :  { %v4921_v35 = vpop.f32.mrf.mxu1  ;;  %v4977_v19 = vpop.f32.mrf.mxu0  ;;  %v3485_v25 = vadd.f32 %v4821_v11, %v7002_v1 }
 0x231   :  { %v4241_v46 = vpack.c.bf16 %v3765_v10, %v3765_v10  ;;  %v3725_v31 = vadd.f32 %v3724_v14, %v3637_v0  ;;  %v4922_v12 = vadd.f32 %v4921_v35, %v4920_v56  ;;  %v7003_v56 = vld [vmem:[#allocation10_spill] sm:$0xff]  ;;  %v7005_v0 = vld [vmem:[#allocation13_spill] sm:$0xff]  ;;  %v3568_v19 = vadd.f32 %v4876_v36, %v3480_v39 }
 0x232   :  { %v4923_v22 = vpop.f32.mrf.mxu1  ;;  %v3732_v53 = vpop.f32.mrf.mxu0 }
 0x233   :  { %3832 = vst.msk [vmem:[%s6976_s3 + $0xc] sm:$0xf] %vm3828_vm2, %v4241_v46  ;;  %v3766_v13 = vmax.f32 %v3725_v31, 0.0  ;;  %v3640_v27 = vadd.f32 %v4922_v12, %v3552_v60  ;;  %v7006_v60 = vld [vmem:[#allocation15_spill] sm:$0xff] }
 0x234   :  { %v4924_v16 = vpop.f32.mrf.mxu1  ;;  %v4980_v9 = vpop.f32.mrf.mxu0  ;;  %v4824_v59 = vadd.f32 %v7006_v60, %v7005_v0 }
 0x235   :  { %v4242_v40 = vpack.c.bf16 %v3766_v13, %v3766_v13  ;;  %v3728_v41 = vadd.f32 %v3727_v6, %v3640_v27  ;;  %v4925_v52 = vadd.f32 %v4924_v16, %v4923_v22  ;;  %v7004_v6 = vld [vmem:[#allocation12_spill] sm:$0xff] }
 0x236   :  { %v4926_v54 = vpop.f32.mrf.mxu1  ;;  %v3735_v3 = vpop.f32.mrf.mxu0  ;;  %v4879_v10 = vadd.f32 %v7004_v6, %v7003_v56  ;;  %v3488_v55 = vadd.f32 %v4824_v59, %v7007_v34 }
 0x237   :  { %3833 = vst.msk [vmem:[%s6976_s3 + $0x10] sm:$0xf] %vm3828_vm2, %v4242_v40  ;;  %v3767_v2 = vmax.f32 %v3728_v41, 0.0  ;;  %v3645_v51 = vadd.f32 %v4925_v52, %v3557_v26  ;;  %v7008_v26 = vld [vmem:[#allocation17_spill] sm:$0xff]  ;;  %v7009_v40 = vld [vmem:[#allocation19_spill] sm:$0xff] }
 0x238   :  { %v4927_v49 = vpop.f32.mrf.mxu1  ;;  %v4981_v38 = vpop.f32.mrf.mxu0  ;;  %v3573_v27 = vadd.f32 %v4879_v10, %v3485_v25  ;;  %v4827_v41 = vadd.f32 %v7009_v40, %v7008_v26 }
 0x239   :  { %v4243_v23 = vpack.c.bf16 %v3767_v2, %v3767_v2  ;;  %v3733_v37 = vadd.f32 %v3732_v53, %v3645_v51  ;;  %v4928_v5 = vadd.f32 %v4927_v49, %v4926_v54  ;;  %v7011_v2 = vld [vmem:[#allocation16_spill] sm:$0xff] }
 0x23a   :  { %v4929_v63 = vpop.f32.mrf.mxu1  ;;  %v3740_v18 = vpop.f32.mrf.mxu0 }
 0x23b   :  { %3834 = vst.msk [vmem:[%s6976_s3 + $0x14] sm:$0xf] %vm3828_vm2, %v4243_v23  ;;  %v3768_v29 = vmax.f32 %v3733_v37, 0.0  ;;  %v3648_v30 = vadd.f32 %v4928_v5, %v3560_v33  ;;  %v4885_v23 = vadd.f32 %v7013_v48, %v7012_v47 }
 0x23c   :  { %v4930_v8 = vpop.f32.mrf.mxu1  ;;  %v4984_v21 = vpop.f32.mrf.mxu0 }
 0x23d   :  { %v4244_v14 = vpack.c.bf16 %v3768_v29, %v3768_v29  ;;  %v3736_v17 = vadd.f32 %v3735_v3, %v3648_v30  ;;  %v4931_v61 = vadd.f32 %v4930_v8, %v4929_v63  ;;  %v7010_v3 = vld [vmem:[#allocation14_spill] sm:$0xff]  ;;  %v7014_v63 = vld [vmem:[#allocation5_spill] sm:$0xff] }
 0x23e   :  { %v4932_v7 = vpop.f32.mrf.mxu1  ;;  %v3743_v62 = vpop.f32.mrf.mxu0  ;;  %v4882_v51 = vadd.f32 %v7011_v2, %v7010_v3 }
 0x23f   :  { %3835 = vst.msk [vmem:[%s6976_s3 + $0x18] sm:$0xf] %vm3828_vm2, %v4244_v14  ;;  %v3769_v45 = vmax.f32 %v3736_v17, 0.0  ;;  %v3653_v42 = vadd.f32 %v4931_v61, %v3565_v58 }
 0x240   :  { %v4933_v32 = vpop.f32.mrf.mxu1  ;;  %v4985_v35 = vpop.f32.mrf.mxu0  ;;  %v3576_v38 = vadd.f32 %v4882_v51, %v3488_v55 }
 0x241   :  { %v4245_v50 = vpack.c.bf16 %v3769_v45, %v3769_v45  ;;  %v3741_v46 = vadd.f32 %v3740_v18, %v3653_v42  ;;  %v4934_v31 = vadd.f32 %v4933_v32, %v4932_v7  ;;  %v3493_v18 = vadd.f32 %v4827_v41, %v7014_v63 }
 0x242   :  { %v4935_v12 = vpop.f32.mrf.mxu1  ;;  %v3748_v22 = vpop.f32.mrf.mxu0 }
 0x243   :  { %3836 = vst.msk [vmem:[%s6976_s3 + $0x1c] sm:$0xf] %vm3828_vm2, %v4245_v50  ;;  %v3770_v53 = vmax.f32 %v3741_v46, 0.0  ;;  %v3656_v13 = vadd.f32 %v4934_v31, %v3568_v19  ;;  %v3581_v39 = vadd.f32 %v4885_v23, %v3493_v18 }
 0x244   :  { %v4936_v16 = vpop.f32.mrf.mxu1  ;;  %v4988_v9 = vpop.f32.mrf.mxu0 }
 0x245   :  { %v4246_v52 = vpack.c.bf16 %v3770_v53, %v3770_v53  ;;  %v3744_v20 = vadd.f32 %v3743_v62, %v3656_v13  ;;  %v4937_v54 = vadd.f32 %v4936_v16, %v4935_v12 }
 0x246   :  { %v4938_v33 = vpop.f32.mrf.mxu1  ;;  %v3751_v43 = vpop.f32.mrf.mxu0 }
 0x247   :  { %3837 = vst.msk [vmem:[%s6976_s3 + $0x20] sm:$0xf] %vm3828_vm2, %v4246_v52  ;;  %v3771_v4 = vmax.f32 %v3744_v20, 0.0  ;;  %v3661_v49 = vadd.f32 %v4937_v54, %v3573_v27 }
 0x248   :  { %v4939_v37 = vpop.f32.mrf.mxu1  ;;  %v4989_v5 = vpop.f32.mrf.mxu0 }
 0x249   :  { %v4247_v29 = vpack.c.bf16 %v3771_v4, %v3771_v4  ;;  %v3749_v30 = vadd.f32 %v3748_v22, %v3661_v49  ;;  %v4940_v58 = vadd.f32 %v4939_v37, %v4938_v33 }
 0x24a   :  { %v4941_v24 = vpop.f32.mrf.mxu1  ;;  %v3756_v44 = vpop.f32.mrf.mxu0 }
 0x24b   :  { %3838 = vst.msk [vmem:[%s6976_s3 + $0x24] sm:$0xf] %vm3828_vm2, %v4247_v29  ;;  %v3772_v11 = vmax.f32 %v3749_v30, 0.0  ;;  %v3664_v8 = vadd.f32 %v4940_v58, %v3576_v38 }
 0x24c   :  { %v4942_v21 = vpop.f32.mrf.mxu1  ;;  %v4992_v57 = vpop.f32.mrf.mxu0 }
 0x24d   :  { %v4248_v14 = vpack.c.bf16 %v3772_v11, %v3772_v11  ;;  %v3752_v17 = vadd.f32 %v3751_v43, %v3664_v8  ;;  %v4943_v61 = vadd.f32 %v4942_v21, %v4941_v24 }
 0x24e   :  { %v4944_v7 = vpop.f32.mrf.mxu1  ;;  %v3759_v62 = vpop.f32.mrf.mxu0 }
 0x24f   :  { %3839 = vst.msk [vmem:[%s6976_s3 + $0x28] sm:$0xf] %vm3828_vm2, %v4248_v14  ;;  %v3773_v28 = vmax.f32 %v3752_v17, 0.0  ;;  %v3669_v15 = vadd.f32 %v4943_v61, %v3581_v39 }
 0x250   :  { %v4945_v36 = vpop.f32.mrf.mxu1  ;;  %v4993_v45 = vpop.f32.mrf.mxu0 }
 0x251   :  { %v4249_v42 = vpack.c.bf16 %v3773_v28, %v3773_v28  ;;  %v3757_v1 = vadd.f32 %v3756_v44, %v3669_v15 }
 0x253   :  { %3840 = vst.msk [vmem:[%s6976_s3 + $0x2c] sm:$0xf] %vm3828_vm2, %v4249_v42  ;;  %v3774_v25 = vmax.f32 %v3757_v1, 0.0 }
 0x255   :  { %v4250_v56 = vpack.c.bf16 %v3774_v25, %v3774_v25 }
 0x257   :  { %3841 = vst.msk [vmem:[%s6976_s3 + $0x30] sm:$0xf] %vm3828_vm2, %v4250_v56 }

// kernel: autoencoder_forward.10
= control target key start
LH: loop header
LB: loop body
LE: loop exit
PB: predicated region body
PF: predicated region fallthrough
CT: control target
= control target key end

     0   :  { %v1941_v0 = vmov 0   ;;  %v1942_v2 = vmov 0.0   ;;  %vm1943_vm0 = vmmov 0   ;;  %vm634_vm1 = vcmask 261120   ;;  %s2721_s1 = inlined_call_operand.vmem [shape: bf16[288,16], index: 1, kind: input, shape index: {}]   ;;  %s2722_s0 = inlined_call_operand.vmem [shape: bf16[392,288], index: 0, kind: input, shape index: {}]   ;;  %s2723_s2 = inlined_call_operand.vmem [shape: f32[1,16], index: 2, kind: input, shape index: {}]   ;;  %s2724_s3 = inlined_call_operand.vmem [shape: bf16[392,16], index: 3, kind: output, shape index: {}]  }
   0x1   :  { %710 = vmatprep.subr.bf16.mxu0 %v1941_v0  ;;  %v1825_v1 = vld [vmem:[%s2721_s1 + $0x38] sm:$0xff]   ;;  %1718 = vmatprep.subr.bf16.mxu1 %v1942_v2  ;;  %v1826_v3 = vld [vmem:[%s2721_s1 + $0x30] sm:$0xff]   ;;  %v1827_v4 = vld [vmem:[%s2721_s1 + $0x28] sm:$0xff]   ;;  %vm1420_vm2 = vcmask 125952  }
   0x2   :  { %1722 = vmatprep.mubr.msk.bf16.mxu1 %vm1943_vm0, %v1942_v2  ;;  %711 = vmatpush1.bf16.msra.mxu0 %v1825_v1  ;;  %v1828_v5 = vld [vmem:[%s2721_s1 + $0x20] sm:$0xff]   ;;  %v1829_v6 = vld [vmem:[%s2721_s1 + $0x18] sm:$0xff]   ;;  %v1839_v7 = vld [vmem:[%s2721_s1 + $0x88] sm:$0xff]  }
   0x3   :  { %712 = vmatprep.subr.bf16.mxu0 %v1941_v0  ;;  %1719 = vmatpush3.bf16.msra.mxu1 %v1839_v7  ;;  %v1841_v8 = vld [vmem:[%s2721_s1 + $0x80] sm:$0xff]   ;;  %v1830_v9 = vld [vmem:[%s2721_s1 + $0x10] sm:$0xff]   ;;  %v1831_v12 = vld [vmem:[%s2721_s1 + $0x8] sm:$0xff]  }
   0x4   :  { %1720 = vmatprep.subr.bf16.mxu1 %v1942_v2  ;;  %v1842_v10 = vld [vmem:[%s2722_s0 + $0x8] ss:$12 sps:$4 sm:$0xff]   ;;  %v1846_v11 = vld [vmem:[%s2722_s0 + $0x4] ss:$12 sps:$4 sm:$0xff]   ;;  %v1847_v14 = vld [vmem:[%s2722_s0 + $0x20] ss:$12 sps:$4 sm:$0xff]  }
   0x5   :  { %742 = vmatprep.mubr.bf16.mxu0 %v1846_v11  ;;  %v1832_v13 = vld [vmem:[%s2721_s1] sm:$0xff]   ;;  %v1833_v15 = vld [vmem:[%s2721_s1 + $0x78] sm:$0xff]   ;;  %v1834_v16 = vld [vmem:[%s2721_s1 + $0x70] sm:$0xff]  }
   0x6   :  { %713 = vmatpush1.bf16.msra.mxu0 %v1826_v3  ;;  %v1851_v17 = vld [vmem:[%s2722_s0 + $0x38] ss:$12 sps:$4 sm:$0xff]   ;;  %v1835_v18 = vld [vmem:[%s2721_s1 + $0x68] sm:$0xff]   ;;  %v1855_v20 = vld [vmem:[%s2722_s0 + $0x50] ss:$12 sps:$4 sm:$0xff]  }
   0x7   :  { %714 = vmatprep.subr.bf16.mxu0 %v1941_v0  ;;  %1721 = vmatpush3.bf16.msra.mxu1 %v1841_v8  ;;  %v1836_v19 = vld [vmem:[%s2721_s1 + $0x60] sm:$0xff]   ;;  %v1837_v21 = vld [vmem:[%s2721_s1 + $0x58] sm:$0xff]   ;;  %v1838_v22 = vld [vmem:[%s2721_s1 + $0x50] sm:$0xff]  }
   0x8   :  { %v1859_v23 = vld [vmem:[%s2722_s0 + $0x68] ss:$12 sps:$4 sm:$0xff]   ;;  %v1843_v25 = vld [vmem:[%s2721_s1 + $0x40] sm:$0xff]   ;;  %v1871_v32 = vld [vmem:[%s2722_s0 + $0xb0] ss:$12 sps:$4 sm:$0xff]  }
   0x9   :  { %v1840_v24 = vld [vmem:[%s2721_s1 + $0x48] sm:$0xff]   ;;  %v1867_v29 = vld [vmem:[%s2722_s0 + $0x98] ss:$12 sps:$4 sm:$0xff]   ;;  %v1852_v31 = vld [vmem:[%s2722_s0 + $0x34] ss:$12 sps:$4 sm:$0xff]  }
   0xa   :  { %715 = vmatpush1.bf16.msra.mxu0 %v1827_v4  ;;  %1723 = vmatmul.mubr.msk.bf16.vlgmr.msra.gmra.mxu1 %vm634_vm1, %v1842_v10  ;;  %v1863_v26 = vld [vmem:[%s2722_s0 + $0x80] ss:$12 sps:$4 sm:$0xff]   ;;  %v1848_v28 = vld [vmem:[%s2722_s0 + $0x1c] ss:$12 sps:$4 sm:$0xff]   ;;  %v1850_v30 = vld [vmem:[%s2722_s0 + $0x18] ss:$12 sps:$4 sm:$0xff]  }
   0xb   :  { %716 = vmatprep.subr.bf16.mxu0 %v1941_v0  ;;  %1726 = vmatprep.mubr.msk.bf16.mxu1 %vm1943_vm0, %v1942_v2  ;;  %v1844_v27 = vld [vmem:[%s2722_s0] ss:$12 sps:$4 sm:$0xff]   ;;  %v1854_v33 = vld [vmem:[%s2722_s0 + $0x30] ss:$12 sps:$4 sm:$0xff]   ;;  %v1875_v35 = vld [vmem:[%s2722_s0 + $0xc8] ss:$12 sps:$4 sm:$0xff]  }
   0xc   :  { %v1856_v34 = vld [vmem:[%s2722_s0 + $0x4c] ss:$12 sps:$4 sm:$0xff]   ;;  %v1858_v36 = vld [vmem:[%s2722_s0 + $0x48] ss:$12 sps:$4 sm:$0xff]   ;;  %v1860_v37 = vld [vmem:[%s2722_s0 + $0x64] ss:$12 sps:$4 sm:$0xff]  }
   0xd   :  { %v1879_v38 = vld [vmem:[%s2722_s0 + $0xe0] ss:$12 sps:$4 sm:$0xff]   ;;  %v1864_v40 = vld [vmem:[%s2722_s0 + $0x7c] ss:$12 sps:$4 sm:$0xff]   ;;  %v1883_v41 = vld [vmem:[%s2722_s0 + $0xf8] ss:$12 sps:$4 sm:$0xff]  }
   0xe   :  { %717 = vmatpush1.bf16.msra.mxu0 %v1828_v5  ;;  %v1862_v39 = vld [vmem:[%s2722_s0 + $0x60] ss:$12 sps:$4 sm:$0xff]   ;;  %v1866_v42 = vld [vmem:[%s2722_s0 + $0x78] ss:$12 sps:$4 sm:$0xff]   ;;  %v1887_v44 = vld [vmem:[%s2722_s0 + $0x110] ss:$12 sps:$4 sm:$0xff]  }
   0xf   :  { %718 = vmatprep.subr.bf16.mxu0 %v1941_v0  ;;  %v1868_v43 = vld [vmem:[%s2722_s0 + $0x94] ss:$12 sps:$4 sm:$0xff]   ;;  %v1870_v45 = vld [vmem:[%s2722_s0 + $0x90] ss:$12 sps:$4 sm:$0xff]   ;;  %v1872_v46 = vld [vmem:[%s2722_s0 + $0xac] ss:$12 sps:$4 sm:$0xff]  }
  0x10   :  { %v1891_v47 = vld [vmem:[%s2722_s0 + $0x128] ss:$12 sps:$4 sm:$0xff]   ;;  %v1876_v49 = vld [vmem:[%s2722_s0 + $0xc4] ss:$12 sps:$4 sm:$0xff]   ;;  %v1895_v50 = vld [vmem:[%s2722_s0 + $0x140] ss:$12 sps:$4 sm:$0xff]  }
  0x11   :  { %v1874_v48 = vld [vmem:[%s2722_s0 + $0xa8] ss:$12 sps:$4 sm:$0xff]   ;;  %v1878_v51 = vld [vmem:[%s2722_s0 + $0xc0] ss:$12 sps:$4 sm:$0xff]   ;;  %v1899_v53 = vld [vmem:[%s2722_s0 + $0x158] ss:$12 sps:$4 sm:$0xff]  }
  0x12   :  { %719 = vmatpush1.bf16.msra.mxu0 %v1829_v6  ;;  %1727 = vmatmul.mubr.msk.bf16.gmra.mxu1 %vm634_vm1, %v1847_v14  ;;  %v1880_v52 = vld [vmem:[%s2722_s0 + $0xdc] ss:$12 sps:$4 sm:$0xff]   ;;  %v1882_v54 = vld [vmem:[%s2722_s0 + $0xd8] ss:$12 sps:$4 sm:$0xff]   ;;  %v1884_v55 = vld [vmem:[%s2722_s0 + $0xf4] ss:$12 sps:$4 sm:$0xff]  }
  0x13   :  { %720 = vmatprep.subr.bf16.mxu0 %v1941_v0  ;;  %1730 = vmatprep.mubr.msk.bf16.mxu1 %vm1943_vm0, %v1942_v2  ;;  %v1903_v56 = vld [vmem:[%s2722_s0 + $0x170] ss:$12 sps:$4 sm:$0xff]   ;;  %v1888_v58 = vld [vmem:[%s2722_s0 + $0x10c] ss:$12 sps:$4 sm:$0xff]   ;;  %v1907_v59 = vld [vmem:[%s2722_s0 + $0x188] ss:$12 sps:$4 sm:$0xff]  }
  0x14   :  { %v1886_v57 = vld [vmem:[%s2722_s0 + $0xf0] ss:$12 sps:$4 sm:$0xff]   ;;  %v1890_v60 = vld [vmem:[%s2722_s0 + $0x108] ss:$12 sps:$4 sm:$0xff]   ;;  %v1911_v62 = vld [vmem:[%s2722_s0 + $0x1a0] ss:$12 sps:$4 sm:$0xff]  }
  0x15   :  { %v1892_v61 = vld [vmem:[%s2722_s0 + $0x124] ss:$12 sps:$4 sm:$0xff]   ;;  %v1894_v63 = vld [vmem:[%s2722_s0 + $0x120] ss:$12 sps:$4 sm:$0xff]   ;;  %v1923_v8 = vld [vmem:[%s2722_s0 + $0x1e8] ss:$12 sps:$4 sm:$0xff]  }
  0x16   :  { %721 = vmatpush1.bf16.msra.mxu0 %v1830_v9  ;;  %v1915_v1 = vld [vmem:[%s2722_s0 + $0x1b8] ss:$12 sps:$4 sm:$0xff]   ;;  %v1900_v4 = vld [vmem:[%s2722_s0 + $0x154] ss:$12 sps:$4 sm:$0xff]   ;;  %v1919_v5 = vld [vmem:[%s2722_s0 + $0x1d0] ss:$12 sps:$4 sm:$0xff]  }
  0x17   :  { %722 = vmatprep.subr.bf16.mxu0 %v1941_v0  ;;  %v1898_v3 = vld [vmem:[%s2722_s0 + $0x138] ss:$12 sps:$4 sm:$0xff]   ;;  %v1902_v6 = vld [vmem:[%s2722_s0 + $0x150] ss:$12 sps:$4 sm:$0xff]   ;;  %v1906_v9 = vld [vmem:[%s2722_s0 + $0x168] ss:$12 sps:$4 sm:$0xff]  }
  0x18   :  { %v1904_v7 = vld [vmem:[%s2722_s0 + $0x16c] ss:$12 sps:$4 sm:$0xff]   ;;  %v1908_v10 = vld [vmem:[%s2722_s0 + $0x184] ss:$12 sps:$4 sm:$0xff]  }
  0x19   :  { %v1927_v11 = vld [vmem:[%s2722_s0 + $0x200] ss:$12 sps:$4 sm:$0xff]   ;;  %v1931_v14 = vld [vmem:[%s2722_s0 + $0x218] ss:$12 sps:$4 sm:$0xff]  }
  0x1a   :  { %723 = vmatpush1.bf16.msra.mxu0 %v1831_v12  ;;  %1731 = vmatmul.mubr.msk.bf16.gmra.mxu1 %vm634_vm1, %v1851_v17  ;;  %v1910_v12 = vld [vmem:[%s2722_s0 + $0x180] ss:$12 sps:$4 sm:$0xff]   ;;  %v1935_v17 = vld [vmem:[%s2722_s0 + $0x230] ss:$12 sps:$4 sm:$0xff]  }
  0x1b   :  { %724 = vmatprep.subr.bf16.mxu0 %v1941_v0  ;;  %1734 = vmatprep.mubr.msk.bf16.mxu1 %vm1943_vm0, %v1942_v2 }
  0x1e   :  { %725 = vmatpush1.bf16.msra.mxu0 %v1832_v13  ;;  %v1912_v13 = vld [vmem:[%s2722_s0 + $0x19c] ss:$12 sps:$4 sm:$0xff]  }
  0x1f   :  { %726 = vmatprep.subr.bf16.mxu0 %v1941_v0 }
  0x22   :  { %727 = vmatpush2.bf16.msra.mxu0 %v1833_v15  ;;  %1735 = vmatmul.mubr.msk.bf16.gmra.mxu1 %vm634_vm1, %v1855_v20  ;;  %v1914_v15 = vld [vmem:[%s2722_s0 + $0x198] ss:$12 sps:$4 sm:$0xff]   ;;  %v1939_v20 = vld [vmem:[%s2722_s0 + $0x248] ss:$0 sps:$4 sm:$0xff]  }
  0x23   :  { %728 = vmatprep.subr.bf16.mxu0 %v1941_v0  ;;  %1738 = vmatprep.mubr.msk.bf16.mxu1 %vm1943_vm0, %v1942_v2 }
  0x26   :  { %729 = vmatpush2.bf16.msra.mxu0 %v1834_v16  ;;  %v1916_v16 = vld [vmem:[%s2722_s0 + $0x1b4] ss:$12 sps:$4 sm:$0xff]  }
  0x27   :  { %730 = vmatprep.subr.bf16.mxu0 %v1941_v0 }
  0x2a   :  { %731 = vmatpush2.bf16.msra.mxu0 %v1835_v18  ;;  %1739 = vmatmul.mubr.msk.bf16.gmra.mxu1 %vm634_vm1, %v1859_v23  ;;  %v1918_v18 = vld [vmem:[%s2722_s0 + $0x1b0] ss:$12 sps:$4 sm:$0xff]  }
  0x2b   :  { %732 = vmatprep.subr.bf16.mxu0 %v1941_v0  ;;  %1742 = vmatprep.mubr.msk.bf16.mxu1 %vm1943_vm0, %v1942_v2 }
  0x2e   :  { %733 = vmatpush2.bf16.msra.mxu0 %v1836_v19  ;;  %v1920_v19 = vld [vmem:[%s2722_s0 + $0x1cc] ss:$12 sps:$4 sm:$0xff]  }
  0x2f   :  { %734 = vmatprep.subr.bf16.mxu0 %v1941_v0 }
  0x32   :  { %735 = vmatpush2.bf16.msra.mxu0 %v1837_v21  ;;  %1743 = vmatmul.mubr.msk.bf16.gmra.mxu1 %vm634_vm1, %v1863_v26  ;;  %v1922_v21 = vld [vmem:[%s2722_s0 + $0x1c8] ss:$12 sps:$4 sm:$0xff]  }
  0x33   :  { %736 = vmatprep.subr.bf16.mxu0 %v1941_v0  ;;  %1746 = vmatprep.mubr.msk.bf16.mxu1 %vm1943_vm0, %v1942_v2 }
  0x36   :  { %737 = vmatpush2.bf16.msra.mxu0 %v1838_v22  ;;  %v1924_v22 = vld [vmem:[%s2722_s0 + $0x1e4] ss:$12 sps:$4 sm:$0xff]  }
  0x37   :  { %738 = vmatprep.subr.bf16.mxu0 %v1941_v0 }
  0x3a   :  { %739 = vmatpush2.bf16.msra.mxu0 %v1840_v24  ;;  %1747 = vmatmul.mubr.msk.bf16.gmra.mxu1 %vm634_vm1, %v1867_v29 }
  0x3b   :  { %740 = vmatprep.subr.bf16.mxu0 %v1941_v0  ;;  %1750 = vmatprep.mubr.msk.bf16.mxu1 %vm1943_vm0, %v1942_v2  ;;  %v1896_v0 = vld [vmem:[%s2722_s0 + $0x13c] ss:$12 sps:$4 sm:$0xff]  }
  0x3e   :  { %741 = vmatpush2.bf16.msra.mxu0 %v1843_v25  ;;  %v1926_v25 = vld [vmem:[%s2722_s0 + $0x1e0] ss:$12 sps:$4 sm:$0xff]  }
  0x41   :  { %743 = vmatmul.mubr.bf16.vlgmr.msra.gmra.mxu0 %v1844_v27  ;;  %v1928_v27 = vld [vmem:[%s2722_s0 + $0x1fc] ss:$12 sps:$4 sm:$0xff]  }
  0x42   :  { %750 = vmatprep.mubr.bf16.mxu0 %v1848_v28  ;;  %1751 = vmatmul.mubr.msk.bf16.gmra.mxu1 %vm634_vm1, %v1871_v32 }
  0x43   :  { %1754 = vmatprep.mubr.msk.bf16.mxu1 %vm1943_vm0, %v1942_v2 }
  0x49   :  { %751 = vmatmul.mubr.bf16.gmra.mxu0 %v1850_v30 }
  0x4a   :  { %758 = vmatprep.mubr.bf16.mxu0 %v1852_v31  ;;  %1755 = vmatmul.mubr.msk.bf16.gmra.mxu1 %vm634_vm1, %v1875_v35  ;;  %v1930_v31 = vld [vmem:[%s2722_s0 + $0x1f8] ss:$12 sps:$4 sm:$0xff]  }
  0x4b   :  { %1758 = vmatprep.mubr.msk.bf16.mxu1 %vm1943_vm0, %v1942_v2 }
  0x51   :  { %759 = vmatmul.mubr.bf16.gmra.mxu0 %v1854_v33  ;;  %v1932_v33 = vld [vmem:[%s2722_s0 + $0x214] ss:$12 sps:$4 sm:$0xff]  }
  0x52   :  { %766 = vmatprep.mubr.bf16.mxu0 %v1856_v34  ;;  %1759 = vmatmul.mubr.msk.bf16.gmra.mxu1 %vm634_vm1, %v1879_v38 }
  0x53   :  { %1762 = vmatprep.mubr.msk.bf16.mxu1 %vm1943_vm0, %v1942_v2 }
  0x59   :  { %767 = vmatmul.mubr.bf16.gmra.mxu0 %v1858_v36 }
  0x5a   :  { %774 = vmatprep.mubr.bf16.mxu0 %v1860_v37  ;;  %1763 = vmatmul.mubr.msk.bf16.gmra.mxu1 %vm634_vm1, %v1883_v41  ;;  %v1934_v37 = vld [vmem:[%s2722_s0 + $0x210] ss:$12 sps:$4 sm:$0xff]  }
  0x5b   :  { %1766 = vmatprep.mubr.msk.bf16.mxu1 %vm1943_vm0, %v1942_v2 }
  0x61   :  { %775 = vmatmul.mubr.bf16.gmra.mxu0 %v1862_v39  ;;  %v1936_v39 = vld [vmem:[%s2722_s0 + $0x22c] ss:$12 sps:$4 sm:$0xff]  }
  0x62   :  { %782 = vmatprep.mubr.bf16.mxu0 %v1864_v40  ;;  %1767 = vmatmul.mubr.msk.bf16.gmra.mxu1 %vm634_vm1, %v1887_v44  ;;  %v1938_v44 = vld [vmem:[%s2722_s0 + $0x228] ss:$12 sps:$4 sm:$0xff]  }
  0x63   :  { %1770 = vmatprep.mubr.msk.bf16.mxu1 %vm1943_vm0, %v1942_v2 }
  0x69   :  { %783 = vmatmul.mubr.bf16.gmra.mxu0 %v1866_v42  ;;  %v111_v42 = vld [vmem:[%s2722_s0 + $0x240] sm:$0xff] }
  0x6a   :  { %790 = vmatprep.mubr.bf16.mxu0 %v1868_v43  ;;  %1771 = vmatmul.mubr.msk.bf16.gmra.mxu1 %vm634_vm1, %v1891_v47 }
  0x6b   :  { %1774 = vmatprep.mubr.msk.bf16.mxu1 %vm1943_vm0, %v1942_v2 }
  0x71   :  { %791 = vmatmul.mubr.bf16.gmra.mxu0 %v1870_v45 }
  0x72   :  { %798 = vmatprep.mubr.bf16.mxu0 %v1872_v46  ;;  %1775 = vmatmul.mubr.msk.bf16.gmra.mxu1 %vm634_vm1, %v1895_v50  ;;  %v1548_v46 = vcombine.high %v111_v42, %v111_v42  ;;  %v1547_v50 = vcombine.low %v111_v42, %v111_v42 }
  0x73   :  { %1778 = vmatprep.mubr.msk.bf16.mxu1 %vm1943_vm0, %v1942_v2 }
  0x79   :  { %799 = vmatmul.mubr.bf16.gmra.mxu0 %v1874_v48 }
  0x7a   :  { %806 = vmatprep.mubr.bf16.mxu0 %v1876_v49  ;;  %1779 = vmatmul.mubr.msk.bf16.gmra.mxu1 %vm634_vm1, %v1899_v53 }
  0x7b   :  { %1782 = vmatprep.mubr.msk.bf16.mxu1 %vm1943_vm0, %v1942_v2 }
  0x81   :  { %807 = vmatmul.mubr.bf16.gmra.mxu0 %v1878_v51 }
  0x82   :  { %814 = vmatprep.mubr.bf16.mxu0 %v1880_v52  ;;  %1783 = vmatmul.mubr.msk.bf16.gmra.mxu1 %vm634_vm1, %v1903_v56  ;;  %v2350_v52 = vld [vmem:[%s2723_s2] ss:$0 sm:$0xff] }
  0x83   :  { %1786 = vmatprep.mubr.msk.bf16.mxu1 %vm1943_vm0, %v1942_v2 }
  0x89   :  { %815 = vmatmul.mubr.bf16.gmra.mxu0 %v1882_v54 }
  0x8a   :  { %822 = vmatprep.mubr.bf16.mxu0 %v1884_v55  ;;  %1787 = vmatmul.mubr.msk.bf16.gmra.mxu1 %vm634_vm1, %v1907_v59 }
  0x8b   :  { %1790 = vmatprep.mubr.msk.bf16.mxu1 %vm1943_vm0, %v1942_v2 }
  0x91   :  { %823 = vmatmul.mubr.bf16.gmra.mxu0 %v1886_v57 }
  0x92   :  { %830 = vmatprep.mubr.bf16.mxu0 %v1888_v58  ;;  %1791 = vmatmul.mubr.msk.bf16.gmra.mxu1 %vm634_vm1, %v1911_v62 }
  0x93   :  { %1794 = vmatprep.mubr.msk.bf16.mxu1 %vm1943_vm0, %v1942_v2 }
  0x99   :  { %831 = vmatmul.mubr.bf16.gmra.mxu0 %v1890_v60 }
  0x9a   :  { %838 = vmatprep.mubr.bf16.mxu0 %v1892_v61  ;;  %1795 = vmatmul.mubr.msk.bf16.gmra.mxu1 %vm634_vm1, %v1915_v1 }
  0x9b   :  { %1798 = vmatprep.mubr.msk.bf16.mxu1 %vm1943_vm0, %v1942_v2 }
  0xa1   :  { %839 = vmatmul.mubr.bf16.gmra.mxu0 %v1894_v63 }
  0xa2   :  { %846 = vmatprep.mubr.bf16.mxu0 %v1896_v0  ;;  %1799 = vmatmul.mubr.msk.bf16.gmra.mxu1 %vm634_vm1, %v1919_v5 }
  0xa3   :  { %1802 = vmatprep.mubr.msk.bf16.mxu1 %vm1943_vm0, %v1942_v2 }
  0xa9   :  { %847 = vmatmul.mubr.bf16.gmra.mxu0 %v1898_v3 }
  0xaa   :  { %854 = vmatprep.mubr.bf16.mxu0 %v1900_v4  ;;  %1803 = vmatmul.mubr.msk.bf16.gmra.mxu1 %vm634_vm1, %v1923_v8 }
  0xab   :  { %1806 = vmatprep.mubr.msk.bf16.mxu1 %vm1943_vm0, %v1942_v2 }
  0xb1   :  { %855 = vmatmul.mubr.bf16.gmra.mxu0 %v1902_v6 }
  0xb2   :  { %862 = vmatprep.mubr.bf16.mxu0 %v1904_v7  ;;  %1807 = vmatmul.mubr.msk.bf16.gmra.mxu1 %vm634_vm1, %v1927_v11 }
  0xb3   :  { %1810 = vmatprep.mubr.msk.bf16.mxu1 %vm1943_vm0, %v1942_v2 }
  0xb9   :  { %863 = vmatmul.mubr.bf16.gmra.mxu0 %v1906_v9 }
  0xba   :  { %870 = vmatprep.mubr.bf16.mxu0 %v1908_v10  ;;  %1811 = vmatmul.mubr.msk.bf16.gmra.mxu1 %vm634_vm1, %v1931_v14 }
  0xbb   :  { %1814 = vmatprep.mubr.msk.bf16.mxu1 %vm1943_vm0, %v1942_v2 }
  0xc1   :  { %871 = vmatmul.mubr.bf16.gmra.mxu0 %v1910_v12 }
  0xc2   :  { %878 = vmatprep.mubr.bf16.mxu0 %v1912_v13  ;;  %1815 = vmatmul.mubr.msk.bf16.gmra.mxu1 %vm634_vm1, %v1935_v17 }
  0xc3   :  { %1818 = vmatprep.mubr.msk.bf16.mxu1 %vm1943_vm0, %v1942_v2 }
  0xc9   :  { %879 = vmatmul.mubr.bf16.gmra.mxu0 %v1914_v15 }
  0xca   :  { %886 = vmatprep.mubr.bf16.mxu0 %v1916_v16  ;;  %v976_v23 = vpop.f32.mrf.mxu1  ;;  %1819 = vmatmul.mubr.msk.bf16.gmra.mxu1 %vm634_vm1, %v1939_v20 }
  0xcc   :  { %v1724_v24 = vpop.f32.mrf.mxu1 }
  0xce   :  { %v979_v2 = vpop.f32.mrf.mxu1 }
  0xd0   :  { %v1725_v26 = vpop.f32.mrf.mxu1 }
  0xd1   :  { %887 = vmatmul.mubr.bf16.gmra.mxu0 %v1918_v18 }
  0xd2   :  { %894 = vmatprep.mubr.bf16.mxu0 %v1920_v19  ;;  %v984_v28 = vpop.f32.mrf.mxu1 }
  0xd4   :  { %v1728_v29 = vpop.f32.mrf.mxu1 }
  0xd6   :  { %v2315_v30 = vpop.f32.mrf.mxu1 }
  0xd8   :  { %v1729_v32 = vpop.f32.mrf.mxu1 }
  0xd9   :  { %895 = vmatmul.mubr.bf16.gmra.mxu0 %v1922_v21 }
  0xda   :  { %902 = vmatprep.mubr.bf16.mxu0 %v1924_v22  ;;  %v2323_v34 = vpop.f32.mrf.mxu1 }
  0xdc   :  { %v1732_v35 = vpop.f32.mrf.mxu1 }
  0xde   :  { %v2325_v36 = vpop.f32.mrf.mxu1 }
  0xe0   :  { %v1733_v38 = vpop.f32.mrf.mxu1 }
  0xe1   :  { %903 = vmatmul.mubr.bf16.gmra.mxu0 %v1926_v25 }
  0xe2   :  { %910 = vmatprep.mubr.bf16.mxu0 %v1928_v27  ;;  %v2333_v40 = vpop.f32.mrf.mxu1 }
  0xe4   :  { %v1736_v41 = vpop.f32.mrf.mxu1 }
  0xe6   :  { %v2338_v43 = vpop.f32.mrf.mxu1 }
  0xe8   :  { %v1737_v45 = vpop.f32.mrf.mxu1 }
  0xe9   :  { %911 = vmatmul.mubr.bf16.gmra.mxu0 %v1930_v31 }
  0xea   :  { %918 = vmatprep.mubr.bf16.mxu0 %v1932_v33  ;;  %v2343_v47 = vpop.f32.mrf.mxu1 }
  0xec   :  { %v1740_v48 = vpop.f32.mrf.mxu1 }
  0xee   :  { %v2345_v49 = vpop.f32.mrf.mxu1 }
  0xf0   :  { %v1741_v51 = vpop.f32.mrf.mxu1 }
  0xf1   :  { %919 = vmatmul.mubr.bf16.gmra.mxu0 %v1934_v37 }
  0xf2   :  { %926 = vmatprep.mubr.bf16.mxu0 %v1936_v39  ;;  %v2352_v53 = vpop.f32.mrf.mxu1 }
  0xf4   :  { %v1744_v55 = vpop.f32.mrf.mxu1 }
  0xf6   :  { %v2355_v58 = vpop.f32.mrf.mxu1 }
  0xf8   :  { %v1745_v61 = vpop.f32.mrf.mxu1 }
  0xf9   :  { %927 = vmatmul.mubr.bf16.gmra.mxu0 %v1938_v44 }
  0xfa   :  { %934 = vmatprep.mubr.bf16.mxu0 %v1548_v46  ;;  %v2358_v1 = vpop.f32.mrf.mxu1 }
  0xfc   :  { %v1748_v6 = vpop.f32.mrf.mxu1 }
  0xfe   :  { %v2365_v10 = vpop.f32.mrf.mxu1 }
 0x100   :  { %v1749_v14 = vpop.f32.mrf.mxu1 }
 0x101   :  { %v744_v54 = vpop.f32.mrf.mxu0  ;;  %935 = vmatmul.mubr.bf16.gmra.mxu0 %v1547_v50 }
 0x102   :  { %v745_v56 = vadd.f32 %v2350_v52, %v744_v54  ;;  %v2372_v18 = vpop.f32.mrf.mxu1 }
 0x103   :  { %v746_v57 = vpop.f32.mrf.mxu0 }
 0x104   :  { %v977_v59 = vadd.f32 %v976_v23, %v745_v56  ;;  %v1752_v22 = vpop.f32.mrf.mxu1 }
 0x105   :  { %v747_v60 = vpop.f32.mrf.mxu0 }
 0x106   :  { %v1174_v62 = vmax.f32 %v977_v59, 0.0  ;;  %v748_v63 = vadd.f32 %v2350_v52, %v747_v60  ;;  %v2380_v25 = vpop.f32.mrf.mxu1 }
 0x107   :  { %v749_v0 = vpop.f32.mrf.mxu0 }
 0x108   :  { %v1642_v3 = vpack.c.bf16 %v1174_v62, %v1174_v62  ;;  %v980_v4 = vadd.f32 %v979_v2, %v748_v63  ;;  %v1753_v29 = vpop.f32.mrf.mxu1 }
 0x109   :  { %v752_v5 = vpop.f32.mrf.mxu0 }
 0x10a   :  { %1421 = vst.msk [vmem:[%s2724_s3] sm:$0xf] %vm1420_vm2, %v1642_v3  ;;  %v1175_v7 = vmax.f32 %v980_v4, 0.0  ;;  %v753_v8 = vadd.f32 %v2350_v52, %v752_v5  ;;  %v2388_v33 = vpop.f32.mrf.mxu1 }
 0x10b   :  { %v754_v9 = vpop.f32.mrf.mxu0 }
 0x10c   :  { %v1643_v11 = vpack.c.bf16 %v1175_v7, %v1175_v7  ;;  %v985_v12 = vadd.f32 %v984_v28, %v753_v8  ;;  %v1756_v39 = vpop.f32.mrf.mxu1 }
 0x10d   :  { %v755_v13 = vpop.f32.mrf.mxu0 }
 0x10e   :  { %1422 = vst.msk [vmem:[%s2724_s3 + $0x4] sm:$0xf] %vm1420_vm2, %v1643_v11  ;;  %v1176_v15 = vmax.f32 %v985_v12, 0.0  ;;  %v756_v16 = vadd.f32 %v2350_v52, %v755_v13  ;;  %v2396_v44 = vpop.f32.mrf.mxu1 }
 0x10f   :  { %v757_v17 = vpop.f32.mrf.mxu0 }
 0x110   :  { %v1644_v19 = vpack.c.bf16 %v1176_v15, %v1176_v15  ;;  %v988_v20 = vadd.f32 %v2315_v30, %v756_v16  ;;  %v1757_v50 = vpop.f32.mrf.mxu1 }
 0x111   :  { %v760_v21 = vpop.f32.mrf.mxu0 }
 0x112   :  { %1423 = vst.msk [vmem:[%s2724_s3 + $0x8] sm:$0xf] %vm1420_vm2, %v1644_v19  ;;  %v1177_v23 = vmax.f32 %v988_v20, 0.0  ;;  %v761_v24 = vadd.f32 %v2350_v52, %v760_v21  ;;  %v2404_v55 = vpop.f32.mrf.mxu1 }
 0x113   :  { %v762_v2 = vpop.f32.mrf.mxu0 }
 0x114   :  { %v1645_v26 = vpack.c.bf16 %v1177_v23, %v1177_v23  ;;  %v993_v27 = vadd.f32 %v2323_v34, %v761_v24  ;;  %v1760_v60 = vpop.f32.mrf.mxu1 }
 0x115   :  { %v763_v28 = vpop.f32.mrf.mxu0 }
 0x116   :  { %1424 = vst.msk [vmem:[%s2724_s3 + $0xc] sm:$0xf] %vm1420_vm2, %v1645_v26  ;;  %v1178_v30 = vmax.f32 %v993_v27, 0.0  ;;  %v764_v31 = vadd.f32 %v2350_v52, %v763_v28  ;;  %v2412_v63 = vpop.f32.mrf.mxu1 }
 0x117   :  { %v765_v32 = vpop.f32.mrf.mxu0 }
 0x118   :  { %v1646_v35 = vpack.c.bf16 %v1178_v30, %v1178_v30  ;;  %v996_v37 = vadd.f32 %v2325_v36, %v764_v31  ;;  %v1761_v5 = vpop.f32.mrf.mxu1 }
 0x119   :  { %v768_v38 = vpop.f32.mrf.mxu0 }
 0x11a   :  { %1425 = vst.msk [vmem:[%s2724_s3 + $0x10] sm:$0xf] %vm1420_vm2, %v1646_v35  ;;  %v1179_v34 = vmax.f32 %v996_v37, 0.0  ;;  %v769_v41 = vadd.f32 %v2350_v52, %v768_v38  ;;  %v2420_v8 = vpop.f32.mrf.mxu1 }
 0x11b   :  { %v770_v42 = vpop.f32.mrf.mxu0 }
 0x11c   :  { %v1647_v45 = vpack.c.bf16 %v1179_v34, %v1179_v34  ;;  %v1001_v46 = vadd.f32 %v2333_v40, %v769_v41  ;;  %v1764_v13 = vpop.f32.mrf.mxu1 }
 0x11d   :  { %v771_v48 = vpop.f32.mrf.mxu0 }
 0x11e   :  { %1426 = vst.msk [vmem:[%s2724_s3 + $0x14] sm:$0xf] %vm1420_vm2, %v1647_v45  ;;  %v1180_v36 = vmax.f32 %v1001_v46, 0.0  ;;  %v772_v51 = vadd.f32 %v2350_v52, %v771_v48  ;;  %v2428_v16 = vpop.f32.mrf.mxu1 }
 0x11f   :  { %v773_v54 = vpop.f32.mrf.mxu0 }
 0x120   :  { %v1648_v56 = vpack.c.bf16 %v1180_v36, %v1180_v36  ;;  %v1004_v57 = vadd.f32 %v2338_v43, %v772_v51  ;;  %v1765_v21 = vpop.f32.mrf.mxu1 }
 0x121   :  { %v776_v59 = vpop.f32.mrf.mxu0 }
 0x122   :  { %1427 = vst.msk [vmem:[%s2724_s3 + $0x18] sm:$0xf] %vm1420_vm2, %v1648_v56  ;;  %v1181_v40 = vmax.f32 %v1004_v57, 0.0  ;;  %v777_v61 = vadd.f32 %v2350_v52, %v776_v59  ;;  %v2436_v24 = vpop.f32.mrf.mxu1 }
 0x123   :  { %v778_v62 = vpop.f32.mrf.mxu0 }
 0x124   :  { %v1649_v0 = vpack.c.bf16 %v1181_v40, %v1181_v40  ;;  %v1009_v3 = vadd.f32 %v2343_v47, %v777_v61  ;;  %v1768_v28 = vpop.f32.mrf.mxu1 }
 0x125   :  { %v779_v4 = vpop.f32.mrf.mxu0 }
 0x126   :  { %1428 = vst.msk [vmem:[%s2724_s3 + $0x1c] sm:$0xf] %vm1420_vm2, %v1649_v0  ;;  %v1182_v43 = vmax.f32 %v1009_v3, 0.0  ;;  %v780_v6 = vadd.f32 %v2350_v52, %v779_v4  ;;  %v2444_v31 = vpop.f32.mrf.mxu1 }
 0x127   :  { %v781_v7 = vpop.f32.mrf.mxu0 }
 0x128   :  { %v1650_v9 = vpack.c.bf16 %v1182_v43, %v1182_v43  ;;  %v1012_v11 = vadd.f32 %v2345_v49, %v780_v6  ;;  %v1769_v38 = vpop.f32.mrf.mxu1 }
 0x129   :  { %v784_v12 = vpop.f32.mrf.mxu0 }
 0x12a   :  { %1429 = vst.msk [vmem:[%s2724_s3 + $0x20] sm:$0xf] %vm1420_vm2, %v1650_v9  ;;  %v1183_v47 = vmax.f32 %v1012_v11, 0.0  ;;  %v785_v14 = vadd.f32 %v2350_v52, %v784_v12  ;;  %v2452_v41 = vpop.f32.mrf.mxu1 }
 0x12b   :  { %v786_v15 = vpop.f32.mrf.mxu0 }
 0x12c   :  { %v1651_v17 = vpack.c.bf16 %v1183_v47, %v1183_v47  ;;  %v1017_v19 = vadd.f32 %v2352_v53, %v785_v14  ;;  %v1772_v48 = vpop.f32.mrf.mxu1 }
 0x12d   :  { %v787_v20 = vpop.f32.mrf.mxu0 }
 0x12e   :  { %1430 = vst.msk [vmem:[%s2724_s3 + $0x24] sm:$0xf] %vm1420_vm2, %v1651_v17  ;;  %v1184_v49 = vmax.f32 %v1017_v19, 0.0  ;;  %v788_v22 = vadd.f32 %v2350_v52, %v787_v20  ;;  %v2460_v51 = vpop.f32.mrf.mxu1 }
 0x12f   :  { %v789_v23 = vpop.f32.mrf.mxu0 }
 0x130   :  { %v1652_v2 = vpack.c.bf16 %v1184_v49, %v1184_v49  ;;  %v1020_v26 = vadd.f32 %v2355_v58, %v788_v22  ;;  %v1773_v59 = vpop.f32.mrf.mxu1 }
 0x131   :  { %v792_v27 = vpop.f32.mrf.mxu0 }
 0x132   :  { %1431 = vst.msk [vmem:[%s2724_s3 + $0x28] sm:$0xf] %vm1420_vm2, %v1652_v2  ;;  %v1185_v53 = vmax.f32 %v1020_v26, 0.0  ;;  %v793_v29 = vadd.f32 %v2350_v52, %v792_v27  ;;  %v2468_v61 = vpop.f32.mrf.mxu1 }
 0x133   :  { %v794_v30 = vpop.f32.mrf.mxu0 }
 0x134   :  { %v1653_v32 = vpack.c.bf16 %v1185_v53, %v1185_v53  ;;  %v1025_v35 = vadd.f32 %v2358_v1, %v793_v29  ;;  %v1776_v4 = vpop.f32.mrf.mxu1 }
 0x135   :  { %v795_v37 = vpop.f32.mrf.mxu0 }
 0x136   :  { %1432 = vst.msk [vmem:[%s2724_s3 + $0x2c] sm:$0xf] %vm1420_vm2, %v1653_v32  ;;  %v1186_v58 = vmax.f32 %v1025_v35, 0.0  ;;  %v796_v39 = vadd.f32 %v2350_v52, %v795_v37  ;;  %v2476_v6 = vpop.f32.mrf.mxu1 }
 0x137   :  { %v797_v34 = vpop.f32.mrf.mxu0 }
 0x138   :  { %v1654_v42 = vpack.c.bf16 %v1186_v58, %v1186_v58  ;;  %v1028_v45 = vadd.f32 %v2365_v10, %v796_v39  ;;  %v1777_v12 = vpop.f32.mrf.mxu1 }
 0x139   :  { %v800_v46 = vpop.f32.mrf.mxu0 }
 0x13a   :  { %1433 = vst.msk [vmem:[%s2724_s3 + $0x30] sm:$0xf] %vm1420_vm2, %v1654_v42  ;;  %v1187_v1 = vmax.f32 %v1028_v45, 0.0  ;;  %v801_v50 = vadd.f32 %v2350_v52, %v800_v46  ;;  %v2484_v14 = vpop.f32.mrf.mxu1 }
 0x13b   :  { %v802_v36 = vpop.f32.mrf.mxu0 }
 0x13c   :  { %v1655_v54 = vpack.c.bf16 %v1187_v1, %v1187_v1  ;;  %v1033_v56 = vadd.f32 %v2372_v18, %v801_v50  ;;  %v1780_v20 = vpop.f32.mrf.mxu1 }
 0x13d   :  { %v803_v57 = vpop.f32.mrf.mxu0 }
 0x13e   :  { %1434 = vst.msk [vmem:[%s2724_s3 + $0x34] sm:$0xf] %vm1420_vm2, %v1655_v54  ;;  %v1188_v10 = vmax.f32 %v1033_v56, 0.0  ;;  %v804_v60 = vadd.f32 %v2350_v52, %v803_v57  ;;  %v2492_v22 = vpop.f32.mrf.mxu1 }
 0x13f   :  { %v805_v40 = vpop.f32.mrf.mxu0 }
 0x140   :  { %v1656_v62 = vpack.c.bf16 %v1188_v10, %v1188_v10  ;;  %v1036_v0 = vadd.f32 %v2380_v25, %v804_v60  ;;  %v1781_v27 = vpop.f32.mrf.mxu1 }
 0x141   :  { %v808_v3 = vpop.f32.mrf.mxu0 }
 0x142   :  { %1435 = vst.msk [vmem:[%s2724_s3 + $0x38] sm:$0xf] %vm1420_vm2, %v1656_v62  ;;  %v1189_v18 = vmax.f32 %v1036_v0, 0.0  ;;  %v809_v5 = vadd.f32 %v2350_v52, %v808_v3  ;;  %v2500_v29 = vpop.f32.mrf.mxu1 }
 0x143   :  { %v810_v43 = vpop.f32.mrf.mxu0 }
 0x144   :  { %v1657_v7 = vpack.c.bf16 %v1189_v18, %v1189_v18  ;;  %v1041_v9 = vadd.f32 %v2388_v33, %v809_v5  ;;  %v1784_v37 = vpop.f32.mrf.mxu1 }
 0x145   :  { %v811_v11 = vpop.f32.mrf.mxu0 }
 0x146   :  { %1436 = vst.msk [vmem:[%s2724_s3 + $0x3c] sm:$0xf] %vm1420_vm2, %v1657_v7  ;;  %v1190_v25 = vmax.f32 %v1041_v9, 0.0  ;;  %v812_v13 = vadd.f32 %v2350_v52, %v811_v11  ;;  %v2508_v39 = vpop.f32.mrf.mxu1 }
 0x147   :  { %v813_v47 = vpop.f32.mrf.mxu0 }
 0x148   :  { %v1658_v15 = vpack.c.bf16 %v1190_v25, %v1190_v25  ;;  %v1044_v17 = vadd.f32 %v2396_v44, %v812_v13  ;;  %v1785_v46 = vpop.f32.mrf.mxu1 }
 0x149   :  { %v816_v19 = vpop.f32.mrf.mxu0 }
 0x14a   :  { %1437 = vst.msk [vmem:[%s2724_s3 + $0x40] sm:$0xf] %vm1420_vm2, %v1658_v15  ;;  %v1191_v33 = vmax.f32 %v1044_v17, 0.0  ;;  %v817_v21 = vadd.f32 %v2350_v52, %v816_v19  ;;  %v2516_v50 = vpop.f32.mrf.mxu1 }
 0x14b   :  { %v818_v49 = vpop.f32.mrf.mxu0 }
 0x14c   :  { %v1659_v23 = vpack.c.bf16 %v1191_v33, %v1191_v33  ;;  %v1049_v2 = vadd.f32 %v2404_v55, %v817_v21  ;;  %v1788_v57 = vpop.f32.mrf.mxu1 }
 0x14d   :  { %v819_v26 = vpop.f32.mrf.mxu0 }
 0x14e   :  { %1438 = vst.msk [vmem:[%s2724_s3 + $0x44] sm:$0xf] %vm1420_vm2, %v1659_v23  ;;  %v1192_v44 = vmax.f32 %v1049_v2, 0.0  ;;  %v820_v28 = vadd.f32 %v2350_v52, %v819_v26  ;;  %v2524_v60 = vpop.f32.mrf.mxu1 }
 0x14f   :  { %v821_v53 = vpop.f32.mrf.mxu0 }
 0x150   :  { %v1660_v30 = vpack.c.bf16 %v1192_v44, %v1192_v44  ;;  %v1052_v32 = vadd.f32 %v2412_v63, %v820_v28  ;;  %v1789_v3 = vpop.f32.mrf.mxu1 }
 0x151   :  { %v824_v35 = vpop.f32.mrf.mxu0 }
 0x152   :  { %1439 = vst.msk [vmem:[%s2724_s3 + $0x48] sm:$0xf] %vm1420_vm2, %v1660_v30  ;;  %v1193_v55 = vmax.f32 %v1052_v32, 0.0  ;;  %v825_v38 = vadd.f32 %v2350_v52, %v824_v35  ;;  %v2532_v5 = vpop.f32.mrf.mxu1 }
 0x153   :  { %v826_v58 = vpop.f32.mrf.mxu0 }
 0x154   :  { %v1661_v34 = vpack.c.bf16 %v1193_v55, %v1193_v55  ;;  %v1057_v42 = vadd.f32 %v2420_v8, %v825_v38  ;;  %v1792_v11 = vpop.f32.mrf.mxu1 }
 0x155   :  { %v827_v45 = vpop.f32.mrf.mxu0 }
 0x156   :  { %1440 = vst.msk [vmem:[%s2724_s3 + $0x4c] sm:$0xf] %vm1420_vm2, %v1661_v34  ;;  %v1194_v63 = vmax.f32 %v1057_v42, 0.0  ;;  %v828_v48 = vadd.f32 %v2350_v52, %v827_v45  ;;  %v2540_v13 = vpop.f32.mrf.mxu1 }
 0x157   :  { %v829_v1 = vpop.f32.mrf.mxu0 }
 0x158   :  { %v1662_v36 = vpack.c.bf16 %v1194_v63, %v1194_v63  ;;  %v1060_v54 = vadd.f32 %v2428_v16, %v828_v48  ;;  %v1793_v19 = vpop.f32.mrf.mxu1 }
 0x159   :  { %v832_v56 = vpop.f32.mrf.mxu0 }
 0x15a   :  { %1441 = vst.msk [vmem:[%s2724_s3 + $0x50] sm:$0xf] %vm1420_vm2, %v1662_v36  ;;  %v1195_v8 = vmax.f32 %v1060_v54, 0.0  ;;  %v833_v59 = vadd.f32 %v2350_v52, %v832_v56  ;;  %v2548_v21 = vpop.f32.mrf.mxu1 }
 0x15b   :  { %v834_v10 = vpop.f32.mrf.mxu0 }
 0x15c   :  { %v1663_v40 = vpack.c.bf16 %v1195_v8, %v1195_v8  ;;  %v1065_v62 = vadd.f32 %v2436_v24, %v833_v59  ;;  %v1796_v26 = vpop.f32.mrf.mxu1 }
 0x15d   :  { %v835_v0 = vpop.f32.mrf.mxu0 }
 0x15e   :  { %1442 = vst.msk [vmem:[%s2724_s3 + $0x54] sm:$0xf] %vm1420_vm2, %v1663_v40  ;;  %v1196_v16 = vmax.f32 %v1065_v62, 0.0  ;;  %v836_v4 = vadd.f32 %v2350_v52, %v835_v0  ;;  %v2556_v28 = vpop.f32.mrf.mxu1 }
 0x15f   :  { %v837_v18 = vpop.f32.mrf.mxu0 }
 0x160   :  { %v1664_v43 = vpack.c.bf16 %v1196_v16, %v1196_v16  ;;  %v1068_v7 = vadd.f32 %v2444_v31, %v836_v4  ;;  %v1797_v35 = vpop.f32.mrf.mxu1 }
 0x161   :  { %v840_v9 = vpop.f32.mrf.mxu0 }
 0x162   :  { %1443 = vst.msk [vmem:[%s2724_s3 + $0x58] sm:$0xf] %vm1420_vm2, %v1664_v43  ;;  %v1197_v24 = vmax.f32 %v1068_v7, 0.0  ;;  %v841_v12 = vadd.f32 %v2350_v52, %v840_v9  ;;  %v2564_v38 = vpop.f32.mrf.mxu1 }
 0x163   :  { %v842_v25 = vpop.f32.mrf.mxu0 }
 0x164   :  { %v1665_v47 = vpack.c.bf16 %v1197_v24, %v1197_v24  ;;  %v1073_v15 = vadd.f32 %v2452_v41, %v841_v12  ;;  %v1800_v45 = vpop.f32.mrf.mxu1 }
 0x165   :  { %v843_v17 = vpop.f32.mrf.mxu0 }
 0x166   :  { %1444 = vst.msk [vmem:[%s2724_s3 + $0x5c] sm:$0xf] %vm1420_vm2, %v1665_v47  ;;  %v1198_v31 = vmax.f32 %v1073_v15, 0.0  ;;  %v844_v20 = vadd.f32 %v2350_v52, %v843_v17  ;;  %v2572_v48 = vpop.f32.mrf.mxu1 }
 0x167   :  { %v845_v33 = vpop.f32.mrf.mxu0 }
 0x168   :  { %v1666_v49 = vpack.c.bf16 %v1198_v31, %v1198_v31  ;;  %v1076_v23 = vadd.f32 %v2460_v51, %v844_v20  ;;  %v1801_v56 = vpop.f32.mrf.mxu1 }
 0x169   :  { %v848_v2 = vpop.f32.mrf.mxu0 }
 0x16a   :  { %1445 = vst.msk [vmem:[%s2724_s3 + $0x60] sm:$0xf] %vm1420_vm2, %v1666_v49  ;;  %v1199_v41 = vmax.f32 %v1076_v23, 0.0  ;;  %v849_v27 = vadd.f32 %v2350_v52, %v848_v2  ;;  %v2580_v59 = vpop.f32.mrf.mxu1 }
 0x16b   :  { %v850_v44 = vpop.f32.mrf.mxu0 }
 0x16c   :  { %v1667_v53 = vpack.c.bf16 %v1199_v41, %v1199_v41  ;;  %v1081_v30 = vadd.f32 %v2468_v61, %v849_v27  ;;  %v1804_v0 = vpop.f32.mrf.mxu1 }
 0x16d   :  { %v851_v32 = vpop.f32.mrf.mxu0 }
 0x16e   :  { %1446 = vst.msk [vmem:[%s2724_s3 + $0x64] sm:$0xf] %vm1420_vm2, %v1667_v53  ;;  %v1200_v51 = vmax.f32 %v1081_v30, 0.0  ;;  %v852_v37 = vadd.f32 %v2350_v52, %v851_v32  ;;  %v2588_v4 = vpop.f32.mrf.mxu1 }
 0x16f   :  { %v853_v55 = vpop.f32.mrf.mxu0 }
 0x170   :  { %v1668_v58 = vpack.c.bf16 %v1200_v51, %v1200_v51  ;;  %v1084_v34 = vadd.f32 %v2476_v6, %v852_v37  ;;  %v1805_v9 = vpop.f32.mrf.mxu1 }
 0x171   :  { %v856_v42 = vpop.f32.mrf.mxu0 }
 0x172   :  { %1447 = vst.msk [vmem:[%s2724_s3 + $0x68] sm:$0xf] %vm1420_vm2, %v1668_v58  ;;  %v1201_v61 = vmax.f32 %v1084_v34, 0.0  ;;  %v857_v46 = vadd.f32 %v2350_v52, %v856_v42  ;;  %v2596_v12 = vpop.f32.mrf.mxu1 }
 0x173   :  { %v858_v63 = vpop.f32.mrf.mxu0 }
 0x174   :  { %v1669_v1 = vpack.c.bf16 %v1201_v61, %v1201_v61  ;;  %v1089_v36 = vadd.f32 %v2484_v14, %v857_v46  ;;  %v1808_v17 = vpop.f32.mrf.mxu1 }
 0x175   :  { %v859_v54 = vpop.f32.mrf.mxu0 }
 0x176   :  { %1448 = vst.msk [vmem:[%s2724_s3 + $0x6c] sm:$0xf] %vm1420_vm2, %v1669_v1  ;;  %v1202_v6 = vmax.f32 %v1089_v36, 0.0  ;;  %v860_v57 = vadd.f32 %v2350_v52, %v859_v54  ;;  %v2604_v20 = vpop.f32.mrf.mxu1 }
 0x177   :  { %v861_v8 = vpop.f32.mrf.mxu0 }
 0x178   :  { %v1670_v10 = vpack.c.bf16 %v1202_v6, %v1202_v6  ;;  %v1092_v40 = vadd.f32 %v2492_v22, %v860_v57  ;;  %v1809_v2 = vpop.f32.mrf.mxu1 }
 0x179   :  { %v864_v62 = vpop.f32.mrf.mxu0 }
 0x17a   :  { %1449 = vst.msk [vmem:[%s2724_s3 + $0x70] sm:$0xf] %vm1420_vm2, %v1670_v10  ;;  %v1203_v14 = vmax.f32 %v1092_v40, 0.0  ;;  %v865_v3 = vadd.f32 %v2350_v52, %v864_v62  ;;  %v2612_v27 = vpop.f32.mrf.mxu1 }
 0x17b   :  { %v866_v16 = vpop.f32.mrf.mxu0 }
 0x17c   :  { %v1671_v18 = vpack.c.bf16 %v1203_v14, %v1203_v14  ;;  %v1097_v43 = vadd.f32 %v2500_v29, %v865_v3  ;;  %v1812_v32 = vpop.f32.mrf.mxu1 }
 0x17d   :  { %v867_v7 = vpop.f32.mrf.mxu0 }
 0x17e   :  { %1450 = vst.msk [vmem:[%s2724_s3 + $0x74] sm:$0xf] %vm1420_vm2, %v1671_v18  ;;  %v1204_v22 = vmax.f32 %v1097_v43, 0.0  ;;  %v868_v11 = vadd.f32 %v2350_v52, %v867_v7  ;;  %v2620_v37 = vpop.f32.mrf.mxu1 }
 0x17f   :  { %v869_v24 = vpop.f32.mrf.mxu0 }
 0x180   :  { %v1672_v25 = vpack.c.bf16 %v1204_v22, %v1204_v22  ;;  %v1100_v47 = vadd.f32 %v2508_v39, %v868_v11  ;;  %v1813_v42 = vpop.f32.mrf.mxu1 }
 0x181   :  { %v872_v15 = vpop.f32.mrf.mxu0 }
 0x182   :  { %1451 = vst.msk [vmem:[%s2724_s3 + $0x78] sm:$0xf] %vm1420_vm2, %v1672_v25  ;;  %v1205_v29 = vmax.f32 %v1100_v47, 0.0  ;;  %v873_v19 = vadd.f32 %v2350_v52, %v872_v15  ;;  %v2628_v46 = vpop.f32.mrf.mxu1 }
 0x183   :  { %v874_v31 = vpop.f32.mrf.mxu0 }
 0x184   :  { %v1673_v33 = vpack.c.bf16 %v1205_v29, %v1205_v29  ;;  %v1105_v49 = vadd.f32 %v2516_v50, %v873_v19  ;;  %v1816_v54 = vpop.f32.mrf.mxu1 }
 0x185   :  { %v875_v23 = vpop.f32.mrf.mxu0 }
 0x186   :  { %1452 = vst.msk [vmem:[%s2724_s3 + $0x7c] sm:$0xf] %vm1420_vm2, %v1673_v33  ;;  %v1206_v39 = vmax.f32 %v1105_v49, 0.0  ;;  %v876_v26 = vadd.f32 %v2350_v52, %v875_v23  ;;  %v2636_v57 = vpop.f32.mrf.mxu1 }
 0x187   :  { %v877_v41 = vpop.f32.mrf.mxu0 }
 0x188   :  { %v1674_v44 = vpack.c.bf16 %v1206_v39, %v1206_v39  ;;  %v1108_v53 = vadd.f32 %v2524_v60, %v876_v26  ;;  %v1817_v62 = vpop.f32.mrf.mxu1 }
 0x189   :  { %v880_v30 = vpop.f32.mrf.mxu0 }
 0x18a   :  { %1453 = vst.msk [vmem:[%s2724_s3 + $0x80] sm:$0xf] %vm1420_vm2, %v1674_v44  ;;  %v1207_v50 = vmax.f32 %v1108_v53, 0.0  ;;  %v881_v35 = vadd.f32 %v2350_v52, %v880_v30  ;;  %v2644_v3 = vpop.f32.mrf.mxu1 }
 0x18b   :  { %v882_v51 = vpop.f32.mrf.mxu0 }
 0x18c   :  { %v1675_v55 = vpack.c.bf16 %v1207_v50, %v1207_v50  ;;  %v1113_v58 = vadd.f32 %v2532_v5, %v881_v35  ;;  %v1820_v7 = vpop.f32.mrf.mxu1 }
 0x18d   :  { %v883_v34 = vpop.f32.mrf.mxu0 }
 0x18e   :  { %1454 = vst.msk [vmem:[%s2724_s3 + $0x84] sm:$0xf] %vm1420_vm2, %v1675_v55  ;;  %v1208_v60 = vmax.f32 %v1113_v58, 0.0  ;;  %v884_v45 = vadd.f32 %v2350_v52, %v883_v34  ;;  %v1171_v11 = vpop.f32.mrf.mxu1 }
 0x18f   :  { %v885_v61 = vpop.f32.mrf.mxu0 }
 0x190   :  { %v1676_v63 = vpack.c.bf16 %v1208_v60, %v1208_v60  ;;  %v1116_v1 = vadd.f32 %v2540_v13, %v884_v45  ;;  %v1821_v15 = vpop.f32.mrf.mxu1 }
 0x191   :  { %v888_v36 = vpop.f32.mrf.mxu0 }
 0x192   :  { %1455 = vst.msk [vmem:[%s2724_s3 + $0x88] sm:$0xf] %vm1420_vm2, %v1676_v63  ;;  %v1209_v5 = vmax.f32 %v1116_v1, 0.0  ;;  %v889_v56 = vadd.f32 %v2350_v52, %v888_v36 }
 0x193   :  { %v890_v6 = vpop.f32.mrf.mxu0 }
 0x194   :  { %v1677_v8 = vpack.c.bf16 %v1209_v5, %v1209_v5  ;;  %v1121_v10 = vadd.f32 %v2548_v21, %v889_v56 }
 0x195   :  { %v891_v40 = vpop.f32.mrf.mxu0 }
 0x196   :  { %1456 = vst.msk [vmem:[%s2724_s3 + $0x8c] sm:$0xf] %vm1420_vm2, %v1677_v8  ;;  %v1210_v13 = vmax.f32 %v1121_v10, 0.0  ;;  %v892_v0 = vadd.f32 %v2350_v52, %v891_v40 }
 0x197   :  { %v893_v14 = vpop.f32.mrf.mxu0 }
 0x198   :  { %v1678_v16 = vpack.c.bf16 %v1210_v13, %v1210_v13  ;;  %v1124_v18 = vadd.f32 %v2556_v28, %v892_v0 }
 0x199   :  { %v896_v43 = vpop.f32.mrf.mxu0 }
 0x19a   :  { %1457 = vst.msk [vmem:[%s2724_s3 + $0x90] sm:$0xf] %vm1420_vm2, %v1678_v16  ;;  %v1211_v21 = vmax.f32 %v1124_v18, 0.0  ;;  %v897_v9 = vadd.f32 %v2350_v52, %v896_v43 }
 0x19b   :  { %v898_v22 = vpop.f32.mrf.mxu0 }
 0x19c   :  { %v1679_v24 = vpack.c.bf16 %v1211_v21, %v1211_v21  ;;  %v1129_v25 = vadd.f32 %v2564_v38, %v897_v9 }
 0x19d   :  { %v899_v47 = vpop.f32.mrf.mxu0 }
 0x19e   :  { %1458 = vst.msk [vmem:[%s2724_s3 + $0x94] sm:$0xf] %vm1420_vm2, %v1679_v24  ;;  %v1212_v28 = vmax.f32 %v1129_v25, 0.0  ;;  %v900_v17 = vadd.f32 %v2350_v52, %v899_v47 }
 0x19f   :  { %v901_v29 = vpop.f32.mrf.mxu0 }
 0x1a0   :  { %v1680_v19 = vpack.c.bf16 %v1212_v28, %v1212_v28  ;;  %v1132_v31 = vadd.f32 %v2572_v48, %v900_v17 }
 0x1a1   :  { %v904_v33 = vpop.f32.mrf.mxu0 }
 0x1a2   :  { %1459 = vst.msk [vmem:[%s2724_s3 + $0x98] sm:$0xf] %vm1420_vm2, %v1680_v19  ;;  %v1213_v38 = vmax.f32 %v1132_v31, 0.0  ;;  %v905_v49 = vadd.f32 %v2350_v52, %v904_v33 }
 0x1a3   :  { %v906_v23 = vpop.f32.mrf.mxu0 }
 0x1a4   :  { %v1681_v2 = vpack.c.bf16 %v1213_v38, %v1213_v38  ;;  %v1137_v39 = vadd.f32 %v2580_v59, %v905_v49 }
 0x1a5   :  { %v907_v26 = vpop.f32.mrf.mxu0 }
 0x1a6   :  { %1460 = vst.msk [vmem:[%s2724_s3 + $0x9c] sm:$0xf] %vm1420_vm2, %v1681_v2  ;;  %v1214_v48 = vmax.f32 %v1137_v39, 0.0  ;;  %v908_v41 = vadd.f32 %v2350_v52, %v907_v26 }
 0x1a7   :  { %v909_v44 = vpop.f32.mrf.mxu0 }
 0x1a8   :  { %v1682_v53 = vpack.c.bf16 %v1214_v48, %v1214_v48  ;;  %v1140_v30 = vadd.f32 %v2588_v4, %v908_v41 }
 0x1a9   :  { %v912_v32 = vpop.f32.mrf.mxu0 }
 0x1aa   :  { %1461 = vst.msk [vmem:[%s2724_s3 + $0xa0] sm:$0xf] %vm1420_vm2, %v1682_v53  ;;  %v1215_v59 = vmax.f32 %v1140_v30, 0.0  ;;  %v913_v50 = vadd.f32 %v2350_v52, %v912_v32 }
 0x1ab   :  { %v914_v35 = vpop.f32.mrf.mxu0 }
 0x1ac   :  { %v1683_v51 = vpack.c.bf16 %v1215_v59, %v1215_v59  ;;  %v1145_v55 = vadd.f32 %v2596_v12, %v913_v50 }
 0x1ad   :  { %v915_v58 = vpop.f32.mrf.mxu0 }
 0x1ae   :  { %1462 = vst.msk [vmem:[%s2724_s3 + $0xa4] sm:$0xf] %vm1420_vm2, %v1683_v51  ;;  %v1216_v4 = vmax.f32 %v1145_v55, 0.0  ;;  %v916_v34 = vadd.f32 %v2350_v52, %v915_v58 }
 0x1af   :  { %v917_v42 = vpop.f32.mrf.mxu0 }
 0x1b0   :  { %v1684_v60 = vpack.c.bf16 %v1216_v4, %v1216_v4  ;;  %v1148_v45 = vadd.f32 %v2604_v20, %v916_v34 }
 0x1b1   :  { %v920_v61 = vpop.f32.mrf.mxu0 }
 0x1b2   :  { %1463 = vst.msk [vmem:[%s2724_s3 + $0xa8] sm:$0xf] %vm1420_vm2, %v1684_v60  ;;  %v1217_v12 = vmax.f32 %v1148_v45, 0.0  ;;  %v921_v63 = vadd.f32 %v2350_v52, %v920_v61 }
 0x1b3   :  { %v922_v1 = vpop.f32.mrf.mxu0 }
 0x1b4   :  { %v1685_v36 = vpack.c.bf16 %v1217_v12, %v1217_v12  ;;  %v1153_v54 = vadd.f32 %v2612_v27, %v921_v63 }
 0x1b5   :  { %v923_v5 = vpop.f32.mrf.mxu0 }
 0x1b6   :  { %1464 = vst.msk [vmem:[%s2724_s3 + $0xac] sm:$0xf] %vm1420_vm2, %v1685_v36  ;;  %v1218_v20 = vmax.f32 %v1153_v54, 0.0  ;;  %v924_v56 = vadd.f32 %v2350_v52, %v923_v5 }
 0x1b7   :  { %v925_v6 = vpop.f32.mrf.mxu0 }
 0x1b8   :  { %v1686_v8 = vpack.c.bf16 %v1218_v20, %v1218_v20  ;;  %v1156_v10 = vadd.f32 %v2620_v37, %v924_v56 }
 0x1b9   :  { %v928_v40 = vpop.f32.mrf.mxu0 }
 0x1ba   :  { %1465 = vst.msk [vmem:[%s2724_s3 + $0xb0] sm:$0xf] %vm1420_vm2, %v1686_v8  ;;  %v1219_v27 = vmax.f32 %v1156_v10, 0.0  ;;  %v929_v62 = vadd.f32 %v2350_v52, %v928_v40 }
 0x1bb   :  { %v930_v13 = vpop.f32.mrf.mxu0 }
 0x1bc   :  { %v1687_v0 = vpack.c.bf16 %v1219_v27, %v1219_v27  ;;  %v1161_v14 = vadd.f32 %v2628_v46, %v929_v62 }
 0x1bd   :  { %v931_v16 = vpop.f32.mrf.mxu0 }
 0x1be   :  { %1466 = vst.msk [vmem:[%s2724_s3 + $0xb4] sm:$0xf] %vm1420_vm2, %v1687_v0  ;;  %v1220_v37 = vmax.f32 %v1161_v14, 0.0  ;;  %v932_v18 = vadd.f32 %v2350_v52, %v931_v16 }
 0x1bf   :  { %v933_v43 = vpop.f32.mrf.mxu0 }
 0x1c0   :  { %v1688_v7 = vpack.c.bf16 %v1220_v37, %v1220_v37  ;;  %v1164_v21 = vadd.f32 %v2636_v57, %v932_v18 }
 0x1c1   :  { %v936_v9 = vpop.f32.mrf.mxu0 }
 0x1c2   :  { %1467 = vst.msk [vmem:[%s2724_s3 + $0xb8] sm:$0xf] %vm1420_vm2, %v1688_v7  ;;  %v1221_v46 = vmax.f32 %v1164_v21, 0.0  ;;  %v937_v22 = vadd.f32 %v2350_v52, %v936_v9 }
 0x1c3   :  { %v938_v11 = vpop.f32.mrf.mxu0 }
 0x1c4   :  { %v1689_v24 = vpack.c.bf16 %v1221_v46, %v1221_v46  ;;  %v1169_v25 = vadd.f32 %v2644_v3, %v937_v22 }
 0x1c5   :  { %v939_v47 = vpop.f32.mrf.mxu0 }
 0x1c6   :  { %1468 = vst.msk [vmem:[%s2724_s3 + $0xbc] sm:$0xf] %vm1420_vm2, %v1689_v24  ;;  %v1222_v57 = vmax.f32 %v1169_v25, 0.0 }
 0x1c7   :  { %v940_v15 = vpop.f32.mrf.mxu0 }
 0x1c8   :  { %v1690_v28 = vpack.c.bf16 %v1222_v57, %v1222_v57 }
 0x1ca   :  { %1469 = vst.msk [vmem:[%s2724_s3 + $0xc0] sm:$0xf] %vm1420_vm2, %v1690_v28 }

// kernel: autoencoder_forward.11
= control target key start
LH: loop header
LB: loop body
LE: loop exit
PB: predicated region body
PF: predicated region fallthrough
CT: control target
= control target key end

     0   :  { %s1593_s14 = smov 0   ;;  %s1938_s0 = inlined_call_operand.vmem [shape: bf16[2048,144], index: 0, kind: input, shape index: {}]   ;;  %s1939_s1 = inlined_call_operand.vmem [shape: bf16[144,1], index: 1, kind: input, shape index: {}]   ;;  %s1940_s2 = inlined_call_operand.<no memory space> [shape: f32[1,1], index: 2, kind: input, shape index: {}]   ;;  %s1941_s3 = inlined_call_operand.vmem [shape: f32[2048,1], index: 3, kind: output, shape index: {}]  }
   0x1   :  { %v8_v0 = vstv %s1940_s2 }
   0x2   :  { %9 = vst [vmem:[#allocation2] sm:$0x1] %v8_v0 }
   0x3 LB: > { %s1182_s15 = sadd.s32 4294967295, %s1567_s14   ;;  %p1186_p0 = scmp.ge.s32.totalorder %s1567_s14, 1  ;;  %s1567_s14 = sphi %s1593_s14, %s15_s14  }
   0x4   : > { %p141_p1 = scmp.lt.s32.totalorder %s1567_s14, 5 }
   0x6   : > { %p142_p2 = pnand %p1186_p0, %p141_p1 }
   0x7   : > { %s1187_s2 = sshll.u32 (!%p142_p2), %s1182_s15, 6 }
   0x8   : > { %145 = sbr.rel (%p142_p2) target bundleno = 385 (0x181), region = 32  ;;  %p167_p3 = scmp.lt.s32.totalorder (!%p142_p2), %s1187_s2, 255 }
   0xd   : > { %v1328_v1 = vld [vmem:[%s1939_s1 + $0x38] sm:$0xff]   ;;  %v1569_v2 = vmov 0   ;;  %v1329_v3 = vld [vmem:[%s1939_s1 + $0x30] sm:$0xff]   ;;  %s1943_s2 = smov (!%p167_p3, %s1187_s2), 255  ;;  %v1330_v4 = vld [vmem:[%s1939_s1 + $0x28] sm:$0xff]   ;;  %vm611_vm0 = vcmask 130048  }
   0xe   : > { %708 = vmatprep.subr.bf16.mxu0 %v1569_v2  ;;  %1301 = vmatprep.subr.bf16.mxu1 %v1569_v2  ;;  %s1300_s22 = sshll.u32 %s1943_s2, 3  ;;  %v1331_v5 = vld [vmem:[%s1939_s1 + $0x20] sm:$0xff]   ;;  %v1332_v8 = vld [vmem:[%s1939_s1 + $0x18] sm:$0xff]   ;;  %v1333_v9 = vld [vmem:[%s1939_s1 + $0x10] sm:$0xff]   ;;  %vm1061_vm1 = vcmask 7168  }
   0xf   : > { %709 = vmatpush1.bf16.msra.mxu0 %v1328_v1  ;;  %1310 = vmatpush1.bf16.msra.mxu1 %v1328_v1  ;;  %s1618_s25 = scalar_lea.vmem %s1938_s0, %s1300_s22  ;;  %v1334_v10 = vld [vmem:[%s1939_s1 + $0x8] sm:$0xff]   ;;  %v1335_v11 = vld [vmem:[%s1939_s1] sm:$0xff]   ;;  %s1749_s13 = scalar_lea.vmem %s1941_s3, %s1300_s22 }
  0x10   : > { %710 = vmatprep.subr.bf16.mxu0 %v1569_v2  ;;  %1302 = vmatprep.subr.bf16.mxu1 %v1569_v2  ;;  %v1339_v6 = vld [vmem:[%s1618_s25 + $0x4] ss:$8 sps:$4 sm:$0xff]   ;;  %v1337_v13 = vld [vmem:[%s1618_s25] ss:$8 sps:$4 sm:$0xff]   ;;  %v1343_v15 = vld [vmem:[%s1618_s25 + $0x14] ss:$8 sps:$4 sm:$0xff]  }
  0x11   : > { %v1342_v7 = vld [vmem:[%s1618_s25 + $0x104] ss:$8 sps:$4 sm:$0xff]   ;;  %1266 = vmatprep.mubr.msk.bf16.mxu0 %vm611_vm0, %v1339_v6  ;;  %v1340_v14 = vld [vmem:[%s1618_s25 + $0x100] ss:$8 sps:$4 sm:$0xff]   ;;  %v1345_v16 = vld [vmem:[%s1618_s25 + $0x114] ss:$8 sps:$4 sm:$0xff]  }
  0x12   : > { %1282 = vmatprep.mubr.msk.bf16.mxu1 %vm611_vm0, %v1342_v7  ;;  %v1336_v12 = vld [vmem:[%s1939_s1 + $0x40] sm:$0xff]   ;;  %v1347_v17 = vld [vmem:[%s1618_s25 + $0x10] ss:$8 sps:$4 sm:$0xff]   ;;  %v1355_v23 = vld [vmem:[%s1618_s25 + $0x34] ss:$8 sps:$4 sm:$0xff]  }
  0x13   : > { %711 = vmatpush1.bf16.msra.mxu0 %v1329_v3  ;;  %1311 = vmatpush1.bf16.msra.mxu1 %v1329_v3  ;;  %v1348_v18 = vld [vmem:[%s1618_s25 + $0x110] ss:$8 sps:$4 sm:$0xff]   ;;  %v1349_v19 = vld [vmem:[%s1618_s25 + $0x24] ss:$8 sps:$4 sm:$0xff]   ;;  %v1353_v21 = vld [vmem:[%s1618_s25 + $0x20] ss:$8 sps:$4 sm:$0xff]  }
  0x14   : > { %712 = vmatprep.subr.bf16.mxu0 %v1569_v2  ;;  %1303 = vmatprep.subr.bf16.mxu1 %v1569_v2  ;;  %v1351_v20 = vld [vmem:[%s1618_s25 + $0x124] ss:$8 sps:$4 sm:$0xff]   ;;  %v1354_v22 = vld [vmem:[%s1618_s25 + $0x120] ss:$8 sps:$4 sm:$0xff]   ;;  %v1357_v24 = vld [vmem:[%s1618_s25 + $0x134] ss:$8 sps:$4 sm:$0xff]  }
  0x15   : > { %v1359_v25 = vld [vmem:[%s1618_s25 + $0x30] ss:$8 sps:$4 sm:$0xff]   ;;  %v1361_v27 = vld [vmem:[%s1618_s25 + $0x44] ss:$8 sps:$4 sm:$0xff]   ;;  %v1365_v29 = vld [vmem:[%s1618_s25 + $0x40] ss:$8 sps:$4 sm:$0xff]  }
  0x16   : > { %v1360_v26 = vld [vmem:[%s1618_s25 + $0x130] ss:$8 sps:$4 sm:$0xff]   ;;  %v1363_v28 = vld [vmem:[%s1618_s25 + $0x144] ss:$8 sps:$4 sm:$0xff]   ;;  %v1366_v30 = vld [vmem:[%s1618_s25 + $0x140] ss:$8 sps:$4 sm:$0xff]  }
  0x17   : > { %713 = vmatpush1.bf16.msra.mxu0 %v1330_v4  ;;  %1312 = vmatpush1.bf16.msra.mxu1 %v1330_v4  ;;  %v1367_v31 = vld [vmem:[%s1618_s25 + $0x54] ss:$8 sps:$4 sm:$0xff]   ;;  %v1371_v33 = vld [vmem:[%s1618_s25 + $0x50] ss:$8 sps:$4 sm:$0xff]   ;;  %v1373_v35 = vld [vmem:[%s1618_s25 + $0x64] ss:$8 sps:$4 sm:$0xff]  }
  0x18   : > { %714 = vmatprep.subr.bf16.mxu0 %v1569_v2  ;;  %1304 = vmatprep.subr.bf16.mxu1 %v1569_v2  ;;  %v1369_v32 = vld [vmem:[%s1618_s25 + $0x154] ss:$8 sps:$4 sm:$0xff]   ;;  %v1372_v34 = vld [vmem:[%s1618_s25 + $0x150] ss:$8 sps:$4 sm:$0xff]   ;;  %v1375_v36 = vld [vmem:[%s1618_s25 + $0x164] ss:$8 sps:$4 sm:$0xff]  }
  0x19   : > { %v1377_v37 = vld [vmem:[%s1618_s25 + $0x60] ss:$8 sps:$4 sm:$0xff]   ;;  %v1379_v39 = vld [vmem:[%s1618_s25 + $0x74] ss:$8 sps:$4 sm:$0xff]   ;;  %v1383_v41 = vld [vmem:[%s1618_s25 + $0x70] ss:$8 sps:$4 sm:$0xff]  }
  0x1a   : > { %v1378_v38 = vld [vmem:[%s1618_s25 + $0x160] ss:$8 sps:$4 sm:$0xff]   ;;  %v1381_v40 = vld [vmem:[%s1618_s25 + $0x174] ss:$8 sps:$4 sm:$0xff]   ;;  %v1384_v42 = vld [vmem:[%s1618_s25 + $0x170] ss:$8 sps:$4 sm:$0xff]  }
  0x1b   : > { %715 = vmatpush1.bf16.msra.mxu0 %v1331_v5  ;;  %1313 = vmatpush1.bf16.msra.mxu1 %v1331_v5  ;;  %v1385_v43 = vld [vmem:[%s1618_s25 + $0x84] ss:$8 sps:$4 sm:$0xff]   ;;  %v1389_v45 = vld [vmem:[%s1618_s25 + $0x80] ss:$8 sps:$4 sm:$0xff]   ;;  %v1391_v47 = vld [vmem:[%s1618_s25 + $0x94] ss:$8 sps:$4 sm:$0xff]  }
  0x1c   : > { %716 = vmatprep.subr.bf16.mxu0 %v1569_v2  ;;  %1305 = vmatprep.subr.bf16.mxu1 %v1569_v2  ;;  %v1387_v44 = vld [vmem:[%s1618_s25 + $0x184] ss:$8 sps:$4 sm:$0xff]   ;;  %v1390_v46 = vld [vmem:[%s1618_s25 + $0x180] ss:$8 sps:$4 sm:$0xff]   ;;  %v1393_v48 = vld [vmem:[%s1618_s25 + $0x194] ss:$8 sps:$4 sm:$0xff]  }
  0x1d   : > { %v1395_v49 = vld [vmem:[%s1618_s25 + $0x90] ss:$8 sps:$4 sm:$0xff]   ;;  %v1397_v51 = vld [vmem:[%s1618_s25 + $0xa4] ss:$8 sps:$4 sm:$0xff]   ;;  %v1401_v53 = vld [vmem:[%s1618_s25 + $0xa0] ss:$8 sps:$4 sm:$0xff]  }
  0x1e   : > { %v1396_v50 = vld [vmem:[%s1618_s25 + $0x190] ss:$8 sps:$4 sm:$0xff]   ;;  %v1399_v52 = vld [vmem:[%s1618_s25 + $0x1a4] ss:$8 sps:$4 sm:$0xff]   ;;  %v1402_v54 = vld [vmem:[%s1618_s25 + $0x1a0] ss:$8 sps:$4 sm:$0xff]  }
  0x1f   : > { %717 = vmatpush1.bf16.msra.mxu0 %v1332_v8  ;;  %1314 = vmatpush1.bf16.msra.mxu1 %v1332_v8  ;;  %v1403_v55 = vld [vmem:[%s1618_s25 + $0xb4] ss:$8 sps:$4 sm:$0xff]   ;;  %v1407_v57 = vld [vmem:[%s1618_s25 + $0xb0] ss:$8 sps:$4 sm:$0xff]   ;;  %v1409_v59 = vld [vmem:[%s1618_s25 + $0xc4] ss:$8 sps:$4 sm:$0xff]  }
  0x20   : > { %718 = vmatprep.subr.bf16.mxu0 %v1569_v2  ;;  %1306 = vmatprep.subr.bf16.mxu1 %v1569_v2  ;;  %v1405_v56 = vld [vmem:[%s1618_s25 + $0x1b4] ss:$8 sps:$4 sm:$0xff]   ;;  %v1408_v58 = vld [vmem:[%s1618_s25 + $0x1b0] ss:$8 sps:$4 sm:$0xff]   ;;  %v1411_v60 = vld [vmem:[%s1618_s25 + $0x1c4] ss:$8 sps:$4 sm:$0xff]  }
  0x21   : > { %v1413_v61 = vld [vmem:[%s1618_s25 + $0xc0] ss:$8 sps:$4 sm:$0xff]   ;;  %v1415_v63 = vld [vmem:[%s1618_s25 + $0xd4] ss:$8 sps:$4 sm:$0xff]   ;;  %v1419_v1 = vld [vmem:[%s1618_s25 + $0xd0] ss:$8 sps:$4 sm:$0xff]  }
  0x22   : > { %v1414_v62 = vld [vmem:[%s1618_s25 + $0x1c0] ss:$8 sps:$4 sm:$0xff]   ;;  %v1417_v0 = vld [vmem:[%s1618_s25 + $0x1d4] ss:$8 sps:$4 sm:$0xff]   ;;  %v1421_v3 = vld [vmem:[%s1618_s25 + $0xe4] ss:$8 sps:$4 sm:$0xff]  }
  0x23   : > { %719 = vmatpush1.bf16.msra.mxu0 %v1333_v9  ;;  %1315 = vmatpush1.bf16.msra.mxu1 %v1333_v9  ;;  %v1423_v4 = vld [vmem:[%s1618_s25 + $0x1e4] ss:$8 sps:$4 sm:$0xff]   ;;  %v1425_v5 = vld [vmem:[%s1618_s25 + $0xe0] ss:$8 sps:$4 sm:$0xff]   ;;  %v1427_v7 = vld [vmem:[%s1618_s25 + $0xf4] ss:$8 sps:$4 sm:$0xff]  }
  0x24   : > { %720 = vmatprep.subr.bf16.mxu0 %v1569_v2  ;;  %1307 = vmatprep.subr.bf16.mxu1 %v1569_v2  ;;  %v1426_v6 = vld [vmem:[%s1618_s25 + $0x1e0] ss:$8 sps:$4 sm:$0xff]   ;;  %v1429_v8 = vld [vmem:[%s1618_s25 + $0x1f4] ss:$8 sps:$4 sm:$0xff]   ;;  %v1431_v9 = vld [vmem:[%s1618_s25 + $0xf0] ss:$8 sps:$4 sm:$0xff]  }
  0x27   : > { %721 = vmatpush1.bf16.msra.mxu0 %v1334_v10  ;;  %1316 = vmatpush1.bf16.msra.mxu1 %v1334_v10  ;;  %v1432_v10 = vld [vmem:[%s1618_s25 + $0x1f0] ss:$8 sps:$4 sm:$0xff]  }
  0x28   : > { %722 = vmatprep.subr.bf16.mxu0 %v1569_v2  ;;  %1308 = vmatprep.subr.bf16.mxu1 %v1569_v2 }
  0x2b   : > { %723 = vmatpush1.bf16.msra.mxu0 %v1335_v11  ;;  %1317 = vmatpush1.bf16.msra.mxu1 %v1335_v11  ;;  %v1734_v11 = vld [vmem:[#allocation2] ss:$0 sm:$0xff] }
  0x2c   : > { %738 = vmatprep.subr.bf16.mxu0 %v1569_v2  ;;  %1309 = vmatprep.subr.bf16.mxu1 %v1569_v2  ;;  %v1420_v2 = vld [vmem:[%s1618_s25 + $0x1d0] ss:$8 sps:$4 sm:$0xff]  }
  0x2f   : > { %739 = vmatpush2.bf16.msra.mxu0 %v1336_v12  ;;  %1318 = vmatpush2.bf16.msra.mxu1 %v1336_v12 }
  0x32   : > { %741 = vmatmul.mubr.bf16.vlgmr.msra.gmra.mxu0 %v1337_v13  ;;  %869 = vmatmul.mubr.bf16.vlgmr.msra.gmra.mxu1 %v1340_v14 }
  0x33   : > { %1267 = vmatprep.mubr.msk.bf16.mxu0 %vm611_vm0, %v1343_v15  ;;  %1283 = vmatprep.mubr.msk.bf16.mxu1 %vm611_vm0, %v1345_v16 }
  0x3a   : > { %749 = vmatmul.mubr.bf16.gmra.mxu0 %v1347_v17  ;;  %877 = vmatmul.mubr.bf16.gmra.mxu1 %v1348_v18 }
  0x3b   : > { %1268 = vmatprep.mubr.msk.bf16.mxu0 %vm611_vm0, %v1349_v19  ;;  %1284 = vmatprep.mubr.msk.bf16.mxu1 %vm611_vm0, %v1351_v20 }
  0x42   : > { %757 = vmatmul.mubr.bf16.gmra.mxu0 %v1353_v21  ;;  %885 = vmatmul.mubr.bf16.gmra.mxu1 %v1354_v22 }
  0x43   : > { %1269 = vmatprep.mubr.msk.bf16.mxu0 %vm611_vm0, %v1355_v23  ;;  %1285 = vmatprep.mubr.msk.bf16.mxu1 %vm611_vm0, %v1357_v24 }
  0x4a   : > { %765 = vmatmul.mubr.bf16.gmra.mxu0 %v1359_v25  ;;  %893 = vmatmul.mubr.bf16.gmra.mxu1 %v1360_v26 }
  0x4b   : > { %1270 = vmatprep.mubr.msk.bf16.mxu0 %vm611_vm0, %v1361_v27  ;;  %1286 = vmatprep.mubr.msk.bf16.mxu1 %vm611_vm0, %v1363_v28 }
  0x52   : > { %773 = vmatmul.mubr.bf16.gmra.mxu0 %v1365_v29  ;;  %901 = vmatmul.mubr.bf16.gmra.mxu1 %v1366_v30 }
  0x53   : > { %1271 = vmatprep.mubr.msk.bf16.mxu0 %vm611_vm0, %v1367_v31  ;;  %1287 = vmatprep.mubr.msk.bf16.mxu1 %vm611_vm0, %v1369_v32 }
  0x5a   : > { %781 = vmatmul.mubr.bf16.gmra.mxu0 %v1371_v33  ;;  %909 = vmatmul.mubr.bf16.gmra.mxu1 %v1372_v34 }
  0x5b   : > { %1272 = vmatprep.mubr.msk.bf16.mxu0 %vm611_vm0, %v1373_v35  ;;  %1288 = vmatprep.mubr.msk.bf16.mxu1 %vm611_vm0, %v1375_v36 }
  0x62   : > { %789 = vmatmul.mubr.bf16.gmra.mxu0 %v1377_v37  ;;  %917 = vmatmul.mubr.bf16.gmra.mxu1 %v1378_v38 }
  0x63   : > { %1273 = vmatprep.mubr.msk.bf16.mxu0 %vm611_vm0, %v1379_v39  ;;  %1289 = vmatprep.mubr.msk.bf16.mxu1 %vm611_vm0, %v1381_v40 }
  0x6a   : > { %797 = vmatmul.mubr.bf16.gmra.mxu0 %v1383_v41  ;;  %925 = vmatmul.mubr.bf16.gmra.mxu1 %v1384_v42 }
  0x6b   : > { %1274 = vmatprep.mubr.msk.bf16.mxu0 %vm611_vm0, %v1385_v43  ;;  %1290 = vmatprep.mubr.msk.bf16.mxu1 %vm611_vm0, %v1387_v44 }
  0x72   : > { %805 = vmatmul.mubr.bf16.gmra.mxu0 %v1389_v45  ;;  %933 = vmatmul.mubr.bf16.gmra.mxu1 %v1390_v46 }
  0x73   : > { %1275 = vmatprep.mubr.msk.bf16.mxu0 %vm611_vm0, %v1391_v47  ;;  %1291 = vmatprep.mubr.msk.bf16.mxu1 %vm611_vm0, %v1393_v48 }
  0x7a   : > { %813 = vmatmul.mubr.bf16.gmra.mxu0 %v1395_v49  ;;  %941 = vmatmul.mubr.bf16.gmra.mxu1 %v1396_v50 }
  0x7b   : > { %1276 = vmatprep.mubr.msk.bf16.mxu0 %vm611_vm0, %v1397_v51  ;;  %1292 = vmatprep.mubr.msk.bf16.mxu1 %vm611_vm0, %v1399_v52 }
  0x82   : > { %821 = vmatmul.mubr.bf16.gmra.mxu0 %v1401_v53  ;;  %949 = vmatmul.mubr.bf16.gmra.mxu1 %v1402_v54 }
  0x83   : > { %1277 = vmatprep.mubr.msk.bf16.mxu0 %vm611_vm0, %v1403_v55  ;;  %1293 = vmatprep.mubr.msk.bf16.mxu1 %vm611_vm0, %v1405_v56 }
  0x8a   : > { %829 = vmatmul.mubr.bf16.gmra.mxu0 %v1407_v57  ;;  %957 = vmatmul.mubr.bf16.gmra.mxu1 %v1408_v58 }
  0x8b   : > { %1278 = vmatprep.mubr.msk.bf16.mxu0 %vm611_vm0, %v1409_v59  ;;  %1294 = vmatprep.mubr.msk.bf16.mxu1 %vm611_vm0, %v1411_v60 }
  0x92   : > { %837 = vmatmul.mubr.bf16.gmra.mxu0 %v1413_v61  ;;  %965 = vmatmul.mubr.bf16.gmra.mxu1 %v1414_v62 }
  0x93   : > { %1279 = vmatprep.mubr.msk.bf16.mxu0 %vm611_vm0, %v1415_v63  ;;  %1295 = vmatprep.mubr.msk.bf16.mxu1 %vm611_vm0, %v1417_v0 }
  0x9a   : > { %845 = vmatmul.mubr.bf16.gmra.mxu0 %v1419_v1  ;;  %973 = vmatmul.mubr.bf16.gmra.mxu1 %v1420_v2 }
  0x9b   : > { %1280 = vmatprep.mubr.msk.bf16.mxu0 %vm611_vm0, %v1421_v3  ;;  %1296 = vmatprep.mubr.msk.bf16.mxu1 %vm611_vm0, %v1423_v4 }
  0xa2   : > { %853 = vmatmul.mubr.bf16.gmra.mxu0 %v1425_v5  ;;  %981 = vmatmul.mubr.bf16.gmra.mxu1 %v1426_v6 }
  0xa3   : > { %1281 = vmatprep.mubr.msk.bf16.mxu0 %vm611_vm0, %v1427_v7  ;;  %1297 = vmatprep.mubr.msk.bf16.mxu1 %vm611_vm0, %v1429_v8 }
  0xaa   : > { %861 = vmatmul.mubr.bf16.gmra.mxu0 %v1431_v9  ;;  %989 = vmatmul.mubr.bf16.gmra.mxu1 %v1432_v10 }
  0xf2   : > { %v742_v12 = vpop.f32.mrf.mxu0  ;;  %v870_v13 = vpop.f32.mrf.mxu1 }
  0xf3   : > { %v743_v14 = vadd.f32 %v1734_v11, %v742_v12  ;;  %v871_v15 = vadd.f32 %v1734_v11, %v870_v13 }
  0xf4   : > { %v744_v16 = vpop.f32.mrf.mxu0  ;;  %v872_v17 = vpop.f32.mrf.mxu1 }
  0xf5   : > { %1433 = vtanh.f32 %v743_v14 }
  0xf6   : > { %1435 = vtanh.f32 %v871_v15  ;;  %v745_v18 = vpop.f32.mrf.mxu0  ;;  %v873_v19 = vpop.f32.mrf.mxu1 }
  0xf7   : > { %v746_v20 = vadd.f32 %v1734_v11, %v745_v18  ;;  %v874_v21 = vadd.f32 %v1734_v11, %v873_v19 }
  0xf8   : > { %v747_v22 = vpop.f32.mrf.mxu0  ;;  %v875_v23 = vpop.f32.mrf.mxu1 }
  0xf9   : > { %1437 = vtanh.f32 %v746_v20 }
  0xfa   : > { %1439 = vtanh.f32 %v874_v21  ;;  %v750_v24 = vpop.f32.mrf.mxu0  ;;  %v878_v25 = vpop.f32.mrf.mxu1 }
  0xfb   : > { %v751_v26 = vadd.f32 %v1734_v11, %v750_v24  ;;  %v879_v27 = vadd.f32 %v1734_v11, %v878_v25 }
  0xfc   : > { %v752_v28 = vpop.f32.mrf.mxu0  ;;  %v880_v29 = vpop.f32.mrf.mxu1 }
  0xfd   : > { %1441 = vtanh.f32 %v751_v26 }
  0xfe   : > { %1443 = vtanh.f32 %v879_v27  ;;  %v753_v30 = vpop.f32.mrf.mxu0  ;;  %v881_v31 = vpop.f32.mrf.mxu1 }
  0xff   : > { %v754_v32 = vadd.f32 %v1734_v11, %v753_v30  ;;  %v882_v33 = vadd.f32 %v1734_v11, %v881_v31 }
 0x100   : > { %v755_v34 = vpop.f32.mrf.mxu0  ;;  %v883_v35 = vpop.f32.mrf.mxu1 }
 0x101   : > { %1445 = vtanh.f32 %v754_v32 }
 0x102   : > { %v1434_v36 = vpop.eup %1433  ;;  %1447 = vtanh.f32 %v882_v33  ;;  %v758_v37 = vpop.f32.mrf.mxu0 }
 0x103   : > { %v886_v38 = vpop.f32.mrf.mxu1  ;;  %v1436_v39 = vpop.eup %1435  ;;  %1062 = vst.msk [vmem:[%s1749_s13] sm:$0xff] %vm1061_vm1, %v1434_v36  ;;  %v759_v40 = vadd.f32 %v1734_v11, %v758_v37 }
 0x104   : > { %v887_v41 = vadd.f32 %v1734_v11, %v886_v38  ;;  %1094 = vst.msk [vmem:[%s1749_s13 + $0x100] sm:$0xff] %vm1061_vm1, %v1436_v39  ;;  %v760_v42 = vpop.f32.mrf.mxu0 }
 0x105   : > { %v888_v43 = vpop.f32.mrf.mxu1  ;;  %1449 = vtanh.f32 %v759_v40 }
 0x106   : > { %v1438_v44 = vpop.eup %1437  ;;  %1451 = vtanh.f32 %v887_v41  ;;  %v761_v45 = vpop.f32.mrf.mxu0 }
 0x107   : > { %v889_v46 = vpop.f32.mrf.mxu1  ;;  %v1440_v47 = vpop.eup %1439  ;;  %1063 = vst.msk [vmem:[%s1749_s13 + $0x8] sm:$0xff] %vm1061_vm1, %v1438_v44  ;;  %v762_v48 = vadd.f32 %v1734_v11, %v761_v45 }
 0x108   : > { %v890_v49 = vadd.f32 %v1734_v11, %v889_v46  ;;  %1095 = vst.msk [vmem:[%s1749_s13 + $0x108] sm:$0xff] %vm1061_vm1, %v1440_v47  ;;  %v763_v50 = vpop.f32.mrf.mxu0 }
 0x109   : > { %v891_v51 = vpop.f32.mrf.mxu1  ;;  %1453 = vtanh.f32 %v762_v48 }
 0x10a   : > { %v1442_v52 = vpop.eup %1441  ;;  %1455 = vtanh.f32 %v890_v49  ;;  %v766_v53 = vpop.f32.mrf.mxu0 }
 0x10b   : > { %v894_v54 = vpop.f32.mrf.mxu1  ;;  %v1444_v55 = vpop.eup %1443  ;;  %1064 = vst.msk [vmem:[%s1749_s13 + $0x10] sm:$0xff] %vm1061_vm1, %v1442_v52  ;;  %v767_v56 = vadd.f32 %v1734_v11, %v766_v53 }
 0x10c   : > { %v895_v57 = vadd.f32 %v1734_v11, %v894_v54  ;;  %1096 = vst.msk [vmem:[%s1749_s13 + $0x110] sm:$0xff] %vm1061_vm1, %v1444_v55  ;;  %v768_v58 = vpop.f32.mrf.mxu0 }
 0x10d   : > { %v896_v59 = vpop.f32.mrf.mxu1  ;;  %1457 = vtanh.f32 %v767_v56 }
 0x10e   : > { %v1446_v60 = vpop.eup %1445  ;;  %1459 = vtanh.f32 %v895_v57  ;;  %v769_v61 = vpop.f32.mrf.mxu0 }
 0x10f   : > { %v897_v62 = vpop.f32.mrf.mxu1  ;;  %v1448_v63 = vpop.eup %1447  ;;  %1065 = vst.msk [vmem:[%s1749_s13 + $0x18] sm:$0xff] %vm1061_vm1, %v1446_v60  ;;  %v770_v0 = vadd.f32 %v1734_v11, %v769_v61 }
 0x110   : > { %v898_v1 = vadd.f32 %v1734_v11, %v897_v62  ;;  %1097 = vst.msk [vmem:[%s1749_s13 + $0x118] sm:$0xff] %vm1061_vm1, %v1448_v63  ;;  %v771_v2 = vpop.f32.mrf.mxu0 }
 0x111   : > { %v899_v3 = vpop.f32.mrf.mxu1  ;;  %1461 = vtanh.f32 %v770_v0 }
 0x112   : > { %v1450_v4 = vpop.eup %1449  ;;  %1463 = vtanh.f32 %v898_v1  ;;  %v774_v5 = vpop.f32.mrf.mxu0 }
 0x113   : > { %v902_v6 = vpop.f32.mrf.mxu1  ;;  %v1452_v7 = vpop.eup %1451  ;;  %1066 = vst.msk [vmem:[%s1749_s13 + $0x20] sm:$0xff] %vm1061_vm1, %v1450_v4  ;;  %v775_v8 = vadd.f32 %v1734_v11, %v774_v5 }
 0x114   : > { %v903_v9 = vadd.f32 %v1734_v11, %v902_v6  ;;  %1098 = vst.msk [vmem:[%s1749_s13 + $0x120] sm:$0xff] %vm1061_vm1, %v1452_v7  ;;  %v776_v10 = vpop.f32.mrf.mxu0 }
 0x115   : > { %v904_v12 = vpop.f32.mrf.mxu1  ;;  %1465 = vtanh.f32 %v775_v8 }
 0x116   : > { %v1454_v13 = vpop.eup %1453  ;;  %1467 = vtanh.f32 %v903_v9  ;;  %v777_v14 = vpop.f32.mrf.mxu0 }
 0x117   : > { %v905_v15 = vpop.f32.mrf.mxu1  ;;  %v1456_v16 = vpop.eup %1455  ;;  %1067 = vst.msk [vmem:[%s1749_s13 + $0x28] sm:$0xff] %vm1061_vm1, %v1454_v13  ;;  %v778_v17 = vadd.f32 %v1734_v11, %v777_v14 }
 0x118   : > { %v906_v18 = vadd.f32 %v1734_v11, %v905_v15  ;;  %1099 = vst.msk [vmem:[%s1749_s13 + $0x128] sm:$0xff] %vm1061_vm1, %v1456_v16  ;;  %v779_v19 = vpop.f32.mrf.mxu0 }
 0x119   : > { %v907_v20 = vpop.f32.mrf.mxu1  ;;  %1469 = vtanh.f32 %v778_v17 }
 0x11a   : > { %v1458_v21 = vpop.eup %1457  ;;  %1471 = vtanh.f32 %v906_v18  ;;  %v782_v22 = vpop.f32.mrf.mxu0 }
 0x11b   : > { %v910_v23 = vpop.f32.mrf.mxu1  ;;  %v1460_v24 = vpop.eup %1459  ;;  %1068 = vst.msk [vmem:[%s1749_s13 + $0x30] sm:$0xff] %vm1061_vm1, %v1458_v21  ;;  %v783_v25 = vadd.f32 %v1734_v11, %v782_v22 }
 0x11c   : > { %v911_v26 = vadd.f32 %v1734_v11, %v910_v23  ;;  %1100 = vst.msk [vmem:[%s1749_s13 + $0x130] sm:$0xff] %vm1061_vm1, %v1460_v24  ;;  %v784_v27 = vpop.f32.mrf.mxu0 }
 0x11d   : > { %v912_v28 = vpop.f32.mrf.mxu1  ;;  %1473 = vtanh.f32 %v783_v25 }
 0x11e   : > { %v1462_v29 = vpop.eup %1461  ;;  %1475 = vtanh.f32 %v911_v26  ;;  %v785_v30 = vpop.f32.mrf.mxu0 }
 0x11f   : > { %v913_v31 = vpop.f32.mrf.mxu1  ;;  %v1464_v32 = vpop.eup %1463  ;;  %1069 = vst.msk [vmem:[%s1749_s13 + $0x38] sm:$0xff] %vm1061_vm1, %v1462_v29  ;;  %v786_v33 = vadd.f32 %v1734_v11, %v785_v30 }
 0x120   : > { %v914_v34 = vadd.f32 %v1734_v11, %v913_v31  ;;  %1101 = vst.msk [vmem:[%s1749_s13 + $0x138] sm:$0xff] %vm1061_vm1, %v1464_v32  ;;  %v787_v35 = vpop.f32.mrf.mxu0 }
 0x121   : > { %v915_v36 = vpop.f32.mrf.mxu1  ;;  %1477 = vtanh.f32 %v786_v33 }
 0x122   : > { %v1466_v37 = vpop.eup %1465  ;;  %1479 = vtanh.f32 %v914_v34  ;;  %v790_v38 = vpop.f32.mrf.mxu0 }
 0x123   : > { %v918_v39 = vpop.f32.mrf.mxu1  ;;  %v1468_v40 = vpop.eup %1467  ;;  %1070 = vst.msk [vmem:[%s1749_s13 + $0x40] sm:$0xff] %vm1061_vm1, %v1466_v37  ;;  %v791_v41 = vadd.f32 %v1734_v11, %v790_v38 }
 0x124   : > { %v919_v42 = vadd.f32 %v1734_v11, %v918_v39  ;;  %1102 = vst.msk [vmem:[%s1749_s13 + $0x140] sm:$0xff] %vm1061_vm1, %v1468_v40  ;;  %v792_v43 = vpop.f32.mrf.mxu0 }
 0x125   : > { %v920_v44 = vpop.f32.mrf.mxu1  ;;  %1481 = vtanh.f32 %v791_v41 }
 0x126   : > { %v1470_v45 = vpop.eup %1469  ;;  %1483 = vtanh.f32 %v919_v42  ;;  %v793_v46 = vpop.f32.mrf.mxu0 }
 0x127   : > { %v921_v47 = vpop.f32.mrf.mxu1  ;;  %v1472_v48 = vpop.eup %1471  ;;  %1071 = vst.msk [vmem:[%s1749_s13 + $0x48] sm:$0xff] %vm1061_vm1, %v1470_v45  ;;  %v794_v49 = vadd.f32 %v1734_v11, %v793_v46 }
 0x128   : > { %v922_v50 = vadd.f32 %v1734_v11, %v921_v47  ;;  %1103 = vst.msk [vmem:[%s1749_s13 + $0x148] sm:$0xff] %vm1061_vm1, %v1472_v48  ;;  %v795_v51 = vpop.f32.mrf.mxu0 }
 0x129   : > { %v923_v52 = vpop.f32.mrf.mxu1  ;;  %1485 = vtanh.f32 %v794_v49 }
 0x12a   : > { %v1474_v53 = vpop.eup %1473  ;;  %1487 = vtanh.f32 %v922_v50  ;;  %v798_v54 = vpop.f32.mrf.mxu0 }
 0x12b   : > { %v926_v55 = vpop.f32.mrf.mxu1  ;;  %v1476_v56 = vpop.eup %1475  ;;  %1072 = vst.msk [vmem:[%s1749_s13 + $0x50] sm:$0xff] %vm1061_vm1, %v1474_v53  ;;  %v799_v57 = vadd.f32 %v1734_v11, %v798_v54 }
 0x12c   : > { %v927_v58 = vadd.f32 %v1734_v11, %v926_v55  ;;  %1104 = vst.msk [vmem:[%s1749_s13 + $0x150] sm:$0xff] %vm1061_vm1, %v1476_v56  ;;  %v800_v59 = vpop.f32.mrf.mxu0 }
 0x12d   : > { %v928_v60 = vpop.f32.mrf.mxu1  ;;  %1489 = vtanh.f32 %v799_v57 }
 0x12e   : > { %v1478_v61 = vpop.eup %1477  ;;  %1491 = vtanh.f32 %v927_v58  ;;  %v801_v62 = vpop.f32.mrf.mxu0 }
 0x12f   : > { %v929_v63 = vpop.f32.mrf.mxu1  ;;  %v1480_v0 = vpop.eup %1479  ;;  %1073 = vst.msk [vmem:[%s1749_s13 + $0x58] sm:$0xff] %vm1061_vm1, %v1478_v61  ;;  %v802_v1 = vadd.f32 %v1734_v11, %v801_v62 }
 0x130   : > { %v930_v2 = vadd.f32 %v1734_v11, %v929_v63  ;;  %1105 = vst.msk [vmem:[%s1749_s13 + $0x158] sm:$0xff] %vm1061_vm1, %v1480_v0  ;;  %v803_v3 = vpop.f32.mrf.mxu0 }
 0x131   : > { %v931_v4 = vpop.f32.mrf.mxu1  ;;  %1493 = vtanh.f32 %v802_v1 }
 0x132   : > { %v1482_v5 = vpop.eup %1481  ;;  %1495 = vtanh.f32 %v930_v2  ;;  %v806_v6 = vpop.f32.mrf.mxu0 }
 0x133   : > { %v934_v7 = vpop.f32.mrf.mxu1  ;;  %v1484_v8 = vpop.eup %1483  ;;  %1074 = vst.msk [vmem:[%s1749_s13 + $0x60] sm:$0xff] %vm1061_vm1, %v1482_v5  ;;  %v807_v9 = vadd.f32 %v1734_v11, %v806_v6 }
 0x134   : > { %v935_v10 = vadd.f32 %v1734_v11, %v934_v7  ;;  %1106 = vst.msk [vmem:[%s1749_s13 + $0x160] sm:$0xff] %vm1061_vm1, %v1484_v8  ;;  %v808_v12 = vpop.f32.mrf.mxu0 }
 0x135   : > { %v936_v13 = vpop.f32.mrf.mxu1  ;;  %1497 = vtanh.f32 %v807_v9 }
 0x136   : > { %v1486_v14 = vpop.eup %1485  ;;  %1499 = vtanh.f32 %v935_v10  ;;  %v809_v15 = vpop.f32.mrf.mxu0 }
 0x137   : > { %v937_v16 = vpop.f32.mrf.mxu1  ;;  %v1488_v17 = vpop.eup %1487  ;;  %1075 = vst.msk [vmem:[%s1749_s13 + $0x68] sm:$0xff] %vm1061_vm1, %v1486_v14  ;;  %v810_v18 = vadd.f32 %v1734_v11, %v809_v15 }
 0x138   : > { %v938_v19 = vadd.f32 %v1734_v11, %v937_v16  ;;  %1107 = vst.msk [vmem:[%s1749_s13 + $0x168] sm:$0xff] %vm1061_vm1, %v1488_v17  ;;  %v811_v20 = vpop.f32.mrf.mxu0 }
 0x139   : > { %v939_v21 = vpop.f32.mrf.mxu1  ;;  %1501 = vtanh.f32 %v810_v18 }
 0x13a   : > { %v1490_v22 = vpop.eup %1489  ;;  %1503 = vtanh.f32 %v938_v19  ;;  %v814_v23 = vpop.f32.mrf.mxu0 }
 0x13b   : > { %v942_v24 = vpop.f32.mrf.mxu1  ;;  %v1492_v25 = vpop.eup %1491  ;;  %1076 = vst.msk [vmem:[%s1749_s13 + $0x70] sm:$0xff] %vm1061_vm1, %v1490_v22  ;;  %v815_v26 = vadd.f32 %v1734_v11, %v814_v23 }
 0x13c   : > { %v943_v27 = vadd.f32 %v1734_v11, %v942_v24  ;;  %1108 = vst.msk [vmem:[%s1749_s13 + $0x170] sm:$0xff] %vm1061_vm1, %v1492_v25  ;;  %v816_v28 = vpop.f32.mrf.mxu0 }
 0x13d   : > { %v944_v29 = vpop.f32.mrf.mxu1  ;;  %1505 = vtanh.f32 %v815_v26 }
 0x13e   : > { %v1494_v30 = vpop.eup %1493  ;;  %1507 = vtanh.f32 %v943_v27  ;;  %v817_v31 = vpop.f32.mrf.mxu0 }
 0x13f   : > { %v945_v32 = vpop.f32.mrf.mxu1  ;;  %v1496_v33 = vpop.eup %1495  ;;  %1077 = vst.msk [vmem:[%s1749_s13 + $0x78] sm:$0xff] %vm1061_vm1, %v1494_v30  ;;  %v818_v34 = vadd.f32 %v1734_v11, %v817_v31 }
 0x140   : > { %v946_v35 = vadd.f32 %v1734_v11, %v945_v32  ;;  %1109 = vst.msk [vmem:[%s1749_s13 + $0x178] sm:$0xff] %vm1061_vm1, %v1496_v33  ;;  %v819_v36 = vpop.f32.mrf.mxu0 }
 0x141   : > { %v947_v37 = vpop.f32.mrf.mxu1  ;;  %1509 = vtanh.f32 %v818_v34 }
 0x142   : > { %v1498_v38 = vpop.eup %1497  ;;  %1511 = vtanh.f32 %v946_v35  ;;  %v822_v39 = vpop.f32.mrf.mxu0 }
 0x143   : > { %v950_v40 = vpop.f32.mrf.mxu1  ;;  %v1500_v41 = vpop.eup %1499  ;;  %1078 = vst.msk [vmem:[%s1749_s13 + $0x80] sm:$0xff] %vm1061_vm1, %v1498_v38  ;;  %v823_v42 = vadd.f32 %v1734_v11, %v822_v39 }
 0x144   : > { %v951_v43 = vadd.f32 %v1734_v11, %v950_v40  ;;  %1110 = vst.msk [vmem:[%s1749_s13 + $0x180] sm:$0xff] %vm1061_vm1, %v1500_v41  ;;  %v824_v44 = vpop.f32.mrf.mxu0 }
 0x145   : > { %v952_v45 = vpop.f32.mrf.mxu1  ;;  %1513 = vtanh.f32 %v823_v42 }
 0x146   : > { %v1502_v46 = vpop.eup %1501  ;;  %1515 = vtanh.f32 %v951_v43  ;;  %v825_v47 = vpop.f32.mrf.mxu0 }
 0x147   : > { %v953_v48 = vpop.f32.mrf.mxu1  ;;  %v1504_v49 = vpop.eup %1503  ;;  %1079 = vst.msk [vmem:[%s1749_s13 + $0x88] sm:$0xff] %vm1061_vm1, %v1502_v46  ;;  %v826_v50 = vadd.f32 %v1734_v11, %v825_v47 }
 0x148   : > { %v954_v51 = vadd.f32 %v1734_v11, %v953_v48  ;;  %1111 = vst.msk [vmem:[%s1749_s13 + $0x188] sm:$0xff] %vm1061_vm1, %v1504_v49  ;;  %v827_v52 = vpop.f32.mrf.mxu0 }
 0x149   : > { %v955_v53 = vpop.f32.mrf.mxu1  ;;  %1517 = vtanh.f32 %v826_v50 }
 0x14a   : > { %v1506_v54 = vpop.eup %1505  ;;  %1519 = vtanh.f32 %v954_v51  ;;  %v830_v55 = vpop.f32.mrf.mxu0 }
 0x14b   : > { %v958_v56 = vpop.f32.mrf.mxu1  ;;  %v1508_v57 = vpop.eup %1507  ;;  %1080 = vst.msk [vmem:[%s1749_s13 + $0x90] sm:$0xff] %vm1061_vm1, %v1506_v54  ;;  %v831_v58 = vadd.f32 %v1734_v11, %v830_v55 }
 0x14c   : > { %v959_v59 = vadd.f32 %v1734_v11, %v958_v56  ;;  %1112 = vst.msk [vmem:[%s1749_s13 + $0x190] sm:$0xff] %vm1061_vm1, %v1508_v57  ;;  %v832_v60 = vpop.f32.mrf.mxu0 }
 0x14d   : > { %v960_v61 = vpop.f32.mrf.mxu1  ;;  %1521 = vtanh.f32 %v831_v58 }
 0x14e   : > { %v1510_v62 = vpop.eup %1509  ;;  %1523 = vtanh.f32 %v959_v59  ;;  %v833_v63 = vpop.f32.mrf.mxu0 }
 0x14f   : > { %v961_v0 = vpop.f32.mrf.mxu1  ;;  %v1512_v1 = vpop.eup %1511  ;;  %1081 = vst.msk [vmem:[%s1749_s13 + $0x98] sm:$0xff] %vm1061_vm1, %v1510_v62  ;;  %v834_v2 = vadd.f32 %v1734_v11, %v833_v63 }
 0x150   : > { %v962_v3 = vadd.f32 %v1734_v11, %v961_v0  ;;  %1113 = vst.msk [vmem:[%s1749_s13 + $0x198] sm:$0xff] %vm1061_vm1, %v1512_v1  ;;  %v835_v4 = vpop.f32.mrf.mxu0 }
 0x151   : > { %v963_v5 = vpop.f32.mrf.mxu1  ;;  %1525 = vtanh.f32 %v834_v2 }
 0x152   : > { %v1514_v6 = vpop.eup %1513  ;;  %1527 = vtanh.f32 %v962_v3  ;;  %v838_v7 = vpop.f32.mrf.mxu0 }
 0x153   : > { %v966_v8 = vpop.f32.mrf.mxu1  ;;  %v1516_v9 = vpop.eup %1515  ;;  %1082 = vst.msk [vmem:[%s1749_s13 + $0xa0] sm:$0xff] %vm1061_vm1, %v1514_v6  ;;  %v839_v10 = vadd.f32 %v1734_v11, %v838_v7 }
 0x154   : > { %v967_v12 = vadd.f32 %v1734_v11, %v966_v8  ;;  %1114 = vst.msk [vmem:[%s1749_s13 + $0x1a0] sm:$0xff] %vm1061_vm1, %v1516_v9  ;;  %v840_v13 = vpop.f32.mrf.mxu0 }
 0x155   : > { %v968_v14 = vpop.f32.mrf.mxu1  ;;  %1529 = vtanh.f32 %v839_v10 }
 0x156   : > { %v1518_v15 = vpop.eup %1517  ;;  %1531 = vtanh.f32 %v967_v12  ;;  %v841_v16 = vpop.f32.mrf.mxu0 }
 0x157   : > { %v969_v17 = vpop.f32.mrf.mxu1  ;;  %v1520_v18 = vpop.eup %1519  ;;  %1083 = vst.msk [vmem:[%s1749_s13 + $0xa8] sm:$0xff] %vm1061_vm1, %v1518_v15  ;;  %v842_v19 = vadd.f32 %v1734_v11, %v841_v16 }
 0x158   : > { %v970_v20 = vadd.f32 %v1734_v11, %v969_v17  ;;  %1115 = vst.msk [vmem:[%s1749_s13 + $0x1a8] sm:$0xff] %vm1061_vm1, %v1520_v18  ;;  %v843_v21 = vpop.f32.mrf.mxu0 }
 0x159   : > { %v971_v22 = vpop.f32.mrf.mxu1  ;;  %1533 = vtanh.f32 %v842_v19 }
 0x15a   : > { %v1522_v23 = vpop.eup %1521  ;;  %1535 = vtanh.f32 %v970_v20  ;;  %v846_v24 = vpop.f32.mrf.mxu0 }
 0x15b   : > { %v974_v25 = vpop.f32.mrf.mxu1  ;;  %v1524_v26 = vpop.eup %1523  ;;  %1084 = vst.msk [vmem:[%s1749_s13 + $0xb0] sm:$0xff] %vm1061_vm1, %v1522_v23  ;;  %v847_v27 = vadd.f32 %v1734_v11, %v846_v24 }
 0x15c   : > { %v975_v28 = vadd.f32 %v1734_v11, %v974_v25  ;;  %1116 = vst.msk [vmem:[%s1749_s13 + $0x1b0] sm:$0xff] %vm1061_vm1, %v1524_v26  ;;  %v848_v29 = vpop.f32.mrf.mxu0 }
 0x15d   : > { %v976_v30 = vpop.f32.mrf.mxu1  ;;  %1537 = vtanh.f32 %v847_v27 }
 0x15e   : > { %v1526_v31 = vpop.eup %1525  ;;  %1539 = vtanh.f32 %v975_v28  ;;  %v849_v32 = vpop.f32.mrf.mxu0 }
 0x15f   : > { %v977_v33 = vpop.f32.mrf.mxu1  ;;  %v1528_v34 = vpop.eup %1527  ;;  %1085 = vst.msk [vmem:[%s1749_s13 + $0xb8] sm:$0xff] %vm1061_vm1, %v1526_v31  ;;  %v850_v35 = vadd.f32 %v1734_v11, %v849_v32 }
 0x160   : > { %v978_v36 = vadd.f32 %v1734_v11, %v977_v33  ;;  %1117 = vst.msk [vmem:[%s1749_s13 + $0x1b8] sm:$0xff] %vm1061_vm1, %v1528_v34  ;;  %v851_v37 = vpop.f32.mrf.mxu0 }
 0x161   : > { %v979_v38 = vpop.f32.mrf.mxu1  ;;  %1541 = vtanh.f32 %v850_v35 }
 0x162   : > { %v1530_v39 = vpop.eup %1529  ;;  %1543 = vtanh.f32 %v978_v36  ;;  %v854_v40 = vpop.f32.mrf.mxu0 }
 0x163   : > { %v982_v41 = vpop.f32.mrf.mxu1  ;;  %v1532_v42 = vpop.eup %1531  ;;  %1086 = vst.msk [vmem:[%s1749_s13 + $0xc0] sm:$0xff] %vm1061_vm1, %v1530_v39  ;;  %v855_v43 = vadd.f32 %v1734_v11, %v854_v40 }
 0x164   : > { %v983_v44 = vadd.f32 %v1734_v11, %v982_v41  ;;  %1118 = vst.msk [vmem:[%s1749_s13 + $0x1c0] sm:$0xff] %vm1061_vm1, %v1532_v42  ;;  %v856_v45 = vpop.f32.mrf.mxu0 }
 0x165   : > { %v984_v46 = vpop.f32.mrf.mxu1  ;;  %1545 = vtanh.f32 %v855_v43 }
 0x166   : > { %v1534_v47 = vpop.eup %1533  ;;  %1547 = vtanh.f32 %v983_v44  ;;  %v857_v48 = vpop.f32.mrf.mxu0 }
 0x167   : > { %v985_v49 = vpop.f32.mrf.mxu1  ;;  %v1536_v50 = vpop.eup %1535  ;;  %1087 = vst.msk [vmem:[%s1749_s13 + $0xc8] sm:$0xff] %vm1061_vm1, %v1534_v47  ;;  %v858_v51 = vadd.f32 %v1734_v11, %v857_v48 }
 0x168   : > { %v986_v52 = vadd.f32 %v1734_v11, %v985_v49  ;;  %1119 = vst.msk [vmem:[%s1749_s13 + $0x1c8] sm:$0xff] %vm1061_vm1, %v1536_v50  ;;  %v859_v53 = vpop.f32.mrf.mxu0 }
 0x169   : > { %v987_v54 = vpop.f32.mrf.mxu1  ;;  %1549 = vtanh.f32 %v858_v51 }
 0x16a   : > { %v1538_v55 = vpop.eup %1537  ;;  %1551 = vtanh.f32 %v986_v52  ;;  %v862_v56 = vpop.f32.mrf.mxu0 }
 0x16b   : > { %v990_v57 = vpop.f32.mrf.mxu1  ;;  %v1540_v58 = vpop.eup %1539  ;;  %1088 = vst.msk [vmem:[%s1749_s13 + $0xd0] sm:$0xff] %vm1061_vm1, %v1538_v55  ;;  %v863_v59 = vadd.f32 %v1734_v11, %v862_v56 }
 0x16c   : > { %v991_v60 = vadd.f32 %v1734_v11, %v990_v57  ;;  %1120 = vst.msk [vmem:[%s1749_s13 + $0x1d0] sm:$0xff] %vm1061_vm1, %v1540_v58  ;;  %v864_v61 = vpop.f32.mrf.mxu0 }
 0x16d   : > { %v992_v62 = vpop.f32.mrf.mxu1  ;;  %1553 = vtanh.f32 %v863_v59 }
 0x16e   : > { %v1542_v63 = vpop.eup %1541  ;;  %1555 = vtanh.f32 %v991_v60  ;;  %v865_v0 = vpop.f32.mrf.mxu0 }
 0x16f   : > { %v993_v1 = vpop.f32.mrf.mxu1  ;;  %v1544_v2 = vpop.eup %1543  ;;  %1089 = vst.msk [vmem:[%s1749_s13 + $0xd8] sm:$0xff] %vm1061_vm1, %v1542_v63  ;;  %v866_v3 = vadd.f32 %v1734_v11, %v865_v0 }
 0x170   : > { %v994_v4 = vadd.f32 %v1734_v11, %v993_v1  ;;  %1121 = vst.msk [vmem:[%s1749_s13 + $0x1d8] sm:$0xff] %vm1061_vm1, %v1544_v2  ;;  %v867_v5 = vpop.f32.mrf.mxu0 }
 0x171   : > { %v995_v6 = vpop.f32.mrf.mxu1  ;;  %1557 = vtanh.f32 %v866_v3 }
 0x172   : > { %v1546_v7 = vpop.eup %1545  ;;  %1559 = vtanh.f32 %v994_v4 }
 0x173   : > { %v1548_v8 = vpop.eup %1547  ;;  %1090 = vst.msk [vmem:[%s1749_s13 + $0xe0] sm:$0xff] %vm1061_vm1, %v1546_v7 }
 0x174   : > { %1122 = vst.msk [vmem:[%s1749_s13 + $0x1e0] sm:$0xff] %vm1061_vm1, %v1548_v8 }
 0x176   : > { %v1550_v9 = vpop.eup %1549 }
 0x177   : > { %v1552_v10 = vpop.eup %1551  ;;  %1091 = vst.msk [vmem:[%s1749_s13 + $0xe8] sm:$0xff] %vm1061_vm1, %v1550_v9 }
 0x178   : > { %1123 = vst.msk [vmem:[%s1749_s13 + $0x1e8] sm:$0xff] %vm1061_vm1, %v1552_v10 }
 0x17a   : > { %v1554_v11 = vpop.eup %1553 }
 0x17b   : > { %v1556_v12 = vpop.eup %1555  ;;  %1092 = vst.msk [vmem:[%s1749_s13 + $0xf0] sm:$0xff] %vm1061_vm1, %v1554_v11 }
 0x17c   : > { %1124 = vst.msk [vmem:[%s1749_s13 + $0x1f0] sm:$0xff] %vm1061_vm1, %v1556_v12 }
 0x17e   : > { %v1558_v13 = vpop.eup %1557 }
 0x17f   : > { %v1560_v14 = vpop.eup %1559  ;;  %1093 = vst.msk [vmem:[%s1749_s13 + $0xf8] sm:$0xff] %vm1061_vm1, %v1558_v13 }
 0x180   : > { %1125 = vst.msk [vmem:[%s1749_s13 + $0x1f8] sm:$0xff] %vm1061_vm1, %v1560_v14 }
 0x181 PF: > { %s15_s14 = sadd.s32 1, %s1567_s14  }
 0x182   : > { %p12_p4 = scmp.ge.s32.totalorder %s15_s14, 6  }
 0x184   :  { %14 = sbr.rel (!%p12_p4) target bundleno = 3 (0x3), region = 62 }

</bundles_post_ra>
